<compile_context>
chip_gen: v7x
topology: tpu7x:2x2x1
jax: 0.10.0
libtpu: 0.0.40
codegen_flags: <defaults>
</compile_context>

<pallas_src>
import functools

import jax
import jax.numpy as jnp
from jax import lax
from jax.experimental import pallas as pl
from jax.experimental.pallas import tpu as pltpu


# ---------------------------------------------------------------------------
# Pass 1 kernel: expand 1x1 + BN + Swish  ->  depthwise kxk + BN + Swish
#                -> SE global average pool
# ---------------------------------------------------------------------------

def _expand_dw_kernel(*refs, k, stride, expand, has_se):
    it = iter(refs)
    x_ref = next(it)                                    # (1, H, W, Cin)
    if expand:
        w_exp_ref = next(it)                            # (Cin, Cexp)
        s0_ref = next(it)                               # (1, Cexp)
        b0_ref = next(it)                               # (1, Cexp)
    w_dw_ref = next(it)                                 # (k, k, Cexp)
    s1_ref = next(it)                                   # (1, Cexp)
    b1_ref = next(it)                                   # (1, Cexp)
    dw_ref = next(it)                                   # out: (1, Ho, Wo, Cexp)
    pool_ref = next(it) if has_se else None             # out: (1, 1, Cexp)
    xpad_ref = next(it)                                 # scratch: (Hp, Wp, Cexp)

    _, H, W, Cin = x_ref.shape
    _, Ho, Wo, C = dw_ref.shape
    p = k // 2

    x = x_ref[0].astype(jnp.float32)                    # (H, W, Cin)
    if expand:
        y = jnp.dot(x.reshape(H * W, Cin), w_exp_ref[...],
                    preferred_element_type=jnp.float32)
        y = y * s0_ref[...] + b0_ref[...]
        y = y * jax.nn.sigmoid(y)                       # Swish
        xe = y.reshape(H, W, C)
    else:
        xe = x

    # Zero-pad the expanded activation entirely in VMEM scratch.
    xpad_ref[...] = jnp.zeros_like(xpad_ref)
    xpad_ref[p:p + H, p:p + W, :] = xe

    # Depthwise conv, computed directly at the requested stride.
    acc = jnp.zeros((Ho, Wo, C), jnp.float32)
    for kh in range(k):
        for kw in range(k):
            if stride == 1:
                patch = xpad_ref[kh:kh + Ho, kw:kw + Wo, :]
            else:
                # TODO(synk): strided pl.ds reads; path not exercised by the demo.
                patch = xpad_ref[pl.ds(kh, Ho, stride), pl.ds(kw, Wo, stride), :]
            acc = acc + patch * w_dw_ref[kh, kw, :]

    y = acc * s1_ref[0] + b1_ref[0]
    y = y * jax.nn.sigmoid(y)                           # Swish

    dw_ref[...] = y[None].astype(dw_ref.dtype)
    if has_se:
        pool_ref[...] = jnp.mean(y, axis=(0, 1)).reshape(1, 1, C)


# ---------------------------------------------------------------------------
# Pass 2 kernel: SE scale (from pooled vector) -> pointwise 1x1 + BN (+ skip)
# ---------------------------------------------------------------------------

def _se_pointwise_kernel(*refs, has_se, has_skip):
    it = iter(refs)
    x_ref = next(it)                                    # (1, tile_m, Cexp)
    if has_se:
        pool_ref = next(it)                             # (1, 1, Cexp)
        w1_ref = next(it)                               # (Cexp, Cred)
        b1_ref = next(it)                               # (1, Cred)
        w2_ref = next(it)                               # (Cred, Cexp)
        b2_ref = next(it)                               # (1, Cexp)
    w_pw_ref = next(it)                                 # (Cexp, Cout)
    s2_ref = next(it)                                   # (1, Cout)
    bias2_ref = next(it)                                # (1, Cout)
    id_ref = next(it) if has_skip else None             # (1, tile_m, Cout)
    o_ref = next(it)                                    # (1, tile_m, Cout)

    x = x_ref[0].astype(jnp.float32)                    # (tile_m, Cexp)
    if has_se:
        # Tiny SE FCs: recomputed per row tile (negligible vs the matmul below).
        pooled = pool_ref[0]                            # (1, Cexp)
        h = jnp.dot(pooled, w1_ref[...],
                    preferred_element_type=jnp.float32) + b1_ref[...]
        h = h * jax.nn.sigmoid(h)                       # Swish
        sc = jnp.dot(h, w2_ref[...],
                     preferred_element_type=jnp.float32) + b2_ref[...]
        sc = jax.nn.sigmoid(sc)                         # (1, Cexp)
        x = x * sc

    y = jnp.dot(x, w_pw_ref[...], preferred_element_type=jnp.float32)
    y = y * s2_ref[...] + bias2_ref[...]
    if has_skip:
        y = y + id_ref[0].astype(jnp.float32)
    o_ref[...] = y[None].astype(o_ref.dtype)


# ---------------------------------------------------------------------------
# Wrapper
# ---------------------------------------------------------------------------

def _pick_tile_m(m, cap=1024):
    """Largest row-tile <= cap that divides m and is sublane-aligned (mult of 8)."""
    if m <= cap:
        return m
    t = cap - cap % 8
    while t >= 8:
        if m % t == 0:
            return t
        t -= 8
    return m


def mbconv_forward(x_nchw, params, *, in_ch, out_ch, expand_ratio, kernel_size,
                   stride, se_ratio, act_dtype=jnp.float32, tile_m=None):
    """Eval-mode MBConvBlock forward. x_nchw: (N, in_ch, H, W) -> (N, out_ch, Ho, Wo)."""
    x = jnp.transpose(x_nchw, (0, 2, 3, 1)).astype(jnp.float32)   # NCHW -> NHWC
    N, H, W, _ = x.shape
    k = kernel_size
    p = k // 2
    s = stride
    Ho = (H + 2 * p - k) // s + 1
    Wo = (W + 2 * p - k) // s + 1
    c_exp = in_ch * expand_ratio
    expand = expand_ratio != 1
    has_se = se_ratio > 0
    has_skip = (in_ch == out_ch) and (s == 1)

    # ---------------- pass 1: expand + depthwise + SE pool ----------------
    in1 = [x]
    specs1 = [pl.BlockSpec((1, H, W, in_ch), lambda n: (n, 0, 0, 0))]
    if expand:
        in1 += [params["w_exp"], params["scale0"], params["bias0"]]
        specs1 += [pl.BlockSpec((in_ch, c_exp), lambda n: (0, 0)),
                   pl.BlockSpec((1, c_exp), lambda n: (0, 0)),
                   pl.BlockSpec((1, c_exp), lambda n: (0, 0))]
    in1 += [params["w_dw"], params["scale1"], params["bias1"]]
    specs1 += [pl.BlockSpec((k, k, c_exp), lambda n: (0, 0, 0)),
               pl.BlockSpec((1, c_exp), lambda n: (0, 0)),
               pl.BlockSpec((1, c_exp), lambda n: (0, 0))]

    out_shape1 = [jax.ShapeDtypeStruct((N, Ho, Wo, c_exp), act_dtype)]
    out_specs1 = [pl.BlockSpec((1, Ho, Wo, c_exp), lambda n: (n, 0, 0, 0))]
    if has_se:
        out_shape1.append(jax.ShapeDtypeStruct((N, 1, c_exp), jnp.float32))
        out_specs1.append(pl.BlockSpec((1, 1, c_exp), lambda n: (n, 0, 0)))

    outs1 = pl.pallas_call(
        functools.partial(_expand_dw_kernel, k=k, stride=s,
                          expand=expand, has_se=has_se),
        out_shape=tuple(out_shape1),
        grid=(N,),
        in_specs=specs1,
        out_specs=tuple(out_specs1),
        scratch_shapes=[pltpu.VMEM((H + 2 * p, W + 2 * p, c_exp), jnp.float32)],
        compiler_params=pltpu.CompilerParams(
            dimension_semantics=("parallel",)),
    )(*in1)
    x_dw = outs1[0]
    pooled = outs1[1] if has_se else None

    # ---------------- pass 2: SE scale + pointwise 1x1 + BN (+ skip) ------
    M = Ho * Wo
    if tile_m is None or M % tile_m != 0 or (tile_m != M and tile_m % 8 != 0):
        tile_m = _pick_tile_m(M)
    mt = M // tile_m

    x2 = x_dw.reshape(N, M, c_exp)
    in2 = [x2]
    specs2 = [pl.BlockSpec((1, tile_m, c_exp), lambda n, m: (n, m, 0))]
    if has_se:
        c_red = params["w_se1"].shape[1]
        in2 += [pooled, params["w_se1"], params["b_se1"],
                params["w_se2"], params["b_se2"]]
        specs2 += [pl.BlockSpec((1, 1, c_exp), lambda n, m: (n, 0, 0)),
                   pl.BlockSpec((c_exp, c_red), lambda n, m: (0, 0)),
                   pl.BlockSpec((1, c_red), lambda n, m: (0, 0)),
                   pl.BlockSpec((c_red, c_exp), lambda n, m: (0, 0)),
                   pl.BlockSpec((1, c_exp), lambda n, m: (0, 0))]
    in2 += [params["w_pw"], params["scale2"], params["bias2"]]
    specs2 += [pl.BlockSpec((c_exp, out_ch), lambda n, m: (0, 0)),
               pl.BlockSpec((1, out_ch), lambda n, m: (0, 0)),
               pl.BlockSpec((1, out_ch), lambda n, m: (0, 0))]
    aliases = {}
    if has_skip:
        identity = x.reshape(N, M, in_ch)
        in2.append(identity)
        specs2.append(pl.BlockSpec((1, tile_m, out_ch), lambda n, m: (n, m, 0)))
        aliases = {len(in2) - 1: 0}     # reuse the residual buffer as the output

    y = pl.pallas_call(
        functools.partial(_se_pointwise_kernel, has_se=has_se, has_skip=has_skip),
        out_shape=jax.ShapeDtypeStruct((N, M, out_ch), jnp.float32),
        grid=(N, mt),
        in_specs=specs2,
        out_specs=pl.BlockSpec((1, tile_m, out_ch), lambda n, m: (n, m, 0)),
        input_output_aliases=aliases,
        compiler_params=pltpu.CompilerParams(
            dimension_semantics=("parallel", "parallel")),
    )(*in2)

    y = y.reshape(N, Ho, Wo, out_ch)
    return jnp.transpose(y, (0, 3, 1, 2))               # NHWC -> NCHW


# ---------------------------------------------------------------------------
# Pure-JAX reference (for correctness checking)
# ---------------------------------------------------------------------------

def ref_forward(x_nchw, params, *, in_ch, out_ch, expand_ratio, kernel_size,
                stride, se_ratio):
    x = jnp.transpose(x_nchw, (0, 2, 3, 1)).astype(jnp.float32)
    identity = x
    if expand_ratio != 1:
        y = jnp.einsum("nhwc,cd->nhwd", x, params["w_exp"])
        y = y * params["scale0"][0] + params["bias0"][0]
        x = y * jax.nn.sigmoid(y)
    c_exp = x.shape[-1]
    k = kernel_size
    p = k // 2
    w_dw = params["w_dw"].reshape(k, k, 1, c_exp)
    x = lax.conv_general_dilated(
        x, w_dw, (stride, stride), [(p, p), (p, p)],
        dimension_numbers=("NHWC", "HWIO", "NHWC"), feature_group_count=c_exp)
    x = x * params["scale1"][0] + params["bias1"][0]
    x = x * jax.nn.sigmoid(x)
    if se_ratio > 0:
        pooled = jnp.mean(x, axis=(1, 2))
        h = pooled @ params["w_se1"] + params["b_se1"]
        h = h * jax.nn.sigmoid(h)
        s = jax.nn.sigmoid(h @ params["w_se2"] + params["b_se2"])
        x = x * s[:, None, None, :]
    y = jnp.einsum("nhwc,cd->nhwd", x, params["w_pw"])
    y = y * params["scale2"][0] + params["bias2"][0]
    if in_ch == out_ch and stride == 1:
        y = y + identity
    return jnp.transpose(y, (0, 3, 1, 2))


# ---------------------------------------------------------------------------
# Deterministic parameter construction (folded eval-mode BN)
# ---------------------------------------------------------------------------

def make_params(key, in_ch, out_ch, expand_ratio, kernel_size, se_ratio):
    c_exp = in_ch * expand_ratio
    c_red = max(1, int(in_ch * se_ratio))
    eps = 1e-5
    keys = jax.random.split(key, 20)

    def bn(kg, kb, km, kv, c):
        gamma = 1.0 + 0.1 * jax.random.normal(kg, (c,), jnp.float32)
        beta = 0.1 * jax.random.normal(kb, (c,), jnp.float32)
        mean = 0.05 * jax.random.normal(km, (c,), jnp.float32)
        var = 0.5 + jax.nn.sigmoid(jax.random.normal(kv, (c,), jnp.float32))
        scale = gamma / jnp.sqrt(var + eps)
        bias = beta - mean * scale
        return scale.reshape(1, c), bias.reshape(1, c)

    params = {}
    params["w_exp"] = 0.1 * jax.random.normal(keys[0], (in_ch, c_exp), jnp.float32)
    params["scale0"], params["bias0"] = bn(keys[1], keys[2], keys[3], keys[4], c_exp)
    params["w_dw"] = 0.1 * jax.random.normal(keys[5], (kernel_size, kernel_size, c_exp),
                                             jnp.float32)
    params["scale1"], params["bias1"] = bn(keys[6], keys[7], keys[8], keys[9], c_exp)
    params["w_se1"] = 0.1 * jax.random.normal(keys[10], (c_exp, c_red), jnp.float32)
    params["b_se1"] = 0.1 * jax.random.normal(keys[11], (1, c_red), jnp.float32)
    params["w_se2"] = 0.1 * jax.random.normal(keys[12], (c_red, c_exp), jnp.float32)
    params["b_se2"] = 0.1 * jax.random.normal(keys[13], (1, c_exp), jnp.float32)
    params["w_pw"] = 0.1 * jax.random.normal(keys[14], (c_exp, out_ch), jnp.float32)
    params["scale2"], params["bias2"] = bn(keys[15], keys[16], keys[17], keys[18], out_ch)
    return params


# ---------------------------------------------------------------------------
# Main
# ---------------------------------------------------------------------------

if __name__ == "__main__":
    in_ch, out_ch = 8, 8
    expand_ratio = 4
    kernel_size = 3
    stride = 1
    se_ratio = 0.25
    drop_connect_rate = 0.2   # eval mode -> no-op
    N, H, W = 2, 16, 16

    root = jax.random.PRNGKey(0)
    kx, kp = jax.random.split(root)
    x = jax.random.normal(kx, (N, in_ch, H, W), jnp.float32)
    params = make_params(kp, in_ch, out_ch, expand_ratio, kernel_size, se_ratio)

    cfg = dict(in_ch=in_ch, out_ch=out_ch, expand_ratio=expand_ratio,
               kernel_size=kernel_size, stride=stride, se_ratio=se_ratio)

    # tile_m=128 exercises the multi-tile row grid of pass 2 at this small size.
    fwd = jax.jit(functools.partial(mbconv_forward, tile_m=128, **cfg))
    out = jax.block_until_ready(fwd(x, params))

    ref = jax.block_until_ready(ref_forward(x, params, **cfg))

    assert out.shape == (N, out_ch, H, W), out.shape
    assert bool(jnp.all(jnp.isfinite(out)))
    assert bool(jnp.allclose(out, ref, rtol=1e-3, atol=1e-3)), \
        f"max abs err {float(jnp.max(jnp.abs(out - ref)))}"

    print("KERNEL_OK")
</pallas_src>

<mosaic_0001>
module attributes {stable_mosaic.version = 11 : i64} {
  func.func @_expand_dw_kernel(%arg0: i32, %arg1: memref<1x16x16x8xf32, #tpu.memory_space<vmem>>, %arg2: memref<8x32xf32, #tpu.memory_space<vmem>>, %arg3: memref<1x32xf32, #tpu.memory_space<vmem>>, %arg4: memref<1x32xf32, #tpu.memory_space<vmem>>, %arg5: memref<3x3x32xf32, #tpu.memory_space<vmem>>, %arg6: memref<1x32xf32, #tpu.memory_space<vmem>>, %arg7: memref<1x32xf32, #tpu.memory_space<vmem>>, %arg8: memref<1x16x16x32xf32, #tpu.memory_space<vmem>>, %arg9: memref<1x1x32xf32, #tpu.memory_space<vmem>>, %arg10: memref<18x18x32xf32, #tpu.memory_space<vmem>>) attributes {dimension_semantics = [#tpu.dimension_semantics<parallel>], iteration_bounds = array<i64: 2>, scalar_prefetch = 0 : i64, scratch_operands = 1 : i64, tpu.core_type = #tpu.core_type<tc>, window_params = [{transform_indices = @transform_0, window_bounds = array<i64: 1, 16, 16, 8>}, {pipeline_mode = #tpu.pipeline_mode<synchronous>, transform_indices = @transform_1, window_bounds = array<i64: 8, 32>}, {pipeline_mode = #tpu.pipeline_mode<synchronous>, transform_indices = @transform_2, window_bounds = array<i64: 1, 32>}, {pipeline_mode = #tpu.pipeline_mode<synchronous>, transform_indices = @transform_3, window_bounds = array<i64: 1, 32>}, {pipeline_mode = #tpu.pipeline_mode<synchronous>, transform_indices = @transform_4, window_bounds = array<i64: 3, 3, 32>}, {pipeline_mode = #tpu.pipeline_mode<synchronous>, transform_indices = @transform_5, window_bounds = array<i64: 1, 32>}, {pipeline_mode = #tpu.pipeline_mode<synchronous>, transform_indices = @transform_6, window_bounds = array<i64: 1, 32>}, {transform_indices = @transform_7, window_bounds = array<i64: 1, 16, 16, 32>}, {transform_indices = @transform_8, window_bounds = array<i64: 1, 1, 32>}]} {
    %c0 = arith.constant 0 : index
    %c0_0 = arith.constant 0 : index
    %c0_1 = arith.constant 0 : index
    %c0_2 = arith.constant 0 : index
    %0 = vector.load %arg1[%c0, %c0_0, %c0_1, %c0_2] : memref<1x16x16x8xf32, #tpu.memory_space<vmem>>, vector<1x16x16x8xf32>
    %1 = vector.shape_cast %0 : vector<1x16x16x8xf32> to vector<16x16x8xf32>
    %2 = vector.shape_cast %1 : vector<16x16x8xf32> to vector<256x8xf32>
    %c0_3 = arith.constant 0 : index
    %c0_4 = arith.constant 0 : index
    %3 = vector.load %arg2[%c0_3, %c0_4] : memref<8x32xf32, #tpu.memory_space<vmem>>, vector<8x32xf32>
    %cst = arith.constant dense<0.000000e+00> : vector<256x32xf32>
    %4 = tpu.matmul %2, %3, %cst {dimension_numbers = #tpu.dot_dimension_numbers<[1], [0], [0], [1], [0, 0, 1, 1], [], []>} : vector<256x8xf32>, vector<8x32xf32>, vector<256x32xf32> -> vector<256x32xf32>
    %c0_5 = arith.constant 0 : index
    %c0_6 = arith.constant 0 : index
    %5 = vector.load %arg3[%c0_5, %c0_6] : memref<1x32xf32, #tpu.memory_space<vmem>>, vector<1x32xf32>
    %6 = vector.broadcast %5 : vector<1x32xf32> to vector<256x32xf32>
    %7 = arith.mulf %4, %6 : vector<256x32xf32>
    %c0_7 = arith.constant 0 : index
    %c0_8 = arith.constant 0 : index
    %8 = vector.load %arg4[%c0_7, %c0_8] : memref<1x32xf32, #tpu.memory_space<vmem>>, vector<1x32xf32>
    %9 = vector.broadcast %8 : vector<1x32xf32> to vector<256x32xf32>
    %10 = arith.addf %7, %9 : vector<256x32xf32>
    %11 = arith.negf %10 : vector<256x32xf32>
    %12 = math.exp %11 : vector<256x32xf32>
    %cst_9 = arith.constant 1.000000e+00 : f32
    %13 = vector.broadcast %cst_9 : f32 to vector<256x32xf32>
    %14 = arith.addf %13, %12 : vector<256x32xf32>
    %15 = arith.divf %13, %14 : vector<256x32xf32>
    %16 = arith.mulf %10, %15 : vector<256x32xf32>
    %17 = vector.shape_cast %16 : vector<256x32xf32> to vector<16x16x32xf32>
    %cst_10 = arith.constant 0.000000e+00 : f32
    %18 = vector.broadcast %cst_10 : f32 to vector<18x18x32xf32>
    %c0_11 = arith.constant 0 : index
    %c0_12 = arith.constant 0 : index
    %c0_13 = arith.constant 0 : index
    %19 = vector.load %arg10[%c0_11, %c0_12, %c0_13] : memref<18x18x32xf32, #tpu.memory_space<vmem>>, vector<18x18x32xf32>
    tpu.vector_store %arg10[%c0_11, %c0_12, %c0_13], %18 {strides = array<i32>} : memref<18x18x32xf32, #tpu.memory_space<vmem>>, vector<18x18x32xf32>,
    %c1 = arith.constant 1 : index
    %c1_14 = arith.constant 1 : index
    %c0_15 = arith.constant 0 : index
    %20 = vector.load %arg10[%c1, %c1_14, %c0_15] : memref<18x18x32xf32, #tpu.memory_space<vmem>>, vector<16x16x32xf32>
    tpu.vector_store %arg10[%c1, %c1_14, %c0_15], %17 {strides = array<i32>} : memref<18x18x32xf32, #tpu.memory_space<vmem>>, vector<16x16x32xf32>,
    %cst_16 = arith.constant 0.000000e+00 : f32
    %21 = vector.broadcast %cst_16 : f32 to vector<16x16x32xf32>
    %c0_17 = arith.constant 0 : index
    %c0_18 = arith.constant 0 : index
    %c0_19 = arith.constant 0 : index
    %22 = vector.load %arg10[%c0_17, %c0_18, %c0_19] : memref<18x18x32xf32, #tpu.memory_space<vmem>>, vector<16x16x32xf32>
    %c0_20 = arith.constant 0 : index
    %c0_21 = arith.constant 0 : index
    %c0_22 = arith.constant 0 : index
    %23 = vector.load %arg5[%c0_20, %c0_21, %c0_22] : memref<3x3x32xf32, #tpu.memory_space<vmem>>, vector<1x1x32xf32>
    %24 = vector.shape_cast %23 : vector<1x1x32xf32> to vector<32xf32>
    %25 = vector.shape_cast %24 : vector<32xf32> to vector<1x1x32xf32>
    %26 = vector.broadcast %25 : vector<1x1x32xf32> to vector<16x16x32xf32>
    %27 = arith.mulf %22, %26 : vector<16x16x32xf32>
    %28 = arith.addf %21, %27 : vector<16x16x32xf32>
    %c0_23 = arith.constant 0 : index
    %c1_24 = arith.constant 1 : index
    %c0_25 = arith.constant 0 : index
    %29 = vector.load %arg10[%c0_23, %c1_24, %c0_25] : memref<18x18x32xf32, #tpu.memory_space<vmem>>, vector<16x16x32xf32>
    %c0_26 = arith.constant 0 : index
    %c1_27 = arith.constant 1 : index
    %c0_28 = arith.constant 0 : index
    %30 = vector.load %arg5[%c0_26, %c1_27, %c0_28] : memref<3x3x32xf32, #tpu.memory_space<vmem>>, vector<1x1x32xf32>
    %31 = vector.shape_cast %30 : vector<1x1x32xf32> to vector<32xf32>
    %32 = vector.shape_cast %31 : vector<32xf32> to vector<1x1x32xf32>
    %33 = vector.broadcast %32 : vector<1x1x32xf32> to vector<16x16x32xf32>
    %34 = arith.mulf %29, %33 : vector<16x16x32xf32>
    %35 = arith.addf %28, %34 : vector<16x16x32xf32>
    %c0_29 = arith.constant 0 : index
    %c2 = arith.constant 2 : index
    %c0_30 = arith.constant 0 : index
    %36 = vector.load %arg10[%c0_29, %c2, %c0_30] : memref<18x18x32xf32, #tpu.memory_space<vmem>>, vector<16x16x32xf32>
    %c0_31 = arith.constant 0 : index
    %c2_32 = arith.constant 2 : index
    %c0_33 = arith.constant 0 : index
    %37 = vector.load %arg5[%c0_31, %c2_32, %c0_33] : memref<3x3x32xf32, #tpu.memory_space<vmem>>, vector<1x1x32xf32>
    %38 = vector.shape_cast %37 : vector<1x1x32xf32> to vector<32xf32>
    %39 = vector.shape_cast %38 : vector<32xf32> to vector<1x1x32xf32>
    %40 = vector.broadcast %39 : vector<1x1x32xf32> to vector<16x16x32xf32>
    %41 = arith.mulf %36, %40 : vector<16x16x32xf32>
    %42 = arith.addf %35, %41 : vector<16x16x32xf32>
    %c1_34 = arith.constant 1 : index
    %c0_35 = arith.constant 0 : index
    %c0_36 = arith.constant 0 : index
    %43 = vector.load %arg10[%c1_34, %c0_35, %c0_36] : memref<18x18x32xf32, #tpu.memory_space<vmem>>, vector<16x16x32xf32>
    %c1_37 = arith.constant 1 : index
    %c0_38 = arith.constant 0 : index
    %c0_39 = arith.constant 0 : index
    %44 = vector.load %arg5[%c1_37, %c0_38, %c0_39] : memref<3x3x32xf32, #tpu.memory_space<vmem>>, vector<1x1x32xf32>
    %45 = vector.shape_cast %44 : vector<1x1x32xf32> to vector<32xf32>
    %46 = vector.shape_cast %45 : vector<32xf32> to vector<1x1x32xf32>
    %47 = vector.broadcast %46 : vector<1x1x32xf32> to vector<16x16x32xf32>
    %48 = arith.mulf %43, %47 : vector<16x16x32xf32>
    %49 = arith.addf %42, %48 : vector<16x16x32xf32>
    %c1_40 = arith.constant 1 : index
    %c1_41 = arith.constant 1 : index
    %c0_42 = arith.constant 0 : index
    %50 = vector.load %arg10[%c1_40, %c1_41, %c0_42] : memref<18x18x32xf32, #tpu.memory_space<vmem>>, vector<16x16x32xf32>
    %c1_43 = arith.constant 1 : index
    %c1_44 = arith.constant 1 : index
    %c0_45 = arith.constant 0 : index
    %51 = vector.load %arg5[%c1_43, %c1_44, %c0_45] : memref<3x3x32xf32, #tpu.memory_space<vmem>>, vector<1x1x32xf32>
    %52 = vector.shape_cast %51 : vector<1x1x32xf32> to vector<32xf32>
    %53 = vector.shape_cast %52 : vector<32xf32> to vector<1x1x32xf32>
    %54 = vector.broadcast %53 : vector<1x1x32xf32> to vector<16x16x32xf32>
    %55 = arith.mulf %50, %54 : vector<16x16x32xf32>
    %56 = arith.addf %49, %55 : vector<16x16x32xf32>
    %c1_46 = arith.constant 1 : index
    %c2_47 = arith.constant 2 : index
    %c0_48 = arith.constant 0 : index
    %57 = vector.load %arg10[%c1_46, %c2_47, %c0_48] : memref<18x18x32xf32, #tpu.memory_space<vmem>>, vector<16x16x32xf32>
    %c1_49 = arith.constant 1 : index
    %c2_50 = arith.constant 2 : index
    %c0_51 = arith.constant 0 : index
    %58 = vector.load %arg5[%c1_49, %c2_50, %c0_51] : memref<3x3x32xf32, #tpu.memory_space<vmem>>, vector<1x1x32xf32>
    %59 = vector.shape_cast %58 : vector<1x1x32xf32> to vector<32xf32>
    %60 = vector.shape_cast %59 : vector<32xf32> to vector<1x1x32xf32>
    %61 = vector.broadcast %60 : vector<1x1x32xf32> to vector<16x16x32xf32>
    %62 = arith.mulf %57, %61 : vector<16x16x32xf32>
    %63 = arith.addf %56, %62 : vector<16x16x32xf32>
    %c2_52 = arith.constant 2 : index
    %c0_53 = arith.constant 0 : index
    %c0_54 = arith.constant 0 : index
    %64 = vector.load %arg10[%c2_52, %c0_53, %c0_54] : memref<18x18x32xf32, #tpu.memory_space<vmem>>, vector<16x16x32xf32>
    %c2_55 = arith.constant 2 : index
    %c0_56 = arith.constant 0 : index
    %c0_57 = arith.constant 0 : index
    %65 = vector.load %arg5[%c2_55, %c0_56, %c0_57] : memref<3x3x32xf32, #tpu.memory_space<vmem>>, vector<1x1x32xf32>
    %66 = vector.shape_cast %65 : vector<1x1x32xf32> to vector<32xf32>
    %67 = vector.shape_cast %66 : vector<32xf32> to vector<1x1x32xf32>
    %68 = vector.broadcast %67 : vector<1x1x32xf32> to vector<16x16x32xf32>
    %69 = arith.mulf %64, %68 : vector<16x16x32xf32>
    %70 = arith.addf %63, %69 : vector<16x16x32xf32>
    %c2_58 = arith.constant 2 : index
    %c1_59 = arith.constant 1 : index
    %c0_60 = arith.constant 0 : index
    %71 = vector.load %arg10[%c2_58, %c1_59, %c0_60] : memref<18x18x32xf32, #tpu.memory_space<vmem>>, vector<16x16x32xf32>
    %c2_61 = arith.constant 2 : index
    %c1_62 = arith.constant 1 : index
    %c0_63 = arith.constant 0 : index
    %72 = vector.load %arg5[%c2_61, %c1_62, %c0_63] : memref<3x3x32xf32, #tpu.memory_space<vmem>>, vector<1x1x32xf32>
    %73 = vector.shape_cast %72 : vector<1x1x32xf32> to vector<32xf32>
    %74 = vector.shape_cast %73 : vector<32xf32> to vector<1x1x32xf32>
    %75 = vector.broadcast %74 : vector<1x1x32xf32> to vector<16x16x32xf32>
    %76 = arith.mulf %71, %75 : vector<16x16x32xf32>
    %77 = arith.addf %70, %76 : vector<16x16x32xf32>
    %c2_64 = arith.constant 2 : index
    %c2_65 = arith.constant 2 : index
    %c0_66 = arith.constant 0 : index
    %78 = vector.load %arg10[%c2_64, %c2_65, %c0_66] : memref<18x18x32xf32, #tpu.memory_space<vmem>>, vector<16x16x32xf32>
    %c2_67 = arith.constant 2 : index
    %c2_68 = arith.constant 2 : index
    %c0_69 = arith.constant 0 : index
    %79 = vector.load %arg5[%c2_67, %c2_68, %c0_69] : memref<3x3x32xf32, #tpu.memory_space<vmem>>, vector<1x1x32xf32>
    %80 = vector.shape_cast %79 : vector<1x1x32xf32> to vector<32xf32>
    %81 = vector.shape_cast %80 : vector<32xf32> to vector<1x1x32xf32>
    %82 = vector.broadcast %81 : vector<1x1x32xf32> to vector<16x16x32xf32>
    %83 = arith.mulf %78, %82 : vector<16x16x32xf32>
    %84 = arith.addf %77, %83 : vector<16x16x32xf32>
    %c0_70 = arith.constant 0 : index
    %c0_71 = arith.constant 0 : index
    %85 = vector.load %arg6[%c0_70, %c0_71] : memref<1x32xf32, #tpu.memory_space<vmem>>, vector<1x32xf32>
    %86 = vector.shape_cast %85 : vector<1x32xf32> to vector<32xf32>
    %87 = vector.shape_cast %86 : vector<32xf32> to vector<1x1x32xf32>
    %88 = vector.broadcast %87 : vector<1x1x32xf32> to vector<16x16x32xf32>
    %89 = arith.mulf %84, %88 : vector<16x16x32xf32>
    %c0_72 = arith.constant 0 : index
    %c0_73 = arith.constant 0 : index
    %90 = vector.load %arg7[%c0_72, %c0_73] : memref<1x32xf32, #tpu.memory_space<vmem>>, vector<1x32xf32>
    %91 = vector.shape_cast %90 : vector<1x32xf32> to vector<32xf32>
    %92 = vector.shape_cast %91 : vector<32xf32> to vector<1x1x32xf32>
    %93 = vector.broadcast %92 : vector<1x1x32xf32> to vector<16x16x32xf32>
    %94 = arith.addf %89, %93 : vector<16x16x32xf32>
    %95 = arith.negf %94 : vector<16x16x32xf32>
    %96 = math.exp %95 : vector<16x16x32xf32>
    %cst_74 = arith.constant 1.000000e+00 : f32
    %97 = vector.broadcast %cst_74 : f32 to vector<16x16x32xf32>
    %98 = arith.addf %97, %96 : vector<16x16x32xf32>
    %99 = arith.divf %97, %98 : vector<16x16x32xf32>
    %100 = arith.mulf %94, %99 : vector<16x16x32xf32>
    %101 = vector.shape_cast %100 : vector<16x16x32xf32> to vector<1x16x16x32xf32>
    %c0_75 = arith.constant 0 : index
    %c0_76 = arith.constant 0 : index
    %c0_77 = arith.constant 0 : index
    %c0_78 = arith.constant 0 : index
    %102 = vector.load %arg8[%c0_75, %c0_76, %c0_77, %c0_78] : memref<1x16x16x32xf32, #tpu.memory_space<vmem>>, vector<1x16x16x32xf32>
    tpu.vector_store %arg8[%c0_75, %c0_76, %c0_77, %c0_78], %101 {strides = array<i32>} : memref<1x16x16x32xf32, #tpu.memory_space<vmem>>, vector<1x16x16x32xf32>,
    %cst_79 = arith.constant dense<0.000000e+00> : vector<32xf32>
    %103 = vector.multi_reduction <add>, %100, %cst_79 [0, 1] : vector<16x16x32xf32> to vector<32xf32>
    %cst_80 = arith.constant 2.560000e+02 : f32
    %104 = vector.broadcast %cst_80 : f32 to vector<32xf32>
    %105 = arith.divf %103, %104 : vector<32xf32>
    %106 = vector.shape_cast %105 : vector<32xf32> to vector<1x1x32xf32>
    %c0_81 = arith.constant 0 : index
    %c0_82 = arith.constant 0 : index
    %c0_83 = arith.constant 0 : index
    %107 = vector.load %arg9[%c0_81, %c0_82, %c0_83] : memref<1x1x32xf32, #tpu.memory_space<vmem>>, vector<1x1x32xf32>
    tpu.vector_store %arg9[%c0_81, %c0_82, %c0_83], %106 {strides = array<i32>} : memref<1x1x32xf32, #tpu.memory_space<vmem>>, vector<1x1x32xf32>,
    return
  }
  func.func @transform_0(%arg0: i32) -> (i32, i32, i32, i32) {
    %c0_i32 = arith.constant 0 : i32
    %c0_i32_0 = arith.constant 0 : i32
    %c0_i32_1 = arith.constant 0 : i32
    %c0_i32_2 = arith.constant 0 : i32
    return %arg0, %c0_i32, %c0_i32_0, %c0_i32_1 : i32, i32, i32, i32
  }
  func.func @transform_1(%arg0: i32) -> (i32, i32) {
    %c0_i32 = arith.constant 0 : i32
    %c0_i32_0 = arith.constant 0 : i32
    %c0_i32_1 = arith.constant 0 : i32
    return %c0_i32, %c0_i32_0 : i32, i32
  }
  func.func @transform_2(%arg0: i32) -> (i32, i32) {
    %c0_i32 = arith.constant 0 : i32
    %c0_i32_0 = arith.constant 0 : i32
    %c0_i32_1 = arith.constant 0 : i32
    return %c0_i32, %c0_i32_0 : i32, i32
  }
  func.func @transform_3(%arg0: i32) -> (i32, i32) {
    %c0_i32 = arith.constant 0 : i32
    %c0_i32_0 = arith.constant 0 : i32
    %c0_i32_1 = arith.constant 0 : i32
    return %c0_i32, %c0_i32_0 : i32, i32
  }
  func.func @transform_4(%arg0: i32) -> (i32, i32, i32) {
    %c0_i32 = arith.constant 0 : i32
    %c0_i32_0 = arith.constant 0 : i32
    %c0_i32_1 = arith.constant 0 : i32
    %c0_i32_2 = arith.constant 0 : i32
    return %c0_i32, %c0_i32_0, %c0_i32_1 : i32, i32, i32
  }
  func.func @transform_5(%arg0: i32) -> (i32, i32) {
    %c0_i32 = arith.constant 0 : i32
    %c0_i32_0 = arith.constant 0 : i32
    %c0_i32_1 = arith.constant 0 : i32
    return %c0_i32, %c0_i32_0 : i32, i32
  }
  func.func @transform_6(%arg0: i32) -> (i32, i32) {
    %c0_i32 = arith.constant 0 : i32
    %c0_i32_0 = arith.constant 0 : i32
    %c0_i32_1 = arith.constant 0 : i32
    return %c0_i32, %c0_i32_0 : i32, i32
  }
  func.func @transform_7(%arg0: i32) -> (i32, i32, i32, i32) {
    %c0_i32 = arith.constant 0 : i32
    %c0_i32_0 = arith.constant 0 : i32
    %c0_i32_1 = arith.constant 0 : i32
    %c0_i32_2 = arith.constant 0 : i32
    return %arg0, %c0_i32, %c0_i32_0, %c0_i32_1 : i32, i32, i32, i32
  }
  func.func @transform_8(%arg0: i32) -> (i32, i32, i32) {
    %c0_i32 = arith.constant 0 : i32
    %c0_i32_0 = arith.constant 0 : i32
    %c0_i32_1 = arith.constant 0 : i32
    return %arg0, %c0_i32, %c0_i32_0 : i32, i32, i32
  }
}

module attributes {stable_mosaic.version = 11 : i64} {
  func.func @_se_pointwise_kernel(%arg0: i32, %arg1: i32, %arg2: memref<1x128x32xf32, #tpu.memory_space<vmem>>, %arg3: memref<1x1x32xf32, #tpu.memory_space<vmem>>, %arg4: memref<32x2xf32, #tpu.memory_space<vmem>>, %arg5: memref<1x2xf32, #tpu.memory_space<vmem>>, %arg6: memref<2x32xf32, #tpu.memory_space<vmem>>, %arg7: memref<1x32xf32, #tpu.memory_space<vmem>>, %arg8: memref<32x8xf32, #tpu.memory_space<vmem>>, %arg9: memref<1x8xf32, #tpu.memory_space<vmem>>, %arg10: memref<1x8xf32, #tpu.memory_space<vmem>>, %arg11: memref<1x128x8xf32, #tpu.memory_space<vmem>>, %arg12: memref<1x128x8xf32, #tpu.memory_space<vmem>>) attributes {dimension_semantics = [#tpu.dimension_semantics<parallel>, #tpu.dimension_semantics<parallel>], iteration_bounds = array<i64: 2, 2>, scalar_prefetch = 0 : i64, scratch_operands = 0 : i64, tpu.core_type = #tpu.core_type<tc>, window_params = [{transform_indices = @transform_0, window_bounds = array<i64: 1, 128, 32>}, {transform_indices = @transform_1, window_bounds = array<i64: 1, 1, 32>}, {pipeline_mode = #tpu.pipeline_mode<synchronous>, transform_indices = @transform_2, window_bounds = array<i64: 32, 2>}, {pipeline_mode = #tpu.pipeline_mode<synchronous>, transform_indices = @transform_3, window_bounds = array<i64: 1, 2>}, {pipeline_mode = #tpu.pipeline_mode<synchronous>, transform_indices = @transform_4, window_bounds = array<i64: 2, 32>}, {pipeline_mode = #tpu.pipeline_mode<synchronous>, transform_indices = @transform_5, window_bounds = array<i64: 1, 32>}, {pipeline_mode = #tpu.pipeline_mode<synchronous>, transform_indices = @transform_6, window_bounds = array<i64: 32, 8>}, {pipeline_mode = #tpu.pipeline_mode<synchronous>, transform_indices = @transform_7, window_bounds = array<i64: 1, 8>}, {pipeline_mode = #tpu.pipeline_mode<synchronous>, transform_indices = @transform_8, window_bounds = array<i64: 1, 8>}, {transform_indices = @transform_9, window_bounds = array<i64: 1, 128, 8>}, {transform_indices = @transform_10, window_bounds = array<i64: 1, 128, 8>}]} {
    %c0 = arith.constant 0 : index
    %c0_0 = arith.constant 0 : index
    %c0_1 = arith.constant 0 : index
    %0 = vector.load %arg2[%c0, %c0_0, %c0_1] : memref<1x128x32xf32, #tpu.memory_space<vmem>>, vector<1x128x32xf32>
    %1 = vector.shape_cast %0 : vector<1x128x32xf32> to vector<128x32xf32>
    %c0_2 = arith.constant 0 : index
    %c0_3 = arith.constant 0 : index
    %c0_4 = arith.constant 0 : index
    %2 = vector.load %arg3[%c0_2, %c0_3, %c0_4] : memref<1x1x32xf32, #tpu.memory_space<vmem>>, vector<1x1x32xf32>
    %3 = vector.shape_cast %2 : vector<1x1x32xf32> to vector<1x32xf32>
    %c0_5 = arith.constant 0 : index
    %c0_6 = arith.constant 0 : index
    %4 = vector.load %arg4[%c0_5, %c0_6] : memref<32x2xf32, #tpu.memory_space<vmem>>, vector<32x2xf32>
    %cst = arith.constant dense<0.000000e+00> : vector<1x2xf32>
    %5 = tpu.matmul %3, %4, %cst {dimension_numbers = #tpu.dot_dimension_numbers<[1], [0], [0], [1], [0, 0, 1, 1], [], []>} : vector<1x32xf32>, vector<32x2xf32>, vector<1x2xf32> -> vector<1x2xf32>
    %c0_7 = arith.constant 0 : index
    %c0_8 = arith.constant 0 : index
    %6 = vector.load %arg5[%c0_7, %c0_8] : memref<1x2xf32, #tpu.memory_space<vmem>>, vector<1x2xf32>
    %7 = arith.addf %5, %6 : vector<1x2xf32>
    %8 = arith.negf %7 : vector<1x2xf32>
    %9 = math.exp %8 : vector<1x2xf32>
    %cst_9 = arith.constant 1.000000e+00 : f32
    %10 = vector.broadcast %cst_9 : f32 to vector<1x2xf32>
    %11 = arith.addf %10, %9 : vector<1x2xf32>
    %12 = arith.divf %10, %11 : vector<1x2xf32>
    %13 = arith.mulf %7, %12 : vector<1x2xf32>
    %c0_10 = arith.constant 0 : index
    %c0_11 = arith.constant 0 : index
    %14 = vector.load %arg6[%c0_10, %c0_11] : memref<2x32xf32, #tpu.memory_space<vmem>>, vector<2x32xf32>
    %cst_12 = arith.constant dense<0.000000e+00> : vector<1x32xf32>
    %15 = tpu.matmul %13, %14, %cst_12 {dimension_numbers = #tpu.dot_dimension_numbers<[1], [0], [0], [1], [0, 0, 1, 1], [], []>} : vector<1x2xf32>, vector<2x32xf32>, vector<1x32xf32> -> vector<1x32xf32>
    %c0_13 = arith.constant 0 : index
    %c0_14 = arith.constant 0 : index
    %16 = vector.load %arg7[%c0_13, %c0_14] : memref<1x32xf32, #tpu.memory_space<vmem>>, vector<1x32xf32>
    %17 = arith.addf %15, %16 : vector<1x32xf32>
    %18 = arith.negf %17 : vector<1x32xf32>
    %19 = math.exp %18 : vector<1x32xf32>
    %cst_15 = arith.constant 1.000000e+00 : f32
    %20 = vector.broadcast %cst_15 : f32 to vector<1x32xf32>
    %21 = arith.addf %20, %19 : vector<1x32xf32>
    %22 = arith.divf %20, %21 : vector<1x32xf32>
    %23 = vector.broadcast %22 : vector<1x32xf32> to vector<128x32xf32>
    %24 = arith.mulf %1, %23 : vector<128x32xf32>
    %c0_16 = arith.constant 0 : index
    %c0_17 = arith.constant 0 : index
    %25 = vector.load %arg8[%c0_16, %c0_17] : memref<32x8xf32, #tpu.memory_space<vmem>>, vector<32x8xf32>
    %cst_18 = arith.constant dense<0.000000e+00> : vector<128x8xf32>
    %26 = tpu.matmul %24, %25, %cst_18 {dimension_numbers = #tpu.dot_dimension_numbers<[1], [0], [0], [1], [0, 0, 1, 1], [], []>} : vector<128x32xf32>, vector<32x8xf32>, vector<128x8xf32> -> vector<128x8xf32>
    %c0_19 = arith.constant 0 : index
    %c0_20 = arith.constant 0 : index
    %27 = vector.load %arg9[%c0_19, %c0_20] : memref<1x8xf32, #tpu.memory_space<vmem>>, vector<1x8xf32>
    %28 = vector.broadcast %27 : vector<1x8xf32> to vector<128x8xf32>
    %29 = arith.mulf %26, %28 : vector<128x8xf32>
    %c0_21 = arith.constant 0 : index
    %c0_22 = arith.constant 0 : index
    %30 = vector.load %arg10[%c0_21, %c0_22] : memref<1x8xf32, #tpu.memory_space<vmem>>, vector<1x8xf32>
    %31 = vector.broadcast %30 : vector<1x8xf32> to vector<128x8xf32>
    %32 = arith.addf %29, %31 : vector<128x8xf32>
    %c0_23 = arith.constant 0 : index
    %c0_24 = arith.constant 0 : index
    %c0_25 = arith.constant 0 : index
    %33 = vector.load %arg11[%c0_23, %c0_24, %c0_25] : memref<1x128x8xf32, #tpu.memory_space<vmem>>, vector<1x128x8xf32>
    %34 = vector.shape_cast %33 : vector<1x128x8xf32> to vector<128x8xf32>
    %35 = arith.addf %32, %34 : vector<128x8xf32>
    %36 = vector.shape_cast %35 : vector<128x8xf32> to vector<1x128x8xf32>
    %c0_26 = arith.constant 0 : index
    %c0_27 = arith.constant 0 : index
    %c0_28 = arith.constant 0 : index
    %37 = vector.load %arg12[%c0_26, %c0_27, %c0_28] : memref<1x128x8xf32, #tpu.memory_space<vmem>>, vector<1x128x8xf32>
    tpu.vector_store %arg12[%c0_26, %c0_27, %c0_28], %36 {strides = array<i32>} : memref<1x128x8xf32, #tpu.memory_space<vmem>>, vector<1x128x8xf32>,
    return
  }
  func.func @transform_0(%arg0: i32, %arg1: i32) -> (i32, i32, i32) {
    %c0_i32 = arith.constant 0 : i32
    %c0_i32_0 = arith.constant 0 : i32
    return %arg0, %arg1, %c0_i32 : i32, i32, i32
  }
  func.func @transform_1(%arg0: i32, %arg1: i32) -> (i32, i32, i32) {
    %c0_i32 = arith.constant 0 : i32
    %c0_i32_0 = arith.constant 0 : i32
    %c0_i32_1 = arith.constant 0 : i32
    return %arg0, %c0_i32, %c0_i32_0 : i32, i32, i32
  }
  func.func @transform_2(%arg0: i32, %arg1: i32) -> (i32, i32) {
    %c0_i32 = arith.constant 0 : i32
    %c0_i32_0 = arith.constant 0 : i32
    %c0_i32_1 = arith.constant 0 : i32
    return %c0_i32, %c0_i32_0 : i32, i32
  }
  func.func @transform_3(%arg0: i32, %arg1: i32) -> (i32, i32) {
    %c0_i32 = arith.constant 0 : i32
    %c0_i32_0 = arith.constant 0 : i32
    %c0_i32_1 = arith.constant 0 : i32
    return %c0_i32, %c0_i32_0 : i32, i32
  }
  func.func @transform_4(%arg0: i32, %arg1: i32) -> (i32, i32) {
    %c0_i32 = arith.constant 0 : i32
    %c0_i32_0 = arith.constant 0 : i32
    %c0_i32_1 = arith.constant 0 : i32
    return %c0_i32, %c0_i32_0 : i32, i32
  }
  func.func @transform_5(%arg0: i32, %arg1: i32) -> (i32, i32) {
    %c0_i32 = arith.constant 0 : i32
    %c0_i32_0 = arith.constant 0 : i32
    %c0_i32_1 = arith.constant 0 : i32
    return %c0_i32, %c0_i32_0 : i32, i32
  }
  func.func @transform_6(%arg0: i32, %arg1: i32) -> (i32, i32) {
    %c0_i32 = arith.constant 0 : i32
    %c0_i32_0 = arith.constant 0 : i32
    %c0_i32_1 = arith.constant 0 : i32
    return %c0_i32, %c0_i32_0 : i32, i32
  }
  func.func @transform_7(%arg0: i32, %arg1: i32) -> (i32, i32) {
    %c0_i32 = arith.constant 0 : i32
    %c0_i32_0 = arith.constant 0 : i32
    %c0_i32_1 = arith.constant 0 : i32
    return %c0_i32, %c0_i32_0 : i32, i32
  }
  func.func @transform_8(%arg0: i32, %arg1: i32) -> (i32, i32) {
    %c0_i32 = arith.constant 0 : i32
    %c0_i32_0 = arith.constant 0 : i32
    %c0_i32_1 = arith.constant 0 : i32
    return %c0_i32, %c0_i32_0 : i32, i32
  }
  func.func @transform_9(%arg0: i32, %arg1: i32) -> (i32, i32, i32) {
    %c0_i32 = arith.constant 0 : i32
    %c0_i32_0 = arith.constant 0 : i32
    return %arg0, %arg1, %c0_i32 : i32, i32, i32
  }
  func.func @transform_10(%arg0: i32, %arg1: i32) -> (i32, i32, i32) {
    %c0_i32 = arith.constant 0 : i32
    %c0_i32_0 = arith.constant 0 : i32
    return %arg0, %arg1, %c0_i32 : i32, i32, i32
  }
}

</mosaic_0001>

<bundles_post_ra>
// kernel: mbconv_forward.3
= control target key start
LH: loop header
LB: loop body
LE: loop exit
PB: predicated region body
PF: predicated region fallthrough
CT: control target
= control target key end

     0   :  { %s1348_s13 = smov 0   ;;  %s1350_s14 = smov 0   ;;  %s1559_s0 = inlined_call_operand.vmem [shape: f32[2,256,32], index: 0, kind: input, shape index: {}]   ;;  %s1560_s1 = inlined_call_operand.vmem [shape: f32[2,1,32], index: 1, kind: input, shape index: {}]   ;;  %s1561_s2 = inlined_call_operand.vmem [shape: f32[32,2], index: 2, kind: input, shape index: {}]   ;;  %s1562_s3 = inlined_call_operand.vmem [shape: f32[1,2], index: 3, kind: input, shape index: {}]   ;;  %s1563_s4 = inlined_call_operand.vmem [shape: f32[2,32], index: 4, kind: input, shape index: {}]   ;;  %s1564_s5 = inlined_call_operand.vmem [shape: f32[1,32], index: 5, kind: input, shape index: {}]   ;;  %s1565_s6 = inlined_call_operand.vmem [shape: f32[32,8], index: 6, kind: input, shape index: {}]   ;;  %s1566_s7 = inlined_call_operand.vmem [shape: f32[1,8], index: 7, kind: input, shape index: {}]   ;;  %s1567_s8 = inlined_call_operand.vmem [shape: f32[1,8], index: 8, kind: input, shape index: {}]   ;;  %s1568_s9 = inlined_call_operand.vmem [shape: f32[2,256,8], index: 9, kind: input, shape index: {}, may-alias: {9,10}]   ;;  %s1569_s10 = inlined_call_operand.vmem [shape: f32[2,256,8], index: 10, kind: output, shape index: {}, may-alias: {9,10}]  }
   0x1   :  { %s1352_s15 = smov 0   ;;  %s1354_s16 = smov 0  }
   0x2   :  { %s1356_s17 = smov 0  }
   0x3 LB: > { %s29_s18 = sadd.s32 1, %s1280_s15  ;;  %s32_s19 = sadd.s32 1, %s1284_s16  ;;  %s1288_s17 = sphi %s1356_s17, %s20_s17   ;;  %s1284_s16 = sphi %s1354_s16, %s1573_s16   ;;  %s1280_s15 = sphi %s1352_s15, %s1572_s15   ;;  %s1276_s14 = sphi %s1350_s14, %s1571_s14   ;;  %s1272_s13 = sphi %s1348_s13, %s1570_s13  }
   0x4   : > { %p30_p0 = scmp.ge.s32.totalorder %s29_s18, 2  ;;  %p1071_p1 = scmp.ge.s32.totalorder %s1288_s17, 1 }
   0x5   : > { %p358_p2 = scmp.lt.s32.totalorder %s1288_s17, 5 }
   0x6   : > { %s1575_s18 = smov (%p30_p0, %s29_s18), 0  ;;  %s1577_s19 = smov (!%p30_p0, %s32_s19), %s1284_s16 }
   0x7   : > { %p359_p3 = pnand %p1071_p1, %p358_p2  ;;  %p34_p4 = scmp.ge.s32.totalorder %s1577_s19, 2 }
   0x8   : > { %v466_v0 = vld [vmem:[%s1561_s2] sm:$0xff] (!%p359_p3)  ;;  %v467_v1 = vld [vmem:[%s1561_s2 + $0x8] sm:$0xff] (!%p359_p3)  ;;  %v468_v2 = vld [vmem:[%s1561_s2 + $0x10] sm:$0xff] (!%p359_p3)  ;;  %v1290_v3 = vmov (!%p359_p3), 0.0|0.0   ;;  %vm1291_vm0 = vmmov (!%p359_p3), 0   ;;  %v1292_v6 = vmov (!%p359_p3), 0.0   ;;  %v638_v32 = vlaneseq (!%p359_p3) }
   0x9   : > { %s1579_s19 = smov (%p34_p4, %s1577_s19), 0  ;;  %362 = sbr.rel (%p359_p3) target bundleno = 742 (0x2e6), region = 60 }
   0xa   : > { %1181 = vmatprep.subr.bf16.mxu0 (!%p359_p3), %v1290_v3  ;;  %v1182_v4 = vpack.c.bf16 (!%p359_p3), %v467_v1, %v466_v0  ;;  %v469_v5 = vld [vmem:[%s1561_s2 + $0x18] sm:$0xff] (!%p359_p3)  ;;  %1141 = vmatprep.mubr.msk.f32.mxu0 (!%p359_p3), %vm1291_vm0, %v1292_v6  ;;  %p417_p5 = scmp.lt.s32.totalorder (!%p359_p3), %s1276_s14, 1  ;;  %vm471_vm1 = vcmask (!%p359_p3), 261120   ;;  %v552_v9 = vld [vmem:[%s1563_s4] sm:$0x3] (!%p359_p3)  ;;  %vm558_vm2 = vcmask (!%p359_p3), 1041408  }
   0xb   : > { %1144 = vmatprep.subr.mxu1 (!%p359_p3), %v1292_v6  ;;  %1146 = vmatprep.mubr.msk.f32.mxu1 (!%p359_p3), %vm1291_vm0, %v1292_v6  ;;  %v1185_v7 = vpack.c.bf16 (!%p359_p3), %v469_v5, %v468_v2  ;;  %v470_v10 = vld [vmem:[%s1562_s3] sm:$0x1] (!%p359_p3)  ;;  %vm554_vm3 = vcmask (!%p359_p3), 15360   ;;  %v659_v20 = vld [vmem:[%s1565_s6 + $0x8] sm:$0xff] (!%p359_p3)  ;;  %v660_v22 = vld [vmem:[%s1565_s6 + $0x10] sm:$0xff] (!%p359_p3)  ;;  %s1072_s12 = sshll.u32 (!%p359_p3), %s1272_s13, 4 }
   0xc   : > { %1183 = vmatpush3.bf16.msra.mxu0 (!%p359_p3), %v1182_v4  ;;  %1145 = vmatpush3.msk.msra.mxu1 (!%p359_p3), %vm558_vm2, %v552_v9  ;;  %v658_v19 = vld [vmem:[%s1565_s6] sm:$0xff] (!%p359_p3)  ;;  %v661_v23 = vld [vmem:[%s1565_s6 + $0x18] sm:$0xff] (!%p359_p3)  ;;  %p419_p6 = scmp.lt.s32.totalorder (!%p359_p3), %s1072_s12, 31  ;;  %v639_v33 = vshrl.u32 (!%p359_p3), %v638_v32, 7  ;;  %vm933_vm4 = vcmask (!%p359_p3), 64512  }
   0xd   : > { %1184 = vmatprep.subr.bf16.mxu0 (!%p359_p3), %v1290_v3  ;;  %v1187_v21 = vpack.c.bf16 (!%p359_p3), %v659_v20, %v658_v19  ;;  %v1191_v24 = vpack.c.bf16 (!%p359_p3), %v661_v23, %v660_v22  ;;  %v553_v25 = vld [vmem:[%s1564_s5] sm:$0x1] (!%p359_p3) }
   0xe   : > { %v640_v34 = vsub.s32 (!%p359_p3), 0, %v639_v33  ;;  %v1455_v5 = vld [vmem:[%s1566_s7] ss:$0 sm:$0xff] (!%p359_p3) }
   0xf   : > { %1195 = vmatprep.subr.bf16.mxu1 (!%p359_p3), %v1187_v21 }
  0x10   : > { %s1581_s14 = smov (!%p417_p5, %s1276_s14), 1  ;;  %1186 = vmatpush3.bf16.msra.mxu0 %v1185_v7  ;;  %s1583_s12 = smov (!%p419_p6, %s1072_s12), 31  ;;  %v1460_v7 = vld [vmem:[%s1567_s8] ss:$0 sm:$0xff] }
  0x11   : > { %s428_s30 = scalar_lea.vmem %s1560_s1, %s1581_s14  ;;  %1188 = vmatprep.subr.bf16.mxu0 %v1187_v21  ;;  %s1073_s20 = sshll.u32 %s1581_s14, 5 }
  0x12   : > { %v465_v8 = vld [vmem:[%s428_s30] sm:$0x1]  ;;  %s422_s21 = sadd.s32 %s1073_s20, %s1583_s12 }
  0x13   : > { %1142 = vmatmul.mubr.msk.f32.vlgmr.msra.gmra.mrb[0].mxu0 %vm471_vm1, %v465_v8  ;;  %s1426_s22 = sshll.u32 %s422_s21, 3 }
  0x14   : > { %1190 = vmatpush3.bf16.msra.mxu0 %v1187_v21  ;;  %s424_s25 = scalar_lea.vmem %s1559_s0, %s1426_s22  ;;  %s437_s26 = scalar_lea.vmem %s1568_s9, %s1426_s22 }
  0x15   : > { %1192 = vmatprep.subr.bf16.mxu0 %v1191_v24  ;;  %v449_v35 = vld [vmem:[%s424_s25] sm:$0xff]  ;;  %v455_v36 = vld [vmem:[%s424_s25 + $0x30] sm:$0xff]  ;;  %v450_v38 = vld [vmem:[%s424_s25 + $0x8] sm:$0xff]  ;;  %s1476_s20 = scalar_lea.vmem %s1569_s10, %s1426_s22 }
  0x16   : > { %v456_v39 = vld [vmem:[%s424_s25 + $0x38] sm:$0xff]  ;;  %v451_v40 = vld [vmem:[%s424_s25 + $0x10] sm:$0xff]  ;;  %v457_v42 = vld [vmem:[%s424_s25 + $0x40] sm:$0xff] }
  0x17   : > { %v452_v43 = vld [vmem:[%s424_s25 + $0x18] sm:$0xff]  ;;  %v458_v44 = vld [vmem:[%s424_s25 + $0x48] sm:$0xff]  ;;  %v453_v45 = vld [vmem:[%s424_s25 + $0x20] sm:$0xff] }
  0x18   : > { %1194 = vmatpush3.bf16.msra.mxu0 %v1191_v24  ;;  %v459_v46 = vld [vmem:[%s424_s25 + $0x50] sm:$0xff]  ;;  %v454_v47 = vld [vmem:[%s424_s25 + $0x28] sm:$0xff]  ;;  %v460_v52 = vld [vmem:[%s424_s25 + $0x58] sm:$0xff] }
  0x19   : > { %v461_v53 = vld [vmem:[%s424_s25 + $0x60] sm:$0xff]  ;;  %v462_v54 = vld [vmem:[%s424_s25 + $0x68] sm:$0xff]  ;;  %v463_v59 = vld [vmem:[%s424_s25 + $0x70] sm:$0xff] }
  0x1a   : > { %v464_v60 = vld [vmem:[%s424_s25 + $0x78] sm:$0xff]  ;;  %v901_v9 = vld [vmem:[%s437_s26] sm:$0xff]  ;;  %v906_v19 = vld [vmem:[%s437_s26 + $0x28] sm:$0xff] }
  0x1b   : > { %v908_v20 = vld [vmem:[%s437_s26 + $0x38] sm:$0xff]  ;;  %v910_v22 = vld [vmem:[%s437_s26 + $0x48] sm:$0xff] }
  0x1c   : > { %v1480_v32 = vld [vmem:[%s437_s26 + $0x78] sm:$0xff] }
  0xe6   : > { %v541_v11 = vpop.f32.mrb[0].mxu0 }
  0xe7   : > { %v542_v12 = vadd.f32 %v541_v11, %v470_v10  ;;  %v1143_v13 = vpop.f32.mrb[1].mxu0  ;;  %v902_v10 = vld [vmem:[%s437_s26 + $0x8] sm:$0xff]  ;;  %v907_v11 = vld [vmem:[%s437_s26 + $0x30] sm:$0xff] }
  0xe9   : > { %v1082_v14 = vmul.f32 -1.442695, %v542_v12 }
  0xeb   : > { %1242 = vpow2.f32 %v1082_v14 }
  0xf5   : > { %v1243_v15 = vpop.eup %1242 }
  0xf6   : > { %v548_v16 = vadd.f32 1.0, %v1243_v15 }
  0xf8   : > { %1244 = vrcp.f32 %v548_v16  ;;  %v903_v16 = vld [vmem:[%s437_s26 + $0x10] sm:$0xff] }
 0x102   : > { %v1245_v17 = vpop.eup %1244 }
 0x103   : > { %v551_v18 = vmul.f32 %v1245_v17, %v542_v12  ;;  %v904_v17 = vld [vmem:[%s437_s26 + $0x18] sm:$0xff] }
 0x105   : > { %1147 = vmatmul.mubr.msk.f32.vlgmr.msra.gmra.mrb[0].mxu1 %vm554_vm3, %v551_v18  ;;  %v1464_v18 = vld [vmem:[%s437_s26 + $0x20] sm:$0xff] }
 0x106   : > { %1197 = vmatpush3.bf16.msra.mxu1 %v1187_v21  ;;  %v909_v21 = vld [vmem:[%s437_s26 + $0x40] sm:$0xff] }
 0x107   : > { %1196 = vmatprep.subr.bf16.mxu1 %v1191_v24 }
 0x10a   : > { %1198 = vmatpush3.bf16.msra.mxu1 %v1191_v24 }
 0x1d8   : > { %v628_v26 = vpop.f32.mrb[0].mxu1 }
 0x1d9   : > { %v629_v27 = vadd.f32 %v628_v26, %v553_v25  ;;  %v1148_v28 = vpop.f32.mrb[1].mxu1  ;;  %v911_v25 = vld [vmem:[%s437_s26 + $0x50] sm:$0xff]  ;;  %v912_v26 = vld [vmem:[%s437_s26 + $0x58] sm:$0xff] }
 0x1db   : > { %v1085_v29 = vmul.f32 -1.442695, %v629_v27  ;;  %v1468_v27 = vld [vmem:[%s437_s26 + $0x60] sm:$0xff] }
 0x1dd   : > { %1246 = vpow2.f32 %v1085_v29 }
 0x1e7   : > { %v1247_v30 = vpop.eup %1246 }
 0x1e8   : > { %v635_v31 = vadd.f32 1.0, %v1247_v30  ;;  %v914_v30 = vld [vmem:[%s437_s26 + $0x68] sm:$0xff] }
 0x1ea   : > { %1248 = vrcp.f32 %v635_v31  ;;  %v1478_v31 = vld [vmem:[%s437_s26 + $0x70] sm:$0xff] }
 0x1f4   : > { %v1249_v37 = vpop.eup %1248 }
 0x1f5   : > { %v641_v41 = vrot.slane %v1249_v37, %v640_v34 }
 0x1f7   : > { %v642_v48 = vmul.f32 %v641_v41, %v449_v35  ;;  %v648_v49 = vmul.f32 %v641_v41, %v455_v36  ;;  %v643_v50 = vmul.f32 %v641_v41, %v450_v38  ;;  %v649_v51 = vmul.f32 %v641_v41, %v456_v39 }
 0x1f8   : > { %v644_v55 = vmul.f32 %v641_v41, %v451_v40  ;;  %v650_v56 = vmul.f32 %v641_v41, %v457_v42  ;;  %v645_v57 = vmul.f32 %v641_v41, %v452_v43  ;;  %v651_v58 = vmul.f32 %v641_v41, %v458_v44 }
 0x1f9   : > { %1157 = vmatprep.mubr.msk.f32.mxu0 %vm471_vm1, %v642_v48  ;;  %1166 = vmatprep.mubr.msk.f32.mxu1 %vm471_vm1, %v648_v49  ;;  %v646_v61 = vmul.f32 %v641_v41, %v453_v45  ;;  %v652_v62 = vmul.f32 %v641_v41, %v459_v46  ;;  %v647_v63 = vmul.f32 %v641_v41, %v454_v47 }
 0x1fa   : > { %1158 = vmatmul.mubr.msk.f32.vlgmr.msra.gmra.mrb[2].mxu0 %vm471_vm1, %v643_v50  ;;  %1167 = vmatmul.mubr.msk.f32.vlgmr.msra.gmra.mrb[2].mxu1 %vm471_vm1, %v649_v51  ;;  %v653_v0 = vmul.f32 %v641_v41, %v460_v52  ;;  %v654_v1 = vmul.f32 %v641_v41, %v461_v53  ;;  %v655_v2 = vmul.f32 %v641_v41, %v462_v54 }
 0x1fb   : > { %1160 = vmatprep.mubr.msk.f32.mxu0 %vm471_vm1, %v644_v55  ;;  %1169 = vmatprep.mubr.msk.f32.mxu1 %vm471_vm1, %v650_v56  ;;  %v656_v3 = vmul.f32 %v641_v41, %v463_v59  ;;  %v657_v4 = vmul.f32 %v641_v41, %v464_v60 }
 0x1fe   : > { %1161 = vmatmul.mubr.msk.f32.gmra.mrb[4].mxu0 %vm471_vm1, %v645_v57  ;;  %1170 = vmatmul.mubr.msk.f32.gmra.mrb[4].mxu1 %vm471_vm1, %v651_v58 }
 0x1ff   : > { %1163 = vmatprep.mubr.msk.f32.mxu0 %vm471_vm1, %v646_v61  ;;  %1172 = vmatprep.mubr.msk.f32.mxu1 %vm471_vm1, %v652_v62 }
 0x202   : > { %1164 = vmatmul.mubr.msk.f32.gmra.mrb[6].mxu0 %vm471_vm1, %v647_v63  ;;  %1173 = vmatmul.mubr.msk.f32.gmra.mrb[6].mxu1 %vm471_vm1, %v653_v0 }
 0x203   : > { %1175 = vmatprep.mubr.msk.f32.mxu1 %vm471_vm1, %v654_v1 }
 0x206   : > { %1176 = vmatmul.mubr.msk.f32.gmra.mrb[8].mxu1 %vm471_vm1, %v655_v2 }
 0x207   : > { %1178 = vmatprep.mubr.msk.f32.mxu1 %vm471_vm1, %v656_v3 }
 0x20a   : > { %1179 = vmatmul.mubr.msk.f32.gmra.mrb[10].mxu1 %vm471_vm1, %v657_v4 }
 0x2cd   : > { %v1159_v6 = vpop.f32.mrb[2].mxu0  ;;  %v1168_v8 = vpop.f32.mrb[2].mxu1 }
 0x2ce   : > { %v863_v12 = vmul.f32 %v1159_v6, %v1455_v5  ;;  %v869_v13 = vmul.f32 %v1168_v8, %v1455_v5  ;;  %v776_v14 = vpop.f32.mrb[3].mxu0  ;;  %v806_v15 = vpop.f32.mrb[3].mxu1 }
 0x2cf   : > { %v862_v23 = vmul.f32 %v1455_v5, %v776_v14  ;;  %v868_v24 = vmul.f32 %v1455_v5, %v806_v15 }
 0x2d0   : > { %v886_v28 = vadd.f32 %v1460_v7, %v863_v12  ;;  %v892_v29 = vadd.f32 %v1460_v7, %v869_v13 }
 0x2d1   : > { %v885_v33 = vadd.f32 %v1460_v7, %v862_v23  ;;  %v891_v34 = vadd.f32 %v1460_v7, %v868_v24  ;;  %v1162_v35 = vpop.f32.mrb[4].mxu0  ;;  %v1171_v36 = vpop.f32.mrb[4].mxu1 }
 0x2d2   : > { %v918_v37 = vadd.f32 %v902_v10, %v886_v28  ;;  %v924_v38 = vadd.f32 %v908_v20, %v892_v29  ;;  %v865_v39 = vmul.f32 %v1162_v35, %v1455_v5  ;;  %v871_v40 = vmul.f32 %v1171_v36, %v1455_v5  ;;  %v786_v41 = vpop.f32.mrb[5].mxu0  ;;  %v816_v42 = vpop.f32.mrb[5].mxu1 }
 0x2d3   : > { %v917_v43 = vadd.f32 %v901_v9, %v885_v33  ;;  %v923_v44 = vadd.f32 %v907_v11, %v891_v34  ;;  %v864_v45 = vmul.f32 %v1455_v5, %v786_v41  ;;  %v870_v46 = vmul.f32 %v1455_v5, %v816_v42 }
 0x2d4   : > { %935 = vst.msk [vmem:[%s1476_s20 + $0x8] sm:$0xff] %vm933_vm4, %v918_v37  ;;  %941 = vst.msk [vmem:[%s1476_s20 + $0x38] sm:$0xff] %vm933_vm4, %v924_v38  ;;  %v888_v47 = vadd.f32 %v1460_v7, %v865_v39  ;;  %v894_v48 = vadd.f32 %v1460_v7, %v871_v40 }
 0x2d5   : > { %934 = vst.msk [vmem:[%s1476_s20] sm:$0xff] %vm933_vm4, %v917_v43  ;;  %940 = vst.msk [vmem:[%s1476_s20 + $0x30] sm:$0xff] %vm933_vm4, %v923_v44  ;;  %v887_v49 = vadd.f32 %v1460_v7, %v864_v45  ;;  %v893_v50 = vadd.f32 %v1460_v7, %v870_v46  ;;  %v1165_v51 = vpop.f32.mrb[6].mxu0  ;;  %v1174_v52 = vpop.f32.mrb[6].mxu1 }
 0x2d6   : > { %v920_v53 = vadd.f32 %v904_v17, %v888_v47  ;;  %v926_v54 = vadd.f32 %v910_v22, %v894_v48  ;;  %v867_v55 = vmul.f32 %v1165_v51, %v1455_v5  ;;  %v873_v56 = vmul.f32 %v1174_v52, %v1455_v5  ;;  %v796_v57 = vpop.f32.mrb[7].mxu0  ;;  %v826_v58 = vpop.f32.mrb[7].mxu1 }
 0x2d7   : > { %v919_v59 = vadd.f32 %v903_v16, %v887_v49  ;;  %v925_v60 = vadd.f32 %v909_v21, %v893_v50  ;;  %v866_v61 = vmul.f32 %v1455_v5, %v796_v57  ;;  %v872_v62 = vmul.f32 %v1455_v5, %v826_v58 }
 0x2d8   : > { %937 = vst.msk [vmem:[%s1476_s20 + $0x18] sm:$0xff] %vm933_vm4, %v920_v53  ;;  %943 = vst.msk [vmem:[%s1476_s20 + $0x48] sm:$0xff] %vm933_vm4, %v926_v54  ;;  %v890_v63 = vadd.f32 %v1460_v7, %v867_v55  ;;  %v896_v0 = vadd.f32 %v1460_v7, %v873_v56 }
 0x2d9   : > { %936 = vst.msk [vmem:[%s1476_s20 + $0x10] sm:$0xff] %vm933_vm4, %v919_v59  ;;  %942 = vst.msk [vmem:[%s1476_s20 + $0x40] sm:$0xff] %vm933_vm4, %v925_v60  ;;  %v889_v1 = vadd.f32 %v1460_v7, %v866_v61  ;;  %v895_v2 = vadd.f32 %v1460_v7, %v872_v62  ;;  %v1177_v3 = vpop.f32.mrb[8].mxu1 }
 0x2da   : > { %v922_v4 = vadd.f32 %v906_v19, %v890_v63  ;;  %v928_v6 = vadd.f32 %v912_v26, %v896_v0  ;;  %v875_v8 = vmul.f32 %v1177_v3, %v1455_v5  ;;  %v836_v9 = vpop.f32.mrb[9].mxu1 }
 0x2db   : > { %v921_v10 = vadd.f32 %v1464_v18, %v889_v1  ;;  %v927_v11 = vadd.f32 %v911_v25, %v895_v2  ;;  %v874_v12 = vmul.f32 %v1455_v5, %v836_v9 }
 0x2dc   : > { %939 = vst.msk [vmem:[%s1476_s20 + $0x28] sm:$0xff] %vm933_vm4, %v922_v4  ;;  %945 = vst.msk [vmem:[%s1476_s20 + $0x58] sm:$0xff] %vm933_vm4, %v928_v6  ;;  %v898_v13 = vadd.f32 %v1460_v7, %v875_v8 }
 0x2dd   : > { %938 = vst.msk [vmem:[%s1476_s20 + $0x20] sm:$0xff] %vm933_vm4, %v921_v10  ;;  %944 = vst.msk [vmem:[%s1476_s20 + $0x50] sm:$0xff] %vm933_vm4, %v927_v11  ;;  %v897_v14 = vadd.f32 %v1460_v7, %v874_v12  ;;  %v1180_v15 = vpop.f32.mrb[10].mxu1 }
 0x2de   : > { %v930_v16 = vadd.f32 %v914_v30, %v898_v13  ;;  %v877_v17 = vmul.f32 %v1180_v15, %v1455_v5  ;;  %v846_v18 = vpop.f32.mrb[11].mxu1 }
 0x2df   : > { %v929_v19 = vadd.f32 %v1468_v27, %v897_v14  ;;  %v876_v20 = vmul.f32 %v1455_v5, %v846_v18 }
 0x2e0   : > { %947 = vst.msk [vmem:[%s1476_s20 + $0x68] sm:$0xff] %vm933_vm4, %v930_v16  ;;  %v900_v21 = vadd.f32 %v1460_v7, %v877_v17 }
 0x2e1   : > { %946 = vst.msk [vmem:[%s1476_s20 + $0x60] sm:$0xff] %vm933_vm4, %v929_v19  ;;  %v899_v22 = vadd.f32 %v1460_v7, %v876_v20 }
 0x2e2   : > { %v932_v23 = vadd.f32 %v1480_v32, %v900_v21 }
 0x2e3   : > { %v931_v24 = vadd.f32 %v1478_v31, %v899_v22 }
 0x2e4   : > { %949 = vst.msk [vmem:[%s1476_s20 + $0x78] sm:$0xff] %vm933_vm4, %v932_v23 }
 0x2e5   : > { %948 = vst.msk [vmem:[%s1476_s20 + $0x70] sm:$0xff] %vm933_vm4, %v931_v24 }
 0x2e6 PF: > { %s20_s17 = sadd.s32 1, %s1288_s17   ;;  %s1570_s13 = smov %s1280_s15 }
 0x2e7   : > { %p17_p7 = scmp.ge.s32.totalorder %s20_s17, 6   ;;  %s1571_s14 = smov %s1284_s16 }
 0x2e8   : > { %s1572_s15 = smov %s1575_s18  ;;  %s1573_s16 = smov %s1579_s19 }
 0x2e9   :  { %19 = sbr.rel (!%p17_p7) target bundleno = 3 (0x3), region = 96 }

// kernel: mbconv_forward.2
= control target key start
LH: loop header
LB: loop body
LE: loop exit
PB: predicated region body
PF: predicated region fallthrough
CT: control target
= control target key end

     0   :  { %s3007_s27 = smov 0   ;;  %s4786_s0 = inlined_call_operand.vmem [shape: f32[2,16,16,8], index: 0, kind: input, shape index: {}]   ;;  %s4787_s1 = inlined_call_operand.vmem [shape: f32[8,32], index: 1, kind: input, shape index: {}]   ;;  %s4788_s2 = inlined_call_operand.vmem [shape: f32[1,32], index: 2, kind: input, shape index: {}]   ;;  %s4789_s3 = inlined_call_operand.vmem [shape: f32[1,32], index: 3, kind: input, shape index: {}]   ;;  %s4790_s4 = inlined_call_operand.vmem [shape: f32[3,3,32], index: 4, kind: input, shape index: {}]   ;;  %s4791_s5 = inlined_call_operand.vmem [shape: f32[1,32], index: 5, kind: input, shape index: {}]   ;;  %s4792_s6 = inlined_call_operand.vmem [shape: f32[1,32], index: 6, kind: input, shape index: {}]   ;;  %s4793_s7 = inlined_call_operand.vmem [shape: f32[2,16,16,32], index: 7, kind: output, shape index: {0}]   ;;  %s4794_s8 = inlined_call_operand.vmem [shape: f32[2,1,32], index: 8, kind: output, shape index: {1}]  }
   0x1 LB: > { %s2460_s28 = sadd.s32 4294967295, %s2959_s27   ;;  %p2464_p0 = scmp.ge.s32.totalorder %s2959_s27, 1  ;;  %s2959_s27 = sphi %s3007_s27, %s19_s27  }
   0x2   : > { %p265_p1 = scmp.lt.s32.totalorder %s2959_s27, 3 }
   0x4   : > { %p266_p2 = pnand %p2464_p0, %p265_p1 }
   0x6   : > { %269 = sbr.rel (%p266_p2) target bundleno = 562 (0x232), region = 48 }
   0xd   : > { %v347_v0 = vld [vmem:[%s4787_s1] sm:$0xff]  ;;  %p302_p3 = scmp.lt.s32.totalorder %s2460_s28, 1  ;;  %vm348_vm0 = vcmask 64512   ;;  %vm972_vm1 = vcmask 261120   ;;  %vm975_vm2 = vcmask 254976   ;;  %v2961_v33 = vmov 0.0  }
   0xe   : > { %2621 = vmatprep.subr.mxu0 %v347_v0  ;;  %2671 = vmatprep.subr.mxu1 %v347_v0  ;;  %978 = vst.msk [vmem:[#allocation2 + $0x20] sm:$0xff] %vm972_vm1, %v2961_v33  ;;  %973 = vst.msk [vmem:[#allocation2] sm:$0xff] %vm972_vm1, %v2961_v33  ;;  %v3149_v34 = vld [vmem:[%s4788_s2] ss:$0 sm:$0xff]  ;;  %vm2378_vm3 = vcmask 253952  }
   0xf   : > { %2622 = vmatpush3.msra.mxu0 %v347_v0  ;;  %2672 = vmatpush3.msra.mxu1 %v347_v0  ;;  %s4970_s28 = smov (!%p302_p3, %s2460_s28), 1  ;;  %979 = vst.msk [vmem:[#allocation2 + $0x28] sm:$0x3] %vm975_vm2, %v2961_v33  ;;  %976 = vst.msk [vmem:[#allocation2 + $0x10] sm:$0x3] %vm975_vm2, %v2961_v33 }
  0x10   : > { %s2586_s9 = sshll.u32 %s4970_s28, 8  ;;  %974 = vst.msk [vmem:[#allocation2 + $0x8] sm:$0xff] %vm972_vm1, %v2961_v33  ;;  %977 = vst.msk [vmem:[#allocation2 + $0x18] sm:$0xff] %vm972_vm1, %v2961_v33  ;;  %v3154_v36 = vld [vmem:[%s4789_s3] ss:$0 sm:$0xff]  ;;  %s314_s15 = scalar_lea.vmem %s4794_s8, %s4970_s28 }
  0x11   : > { %s3026_s12 = scalar_lea.vmem %s4786_s0, %s2586_s9  ;;  %980 = vst.msk [vmem:[#allocation2 + $0x30] sm:$0xff] %vm972_vm1, %v2961_v33  ;;  %981 = vst.msk [vmem:[#allocation2 + $0x38] sm:$0xff] %vm972_vm1, %v2961_v33  ;;  %s3634_s22 = scalar_lea.vmem %s4793_s7, %s2586_s9 }
  0x12   : > { %v315_v1 = vld [vmem:[%s3026_s12] sm:$0xff]  ;;  %v316_v3 = vld [vmem:[%s3026_s12 + $0x8] sm:$0xff]  ;;  %v317_v5 = vld [vmem:[%s3026_s12 + $0x10] sm:$0xff]  ;;  %982 = vst.msk [vmem:[#allocation2 + $0x40] sm:$0x3] %vm975_vm2, %v2961_v33 }
  0x13   : > { %v331_v2 = vld [vmem:[%s3026_s12 + $0x80] sm:$0xff]  ;;  %2623 = vmatprep.mubr.msk.f32.mxu0 %vm348_vm0, %v315_v1  ;;  %v332_v4 = vld [vmem:[%s3026_s12 + $0x88] sm:$0xff]  ;;  %v333_v6 = vld [vmem:[%s3026_s12 + $0x90] sm:$0xff]  ;;  %983 = vst.msk [vmem:[#allocation2 + $0x48] sm:$0xff] %vm972_vm1, %v2961_v33 }
  0x14   : > { %2647 = vmatprep.mubr.msk.f32.mxu1 %vm348_vm0, %v331_v2  ;;  %2624 = vmatmul.mubr.msk.f32.vlgmr.msra.gmra.mrb[0].mxu0 %vm348_vm0, %v316_v3  ;;  %v318_v7 = vld [vmem:[%s3026_s12 + $0x18] sm:$0xff]  ;;  %v319_v9 = vld [vmem:[%s3026_s12 + $0x20] sm:$0xff]  ;;  %v320_v11 = vld [vmem:[%s3026_s12 + $0x28] sm:$0xff]  ;;  %984 = vst.msk [vmem:[#allocation2 + $0x50] sm:$0xff] %vm972_vm1, %v2961_v33 }
  0x15   : > { %2648 = vmatmul.mubr.msk.f32.vlgmr.msra.gmra.mrb[0].mxu1 %vm348_vm0, %v332_v4  ;;  %2626 = vmatprep.mubr.msk.f32.mxu0 %vm348_vm0, %v317_v5  ;;  %v334_v8 = vld [vmem:[%s3026_s12 + $0x98] sm:$0xff]  ;;  %v335_v10 = vld [vmem:[%s3026_s12 + $0xa0] sm:$0xff]  ;;  %v336_v12 = vld [vmem:[%s3026_s12 + $0xa8] sm:$0xff]  ;;  %985 = vst.msk [vmem:[#allocation2 + $0x58] sm:$0x3] %vm975_vm2, %v2961_v33 }
  0x16   : > { %2650 = vmatprep.mubr.msk.f32.mxu1 %vm348_vm0, %v333_v6  ;;  %v321_v13 = vld [vmem:[%s3026_s12 + $0x30] sm:$0xff]  ;;  %v322_v15 = vld [vmem:[%s3026_s12 + $0x38] sm:$0xff]  ;;  %v323_v17 = vld [vmem:[%s3026_s12 + $0x40] sm:$0xff]  ;;  %986 = vst.msk [vmem:[#allocation2 + $0x60] sm:$0xff] %vm972_vm1, %v2961_v33 }
  0x17   : > { %v337_v14 = vld [vmem:[%s3026_s12 + $0xb0] sm:$0xff]  ;;  %v338_v16 = vld [vmem:[%s3026_s12 + $0xb8] sm:$0xff]  ;;  %v339_v18 = vld [vmem:[%s3026_s12 + $0xc0] sm:$0xff]  ;;  %987 = vst.msk [vmem:[#allocation2 + $0x68] sm:$0xff] %vm972_vm1, %v2961_v33 }
  0x18   : > { %2627 = vmatmul.mubr.msk.f32.gmra.mrb[2].mxu0 %vm348_vm0, %v318_v7  ;;  %v324_v19 = vld [vmem:[%s3026_s12 + $0x48] sm:$0xff]  ;;  %v325_v21 = vld [vmem:[%s3026_s12 + $0x50] sm:$0xff]  ;;  %v326_v23 = vld [vmem:[%s3026_s12 + $0x58] sm:$0xff]  ;;  %988 = vst.msk [vmem:[#allocation2 + $0x70] sm:$0x3] %vm975_vm2, %v2961_v33 }
  0x19   : > { %2651 = vmatmul.mubr.msk.f32.gmra.mrb[2].mxu1 %vm348_vm0, %v334_v8  ;;  %2629 = vmatprep.mubr.msk.f32.mxu0 %vm348_vm0, %v319_v9  ;;  %v340_v20 = vld [vmem:[%s3026_s12 + $0xc8] sm:$0xff]  ;;  %v341_v22 = vld [vmem:[%s3026_s12 + $0xd0] sm:$0xff]  ;;  %v342_v24 = vld [vmem:[%s3026_s12 + $0xd8] sm:$0xff]  ;;  %989 = vst.msk [vmem:[#allocation2 + $0x78] sm:$0xff] %vm972_vm1, %v2961_v33 }
  0x1a   : > { %2653 = vmatprep.mubr.msk.f32.mxu1 %vm348_vm0, %v335_v10  ;;  %v327_v25 = vld [vmem:[%s3026_s12 + $0x60] sm:$0xff]  ;;  %v328_v27 = vld [vmem:[%s3026_s12 + $0x68] sm:$0xff]  ;;  %v329_v29 = vld [vmem:[%s3026_s12 + $0x70] sm:$0xff]  ;;  %990 = vst.msk [vmem:[#allocation2 + $0x80] sm:$0xff] %vm972_vm1, %v2961_v33 }
  0x1b   : > { %v343_v26 = vld [vmem:[%s3026_s12 + $0xe0] sm:$0xff]  ;;  %v344_v28 = vld [vmem:[%s3026_s12 + $0xe8] sm:$0xff]  ;;  %v345_v30 = vld [vmem:[%s3026_s12 + $0xf0] sm:$0xff]  ;;  %991 = vst.msk [vmem:[#allocation2 + $0x88] sm:$0x3] %vm975_vm2, %v2961_v33 }
  0x1c   : > { %2630 = vmatmul.mubr.msk.f32.gmra.mrb[4].mxu0 %vm348_vm0, %v320_v11  ;;  %v330_v31 = vld [vmem:[%s3026_s12 + $0x78] sm:$0xff]  ;;  %992 = vst.msk [vmem:[#allocation2 + $0x90] sm:$0xff] %vm972_vm1, %v2961_v33  ;;  %993 = vst.msk [vmem:[#allocation2 + $0x98] sm:$0xff] %vm972_vm1, %v2961_v33 }
  0x1d   : > { %2654 = vmatmul.mubr.msk.f32.gmra.mrb[4].mxu1 %vm348_vm0, %v336_v12  ;;  %2632 = vmatprep.mubr.msk.f32.mxu0 %vm348_vm0, %v321_v13  ;;  %v346_v32 = vld [vmem:[%s3026_s12 + $0xf8] sm:$0xff]  ;;  %994 = vst.msk [vmem:[#allocation2 + $0xa0] sm:$0x3] %vm975_vm2, %v2961_v33  ;;  %997 = vst.msk [vmem:[#allocation2 + $0xb8] sm:$0x3] %vm975_vm2, %v2961_v33 }
  0x1e   : > { %2656 = vmatprep.mubr.msk.f32.mxu1 %vm348_vm0, %v337_v14  ;;  %995 = vst.msk [vmem:[#allocation2 + $0xa8] sm:$0xff] %vm972_vm1, %v2961_v33  ;;  %996 = vst.msk [vmem:[#allocation2 + $0xb0] sm:$0xff] %vm972_vm1, %v2961_v33 }
  0x1f   : > { %998 = vst.msk [vmem:[#allocation2 + $0xc0] sm:$0xff] %vm972_vm1, %v2961_v33  ;;  %999 = vst.msk [vmem:[#allocation2 + $0xc8] sm:$0xff] %vm972_vm1, %v2961_v33 }
  0x20   : > { %2633 = vmatmul.mubr.msk.f32.gmra.mrb[6].mxu0 %vm348_vm0, %v322_v15  ;;  %1000 = vst.msk [vmem:[#allocation2 + $0xd0] sm:$0x3] %vm975_vm2, %v2961_v33  ;;  %1003 = vst.msk [vmem:[#allocation2 + $0xe8] sm:$0x3] %vm975_vm2, %v2961_v33 }
  0x21   : > { %2657 = vmatmul.mubr.msk.f32.gmra.mrb[6].mxu1 %vm348_vm0, %v338_v16  ;;  %2635 = vmatprep.mubr.msk.f32.mxu0 %vm348_vm0, %v323_v17  ;;  %1001 = vst.msk [vmem:[#allocation2 + $0xd8] sm:$0xff] %vm972_vm1, %v2961_v33  ;;  %1002 = vst.msk [vmem:[#allocation2 + $0xe0] sm:$0xff] %vm972_vm1, %v2961_v33 }
  0x22   : > { %2659 = vmatprep.mubr.msk.f32.mxu1 %vm348_vm0, %v339_v18  ;;  %1004 = vst.msk [vmem:[#allocation2 + $0xf0] sm:$0xff] %vm972_vm1, %v2961_v33  ;;  %1005 = vst.msk [vmem:[#allocation2 + $0xf8] sm:$0xff] %vm972_vm1, %v2961_v33 }
  0x23   : > { %1006 = vst.msk [vmem:[#allocation2 + $0x100] sm:$0x3] %vm975_vm2, %v2961_v33  ;;  %1009 = vst.msk [vmem:[#allocation2 + $0x118] sm:$0x3] %vm975_vm2, %v2961_v33 }
  0x24   : > { %2636 = vmatmul.mubr.msk.f32.gmra.mrb[8].mxu0 %vm348_vm0, %v324_v19  ;;  %1007 = vst.msk [vmem:[#allocation2 + $0x108] sm:$0xff] %vm972_vm1, %v2961_v33  ;;  %1008 = vst.msk [vmem:[#allocation2 + $0x110] sm:$0xff] %vm972_vm1, %v2961_v33 }
  0x25   : > { %2660 = vmatmul.mubr.msk.f32.gmra.mrb[8].mxu1 %vm348_vm0, %v340_v20  ;;  %2638 = vmatprep.mubr.msk.f32.mxu0 %vm348_vm0, %v325_v21  ;;  %1010 = vst.msk [vmem:[#allocation2 + $0x120] sm:$0xff] %vm972_vm1, %v2961_v33  ;;  %1011 = vst.msk [vmem:[#allocation2 + $0x128] sm:$0xff] %vm972_vm1, %v2961_v33 }
  0x26   : > { %2662 = vmatprep.mubr.msk.f32.mxu1 %vm348_vm0, %v341_v22  ;;  %1012 = vst.msk [vmem:[#allocation2 + $0x130] sm:$0x3] %vm975_vm2, %v2961_v33  ;;  %1015 = vst.msk [vmem:[#allocation2 + $0x148] sm:$0x3] %vm975_vm2, %v2961_v33 }
  0x27   : > { %1013 = vst.msk [vmem:[#allocation2 + $0x138] sm:$0xff] %vm972_vm1, %v2961_v33  ;;  %1014 = vst.msk [vmem:[#allocation2 + $0x140] sm:$0xff] %vm972_vm1, %v2961_v33 }
  0x28   : > { %2639 = vmatmul.mubr.msk.f32.gmra.mrb[10].mxu0 %vm348_vm0, %v326_v23  ;;  %1016 = vst.msk [vmem:[#allocation2 + $0x150] sm:$0xff] %vm972_vm1, %v2961_v33  ;;  %1017 = vst.msk [vmem:[#allocation2 + $0x158] sm:$0xff] %vm972_vm1, %v2961_v33 }
  0x29   : > { %2663 = vmatmul.mubr.msk.f32.gmra.mrb[10].mxu1 %vm348_vm0, %v342_v24  ;;  %2641 = vmatprep.mubr.msk.f32.mxu0 %vm348_vm0, %v327_v25  ;;  %1018 = vst.msk [vmem:[#allocation2 + $0x160] sm:$0x3] %vm975_vm2, %v2961_v33  ;;  %1021 = vst.msk [vmem:[#allocation2 + $0x178] sm:$0x3] %vm975_vm2, %v2961_v33 }
  0x2a   : > { %2665 = vmatprep.mubr.msk.f32.mxu1 %vm348_vm0, %v343_v26  ;;  %1019 = vst.msk [vmem:[#allocation2 + $0x168] sm:$0xff] %vm972_vm1, %v2961_v33  ;;  %1020 = vst.msk [vmem:[#allocation2 + $0x170] sm:$0xff] %vm972_vm1, %v2961_v33 }
  0x2b   : > { %1022 = vst.msk [vmem:[#allocation2 + $0x180] sm:$0xff] %vm972_vm1, %v2961_v33  ;;  %1023 = vst.msk [vmem:[#allocation2 + $0x188] sm:$0xff] %vm972_vm1, %v2961_v33 }
  0x2c   : > { %2642 = vmatmul.mubr.msk.f32.gmra.mrb[12].mxu0 %vm348_vm0, %v328_v27  ;;  %1024 = vst.msk [vmem:[#allocation2 + $0x190] sm:$0x3] %vm975_vm2, %v2961_v33  ;;  %1027 = vst.msk [vmem:[#allocation2 + $0x1a8] sm:$0x3] %vm975_vm2, %v2961_v33 }
  0x2d   : > { %2666 = vmatmul.mubr.msk.f32.gmra.mrb[12].mxu1 %vm348_vm0, %v344_v28  ;;  %2644 = vmatprep.mubr.msk.f32.mxu0 %vm348_vm0, %v329_v29  ;;  %1025 = vst.msk [vmem:[#allocation2 + $0x198] sm:$0xff] %vm972_vm1, %v2961_v33  ;;  %1026 = vst.msk [vmem:[#allocation2 + $0x1a0] sm:$0xff] %vm972_vm1, %v2961_v33 }
  0x2e   : > { %2668 = vmatprep.mubr.msk.f32.mxu1 %vm348_vm0, %v345_v30 }
  0x30   : > { %2645 = vmatmul.mubr.msk.f32.gmra.mrb[14].mxu0 %vm348_vm0, %v330_v31 }
  0x31   : > { %2669 = vmatmul.mubr.msk.f32.gmra.mrb[14].mxu1 %vm348_vm0, %v346_v32 }
  0xe7   : > { %v2625_v35 = vpop.f32.mrb[0].mxu0 }
  0xe8   : > { %v2649_v37 = vpop.f32.mrb[0].mxu1  ;;  %v678_v38 = vmul.f32 %v2625_v35, %v3149_v34  ;;  %v511_v40 = vpop.f32.mrb[1].mxu0 }
  0xe9   : > { %v694_v39 = vmul.f32 %v2649_v37, %v3149_v34  ;;  %v591_v41 = vpop.f32.mrb[1].mxu1  ;;  %v677_v42 = vmul.f32 %v3149_v34, %v511_v40 }
  0xea   : > { %v693_v43 = vmul.f32 %v3149_v34, %v591_v41  ;;  %v3161_v44 = vadd.f32 %v3154_v36, %v678_v38 }
  0xeb   : > { %v3164_v45 = vadd.f32 %v3154_v36, %v694_v39  ;;  %v3167_v46 = vadd.f32 %v3154_v36, %v677_v42  ;;  %v2628_v48 = vpop.f32.mrb[2].mxu0 }
  0xec   : > { %v3170_v47 = vadd.f32 %v3154_v36, %v693_v43  ;;  %v2652_v49 = vpop.f32.mrb[2].mxu1  ;;  %v2504_v50 = vmul.f32 -1.442695, %v3161_v44  ;;  %v680_v52 = vmul.f32 %v2628_v48, %v3149_v34  ;;  %v521_v54 = vpop.f32.mrb[3].mxu0 }
  0xed   : > { %v2520_v51 = vmul.f32 -1.442695, %v3164_v45  ;;  %v696_v53 = vmul.f32 %v2652_v49, %v3149_v34  ;;  %v601_v55 = vpop.f32.mrb[3].mxu1  ;;  %v2503_v56 = vmul.f32 -1.442695, %v3167_v46  ;;  %v679_v58 = vmul.f32 %v3149_v34, %v521_v54 }
  0xee   : > { %v2519_v57 = vmul.f32 -1.442695, %v3170_v47  ;;  %v695_v59 = vmul.f32 %v3149_v34, %v601_v55  ;;  %2682 = vpow2.f32 %v2504_v50  ;;  %v3181_v60 = vadd.f32 %v3154_v36, %v680_v52 }
  0xef   : > { %v3184_v61 = vadd.f32 %v3154_v36, %v696_v53  ;;  %2684 = vpow2.f32 %v2520_v51  ;;  %v3187_v62 = vadd.f32 %v3154_v36, %v679_v58  ;;  %v2631_v0 = vpop.f32.mrb[4].mxu0  ;;  %v3238_v58 = vld [vmem:[%s4790_s4 + $0x1] ss:$0 sm:$0xff] }
  0xf0   : > { %v3190_v63 = vadd.f32 %v3154_v36, %v695_v59  ;;  %v2655_v1 = vpop.f32.mrb[4].mxu1  ;;  %2686 = vpow2.f32 %v2503_v56  ;;  %v2506_v2 = vmul.f32 -1.442695, %v3181_v60  ;;  %v682_v4 = vmul.f32 %v2631_v0, %v3149_v34  ;;  %v531_v5 = vpop.f32.mrb[5].mxu0 }
  0xf1   : > { %v2522_v3 = vmul.f32 -1.442695, %v3184_v61  ;;  %v611_v6 = vpop.f32.mrb[5].mxu1  ;;  %2688 = vpow2.f32 %v2519_v57  ;;  %v2505_v7 = vmul.f32 -1.442695, %v3187_v62  ;;  %v698_v9 = vmul.f32 %v2655_v1, %v3149_v34  ;;  %v1061_v1 = vld [vmem:[#allocation2] sm:$0xff] }
  0xf2   : > { %v2521_v8 = vmul.f32 -1.442695, %v3190_v63  ;;  %2690 = vpow2.f32 %v2506_v2  ;;  %v3199_v10 = vadd.f32 %v3154_v36, %v682_v4  ;;  %v681_v53 = vmul.f32 %v3149_v34, %v531_v5  ;;  %v3244_v2 = vld [vmem:[%s4790_s4] ss:$0 sm:$0xff] }
  0xf3   : > { %2692 = vpow2.f32 %v2522_v3  ;;  %v3202_v11 = vadd.f32 %v3154_v36, %v698_v9  ;;  %v3204_v12 = vpop.f32.mrb[6].mxu0  ;;  %v697_v55 = vmul.f32 %v3149_v34, %v611_v6  ;;  %v1162_v3 = vld [vmem:[#allocation2 + $0x1] sm:$0xff] }
  0xf4   : > { %v3206_v13 = vpop.f32.mrb[6].mxu1  ;;  %2694 = vpow2.f32 %v2505_v7  ;;  %v2508_v14 = vmul.f32 -1.442695, %v3199_v10  ;;  %v3209_v15 = vpop.f32.mrb[7].mxu0  ;;  %v3249_v5 = vadd.f32 %v3154_v36, %v681_v53  ;;  %v1062_v7 = vld [vmem:[#allocation2 + $0x8] sm:$0xff] }
  0xf5   : > { %v3211_v16 = vpop.f32.mrb[7].mxu1  ;;  %2696 = vpow2.f32 %v2521_v8  ;;  %v2524_v17 = vmul.f32 -1.442695, %v3202_v11  ;;  %v3254_v9 = vadd.f32 %v3154_v36, %v697_v55 }
  0xf6   : > { %2698 = vpow2.f32 %v2508_v14 }
  0xf7   : > { %2700 = vpow2.f32 %v2524_v17  ;;  %v3214_v18 = vpop.f32.mrb[8].mxu0  ;;  %v1098_v17 = vmul.f32 %v3244_v2, %v1061_v1 }
  0xf8   : > { %v3216_v19 = vpop.f32.mrb[8].mxu1  ;;  %v2683_v20 = vpop.eup %2682 }
  0xf9   : > { %v3218_v21 = vpop.f32.mrb[9].mxu0  ;;  %v3220_v22 = vpop.f32.mrb[9].mxu1  ;;  %v845_v24 = vadd.f32 1.0, %v2683_v20 }
  0xfa   : > { %v2685_v23 = vpop.eup %2684 }
  0xfb   : > { %v2687_v25 = vpop.eup %2686  ;;  %v861_v26 = vadd.f32 1.0, %v2685_v23  ;;  %2702 = vrcp.f32 %v845_v24  ;;  %v3222_v29 = vpop.f32.mrb[10].mxu0  ;;  %v3263_v24 = vld [vmem:[%s4790_s4 + $0x2] ss:$0 sm:$0xff] }
  0xfc   : > { %v2689_v27 = vpop.eup %2688  ;;  %v844_v28 = vadd.f32 1.0, %v2687_v25  ;;  %v3224_v30 = vpop.f32.mrb[10].mxu1  ;;  %v1263_v25 = vld [vmem:[#allocation2 + $0x2] sm:$0xff] }
  0xfd   : > { %v2691_v31 = vpop.eup %2690  ;;  %2704 = vrcp.f32 %v861_v26  ;;  %v860_v32 = vadd.f32 1.0, %v2689_v27  ;;  %v3226_v33 = vpop.f32.mrb[11].mxu0  ;;  %v1099_v27 = vmul.f32 %v3244_v2, %v1062_v7  ;;  %v683_v7 = vmul.f32 %v3149_v34, %v3209_v15 }
  0xfe   : > { %v2693_v35 = vpop.eup %2692  ;;  %2706 = vrcp.f32 %v844_v28  ;;  %v847_v37 = vadd.f32 1.0, %v2691_v31  ;;  %v3228_v38 = vpop.f32.mrb[11].mxu1  ;;  %v2507_v31 = vmul.f32 -1.442695, %v3249_v5  ;;  %v702_v15 = vmul.f32 %v3216_v19, %v3149_v34  ;;  %v3352_v19 = vld [vmem:[%s4790_s4 + $0x8] ss:$0 sm:$0xff] }
  0xff   : > { %v2695_v39 = vpop.eup %2694  ;;  %2708 = vrcp.f32 %v860_v32  ;;  %v863_v40 = vadd.f32 1.0, %v2693_v35  ;;  %v3230_v52 = vpop.f32.mrb[12].mxu0  ;;  %v1264_v35 = vld [vmem:[#allocation2 + $0xa] sm:$0xff] }
 0x100   : > { %v2697_v41 = vpop.eup %2696  ;;  %2710 = vrcp.f32 %v847_v37  ;;  %v846_v42 = vadd.f32 1.0, %v2695_v39  ;;  %v2523_v39 = vmul.f32 -1.442695, %v3254_v9 }
 0x101   : > { %v2699_v43 = vpop.eup %2698  ;;  %2712 = vrcp.f32 %v863_v40  ;;  %v862_v48 = vadd.f32 1.0, %v2697_v41  ;;  %v1300_v41 = vmul.f32 %v3263_v24, %v1263_v25 }
 0x102   : > { %v2701_v49 = vpop.eup %2700  ;;  %2714 = vrcp.f32 %v846_v42  ;;  %v849_v50 = vadd.f32 1.0, %v2699_v43  ;;  %v3280_v43 = vpop.f32.mrb[12].mxu1 }
 0x103   : > { %2716 = vrcp.f32 %v862_v48  ;;  %v865_v51 = vadd.f32 1.0, %v2701_v49  ;;  %4836 = vst [vmem:[#allocation3_spill] sm:$0xff] %v3280_v43  ;;  %v1301_v49 = vmul.f32 %v3263_v24, %v1264_v35  ;;  %v3367_v35 = vld [vmem:[%s4790_s4 + $0x9] ss:$0 sm:$0xff] }
 0x104   : > { %2718 = vrcp.f32 %v849_v50  ;;  %v3289_v50 = vpop.f32.mrb[13].mxu0 }
 0x105   : > { %2720 = vrcp.f32 %v865_v51  ;;  %v2703_v54 = vpop.eup %2702  ;;  %4837 = vst [vmem:[#allocation4_spill] sm:$0xff] %v3289_v50 }
 0x106   : > { %v941_v57 = vmul.f32 %v2703_v54, %v3161_v44  ;;  %2722 = vpow2.f32 %v2507_v31 }
 0x107   : > { %v2705_v56 = vpop.eup %2704  ;;  %2724 = vpow2.f32 %v2523_v39 }
 0x108   : > { %v2707_v59 = vpop.eup %2706  ;;  %v957_v0 = vmul.f32 %v2705_v56, %v3164_v45  ;;  %1030 = vst.msk [vmem:[#allocation2 + $0x21] sm:$0xff] %vm972_vm1, %v941_v57  ;;  %v1163_v45 = vld [vmem:[#allocation2 + $0x9] sm:$0xff]  ;;  %v3303_v56 = vld [vmem:[%s4790_s4 + $0x5] ss:$0 sm:$0xff] }
 0x109   : > { %v2709_v4 = vpop.eup %2708  ;;  %v940_v44 = vmul.f32 %v2707_v59, %v3167_v46  ;;  %v1199_v46 = vmul.f32 %v3238_v58, %v1162_v3  ;;  %v1200_v28 = vmul.f32 %v3238_v58, %v1163_v45  ;;  %v684_v3 = vmul.f32 %v3204_v12, %v3149_v34  ;;  %v3322_v45 = vld [vmem:[%s4790_s4 + $0x6] ss:$0 sm:$0xff] }
 0x10a   : > { %v2711_v6 = vpop.eup %2710  ;;  %1046 = vst.msk [vmem:[#allocation2 + $0xe1] sm:$0xff] %vm972_vm1, %v957_v0  ;;  %v956_v8 = vmul.f32 %v2709_v4, %v3170_v47  ;;  %v3307_v0 = vpop.f32.mrb[13].mxu1  ;;  %v700_v4 = vmul.f32 %v3206_v13, %v3149_v34  ;;  %v699_v12 = vmul.f32 %v3149_v34, %v3211_v16  ;;  %v686_v13 = vmul.f32 %v3214_v18, %v3149_v34 }
 0x10b   : > { %v2713_v14 = vpop.eup %2712  ;;  %1029 = vst.msk [vmem:[#allocation2 + $0x19] sm:$0xff] %vm972_vm1, %v940_v44  ;;  %v943_v20 = vmul.f32 %v2711_v6, %v3181_v60  ;;  %v1231_v40 = vadd.f32 %v1199_v46, %v1098_v17  ;;  %v1232_v48 = vadd.f32 %v1200_v28, %v1099_v27  ;;  %4838 = vst [vmem:[#allocation5_spill] sm:$0xff] %v3307_v0 }
 0x10c   : > { %v2715_v23 = vpop.eup %2714  ;;  %1045 = vst.msk [vmem:[#allocation2 + $0xd9] sm:$0xff] %vm972_vm1, %v956_v8  ;;  %v959_v47 = vmul.f32 %v2713_v14, %v3184_v61  ;;  %v3337_v25 = vadd.f32 %v3154_v36, %v684_v3  ;;  %v685_v16 = vmul.f32 %v3149_v34, %v3218_v21  ;;  %v3347_v27 = vadd.f32 %v3154_v36, %v683_v7  ;;  %v3399_v7 = vpop.f32.mrb[14].mxu0 }
 0x10d   : > { %v2717_v26 = vpop.eup %2716  ;;  %1032 = vst.msk [vmem:[#allocation2 + $0x39] sm:$0xff] %vm972_vm1, %v943_v20  ;;  %v942_v60 = vmul.f32 %v2715_v23, %v3187_v62  ;;  %v1333_v54 = vadd.f32 %v1301_v49, %v1232_v48  ;;  %v3357_v31 = vadd.f32 %v3154_v36, %v699_v12  ;;  %v3360_v21 = vadd.f32 %v3154_v36, %v686_v13  ;;  %v3384_v49 = vld [vmem:[%s4790_s4 + $0xa] ss:$0 sm:$0xff] }
 0x10e   : > { %v2719_v32 = vpop.eup %2718  ;;  %1048 = vst.msk [vmem:[#allocation2 + $0xf9] sm:$0xff] %vm972_vm1, %v959_v47  ;;  %v958_v37 = vmul.f32 %v2717_v26, %v3190_v63  ;;  %v3286_v63 = vld [vmem:[%s4790_s4 + $0x4] ss:$0 sm:$0xff]  ;;  %v3340_v47 = vadd.f32 %v3154_v36, %v700_v4  ;;  %v3379_v48 = vadd.f32 %v3154_v36, %v685_v16  ;;  %4840 = vst [vmem:[#allocation7_spill] sm:$0xff] %v3399_v7  ;;  %v3486_v7 = vpop.f32.mrb[14].mxu1 }
 0x10f   : > { %v2721_v61 = vpop.eup %2720  ;;  %1031 = vst.msk [vmem:[#allocation2 + $0x31] sm:$0xff] %vm972_vm1, %v942_v60  ;;  %v945_v42 = vmul.f32 %v2719_v32, %v3199_v10  ;;  %v3309_v1 = vld [vmem:[#allocation2 + $0x21] sm:$0xff]  ;;  %4849 = vst [vmem:[#allocation16_spill] sm:$0xff] %v3486_v7 }
 0x110   : > { %1047 = vst.msk [vmem:[#allocation2 + $0xf1] sm:$0xff] %vm972_vm1, %v958_v37  ;;  %v961_v62 = vmul.f32 %v2721_v61, %v3202_v11  ;;  %v1332_v11 = vadd.f32 %v1300_v41, %v1231_v40  ;;  %v2723_v14 = vpop.eup %2722  ;;  %v1504_v17 = vmul.f32 %v3303_v56, %v3309_v1  ;;  %v3334_v23 = vld [vmem:[#allocation2 + $0x22] sm:$0xff]  ;;  %v3372_v40 = vadd.f32 %v3154_v36, %v702_v15 }
 0x111   : > { %1034 = vst.msk [vmem:[#allocation2 + $0x51] sm:$0xff] %vm972_vm1, %v945_v42  ;;  %v2725_v20 = vpop.eup %2724  ;;  %v848_v60 = vadd.f32 1.0, %v2723_v14  ;;  %v1605_v32 = vmul.f32 %v3322_v45, %v3334_v23  ;;  %v2510_v42 = vmul.f32 -1.442695, %v3337_v25  ;;  %4839 = vst [vmem:[#allocation6_spill] sm:$0xff] %v3379_v48 }
 0x112   : > { %v3291_v10 = vld [vmem:[#allocation2 + $0x18] sm:$0xff]  ;;  %v3293_v51 = vld [vmem:[#allocation2 + $0x20] sm:$0xff]  ;;  %1050 = vst.msk [vmem:[#allocation2 + $0x111] sm:$0xff] %vm972_vm1, %v961_v62  ;;  %v864_v61 = vadd.f32 1.0, %v2725_v20  ;;  %v2526_v62 = vmul.f32 -1.442695, %v3340_v47  ;;  %v688_v20 = vmul.f32 %v3222_v29, %v3149_v34 }
 0x113   : > { %v1402_v53 = vmul.f32 %v3286_v63, %v3291_v10  ;;  %v1403_v55 = vmul.f32 %v3286_v63, %v3293_v51  ;;  %v3305_v57 = vld [vmem:[#allocation2 + $0x19] sm:$0xff]  ;;  %2726 = vrcp.f32 %v848_v60  ;;  %v3409_v15 = vmul.f32 -1.442695, %v3379_v48  ;;  %v3491_v48 = vpop.f32.mrb[15].mxu0 }
 0x114   : > { %v1503_v6 = vmul.f32 %v3303_v56, %v3305_v57  ;;  %v3324_v8 = vld [vmem:[#allocation2 + $0x1a] sm:$0xff]  ;;  %2728 = vrcp.f32 %v864_v61  ;;  %v1100_v60 = vmul.f32 %v3244_v2, %v3291_v10  ;;  %4850 = vst [vmem:[#allocation17_spill] sm:$0xff] %v3491_v48 }
 0x115   : > { %v1434_v59 = vadd.f32 %v1402_v53, %v1332_v11  ;;  %v1435_v44 = vadd.f32 %v1403_v55, %v1333_v54  ;;  %v1604_v26 = vmul.f32 %v3322_v45, %v3324_v8  ;;  %v3386_v11 = vld [vmem:[#allocation2 + $0x39] sm:$0xff]  ;;  %v2509_v55 = vmul.f32 -1.442695, %v3347_v27 }
 0x116   : > { %v3354_v28 = vld [vmem:[#allocation2 + $0x30] sm:$0xff]  ;;  %v3369_v39 = vld [vmem:[#allocation2 + $0x38] sm:$0xff]  ;;  %2730 = vpow2.f32 %v2510_v42  ;;  %v3427_v29 = vld [vmem:[%s4791_s5] ss:$0 sm:$0xff]  ;;  %v1202_v42 = vmul.f32 %v3238_v58, %v3309_v1  ;;  %v704_v1 = vmul.f32 %v3224_v30, %v3149_v34 }
 0x117   : > { %v1535_v46 = vadd.f32 %v1503_v6, %v1434_v59  ;;  %v1536_v18 = vadd.f32 %v1504_v17, %v1435_v44  ;;  %v3374_v41 = vld [vmem:[#allocation2 + $0x31] sm:$0xff]  ;;  %v1707_v54 = vmul.f32 %v3352_v19, %v3354_v28  ;;  %v701_v59 = vmul.f32 %v3149_v34, %v3220_v22  ;;  %v3401_v12 = vld [vmem:[#allocation2 + $0x3a] sm:$0xff] }
 0x118   : > { %v3393_v3 = vld [vmem:[#allocation2 + $0x32] sm:$0xff]  ;;  %v1708_v4 = vmul.f32 %v3352_v19, %v3369_v39  ;;  %v2525_v44 = vmul.f32 -1.442695, %v3357_v31  ;;  %v2512_v6 = vmul.f32 -1.442695, %v3360_v21  ;;  %v1808_v14 = vmul.f32 %v3367_v35, %v3374_v41  ;;  %v3459_v30 = vld [vmem:[#allocation2 + $0xda] sm:$0xff] }
 0x119   : > { %v1636_v37 = vadd.f32 %v1604_v26, %v1535_v46  ;;  %v1637_v53 = vadd.f32 %v1605_v32, %v1536_v18  ;;  %v2528_v22 = vmul.f32 -1.442695, %v3372_v40  ;;  %v1809_v17 = vmul.f32 %v3367_v35, %v3386_v11  ;;  %v3435_v10 = vld [vmem:[#allocation2 + $0xd9] sm:$0xff]  ;;  %4847 = vst [vmem:[#allocation14_spill] sm:$0xff] %v3459_v30 }
 0x11a   : > { %v1909_v18 = vmul.f32 %v3384_v49, %v3393_v3  ;;  %v3416_v26 = vadd.f32 %v3154_v36, %v701_v59  ;;  %v1201_v32 = vmul.f32 %v3238_v58, %v3305_v57  ;;  %4843 = vst [vmem:[#allocation10_spill] sm:$0xff] %v3435_v10  ;;  %2732 = vpow2.f32 %v2526_v62  ;;  %v3545_v48 = vld [vmem:[#allocation2 + $0xfa] sm:$0xff] }
 0x11b   : > { %v1739_v13 = vadd.f32 %v1707_v54, %v1636_v37  ;;  %v1740_v46 = vadd.f32 %v1708_v4, %v1637_v53  ;;  %v1910_v37 = vmul.f32 %v3384_v49, %v3401_v12  ;;  %v1101_v53 = vmul.f32 %v3244_v2, %v3293_v51  ;;  %v3433_v54 = vld [vmem:[#allocation2 + $0xd8] sm:$0xff]  ;;  %v3440_v4 = vld [vmem:[%s4792_s6] ss:$0 sm:$0xff] }
 0x11c   : > { %4841 = vst [vmem:[#allocation8_spill] sm:$0xff] %v3416_v26  ;;  %4842 = vst [vmem:[#allocation9_spill] sm:$0xff] %v3433_v54  ;;  %2734 = vpow2.f32 %v2509_v55  ;;  %v687_v62 = vmul.f32 %v3149_v34, %v3226_v33  ;;  %v1116_v55 = vmul.f32 %v3244_v2, %v3433_v54  ;;  %v703_v33 = vmul.f32 %v3149_v34, %v3228_v38 }
 0x11d   : > { %v1840_v16 = vadd.f32 %v1808_v14, %v1739_v13  ;;  %v1841_v61 = vadd.f32 %v1809_v17, %v1740_v46  ;;  %v3443_v13 = vadd.f32 %v3154_v36, %v688_v20  ;;  %2736 = vpow2.f32 %v2525_v44  ;;  %v3451_v17 = vld [vmem:[#allocation2 + $0xe1] sm:$0xff] }
 0x11e   : > { %v2527_v14 = vmul.f32 -1.442695, %v3416_v26  ;;  %4845 = vst [vmem:[#allocation12_spill] sm:$0xff] %v3451_v17  ;;  %v1233_v46 = vadd.f32 %v1201_v32, %v1100_v60  ;;  %v1217_v20 = vmul.f32 %v3238_v58, %v3435_v10  ;;  %2738 = vpow2.f32 %v2512_v6  ;;  %v2727_v60 = vpop.eup %2726 }
 0x11f   : > { %v1941_v57 = vadd.f32 %v1909_v18, %v1840_v16  ;;  %v1942_v59 = vadd.f32 %v1910_v37, %v1841_v61  ;;  %4844 = vst [vmem:[#allocation11_spill] sm:$0xff] %v3443_v13  ;;  %v3453_v16 = vld [vmem:[#allocation2 + $0xe0] sm:$0xff]  ;;  %v1234_v18 = vadd.f32 %v1202_v42, %v1101_v53  ;;  %v1303_v32 = vmul.f32 %v3263_v24, %v3334_v23 }
 0x120   : > { %4846 = vst [vmem:[#allocation13_spill] sm:$0xff] %v3453_v16  ;;  %v1302_v61 = vmul.f32 %v3263_v24, %v3324_v8  ;;  %2740 = vpow2.f32 %v2528_v22  ;;  %v1218_v42 = vmul.f32 %v3238_v58, %v3451_v17  ;;  %v1117_v6 = vmul.f32 %v3244_v2, %v3453_v16  ;;  %v3481_v23 = vld [vmem:[#allocation2 + $0xe2] sm:$0xff]  ;;  %v3567_v17 = vld [vmem:[#allocation2 + $0xf2] sm:$0xff] }
 0x121   : > { %v1980_v51 = vmul.f32 %v3427_v29, %v1941_v57  ;;  %v1981_v44 = vmul.f32 %v3427_v29, %v1942_v59  ;;  %v2729_v59 = vpop.eup %2728  ;;  %v1318_v38 = vmul.f32 %v3263_v24, %v3459_v30  ;;  %4848 = vst [vmem:[#allocation15_spill] sm:$0xff] %v3481_v23  ;;  %v1249_v8 = vadd.f32 %v1217_v20, %v1116_v55 }
 0x122   : > { %v2731_v0 = vpop.eup %2730  ;;  %v1335_v50 = vadd.f32 %v1303_v32, %v1234_v18  ;;  %v1405_v43 = vmul.f32 %v3286_v63, %v3369_v39  ;;  %v944_v26 = vmul.f32 %v2727_v60, %v3249_v5  ;;  %v1319_v20 = vmul.f32 %v3263_v24, %v3481_v23  ;;  %v3503_v60 = vld [vmem:[#allocation2 + $0xf0] sm:$0xff] }
 0x123   : > { %v3463_v37 = vadd.f32 %v3440_v4, %v1980_v51  ;;  %v3472_v57 = vadd.f32 %v3440_v4, %v1981_v44  ;;  %v1334_v51 = vadd.f32 %v1302_v61, %v1233_v46  ;;  %v1404_v44 = vmul.f32 %v3286_v63, %v3354_v28  ;;  %4852 = vst [vmem:[#allocation19_spill] sm:$0xff] %v3503_v60 }
 0x124   : > { %v960_v46 = vmul.f32 %v2729_v59, %v3254_v9  ;;  %v2733_v55 = vpop.eup %2732  ;;  %v1250_v61 = vadd.f32 %v1218_v42, %v1117_v6  ;;  %1033 = vst.msk [vmem:[#allocation2 + $0x49] sm:$0xff] %vm972_vm1, %v944_v26  ;;  %v3498_v18 = vmul.f32 -1.442695, %v3443_v13  ;;  %v3501_v32 = vadd.f32 %v3154_v36, %v704_v1  ;;  %v3516_v42 = vld [vmem:[#allocation2 + $0xf9] sm:$0xff] }
 0x125   : > { %v2552_v53 = vmul.f32 -1.442695, %v3463_v37  ;;  %v2553_v22 = vmul.f32 -1.442695, %v3472_v57  ;;  %v1436_v5 = vadd.f32 %v1404_v44, %v1334_v51  ;;  %v3510_v9 = vadd.f32 %v3154_v36, %v687_v62  ;;  %4854 = vst [vmem:[#allocation21_spill] sm:$0xff] %v3516_v42 }
 0x126   : > { %4851 = vst [vmem:[#allocation18_spill] sm:$0xff] %v3501_v32  ;;  %1049 = vst.msk [vmem:[#allocation2 + $0x109] sm:$0xff] %vm972_vm1, %v960_v46  ;;  %v3514_v26 = vmul.f32 %v3230_v52, %v3149_v34  ;;  %v1350_v1 = vadd.f32 %v1318_v38, %v1249_v8  ;;  %v1437_v6 = vadd.f32 %v1405_v43, %v1335_v50  ;;  %v3537_v38 = vpop.f32.mrb[15].mxu1 }
 0x127   : > { %2742 = vpow2.f32 %v2552_v53  ;;  %v2735_v53 = vpop.eup %2734  ;;  %4853 = vst [vmem:[#allocation20_spill] sm:$0xff] %v3510_v9  ;;  %v3519_v51 = vadd.f32 %v3154_v36, %v703_v33  ;;  %v3523_v44 = vmul.f32 %v3238_v58, %v3386_v11  ;;  %v1506_v34 = vmul.f32 %v3303_v56, %v3386_v11  ;;  %4856 = vst [vmem:[#allocation23_spill] sm:$0xff] %v3537_v38 }
 0x128   : > { %2744 = vpow2.f32 %v2553_v22  ;;  %v3505_v22 = vld [vmem:[#allocation2 + $0xf8] sm:$0xff]  ;;  %v2737_v59 = vpop.eup %2736  ;;  %v1505_v52 = vmul.f32 %v3303_v56, %v3374_v41  ;;  %v1351_v43 = vadd.f32 %v1319_v20, %v1250_v61  ;;  %v1420_v50 = vmul.f32 %v3286_v63, %v3503_v60 }
 0x129   : > { %2746 = vpow2.f32 %v3409_v15  ;;  %4855 = vst [vmem:[#allocation22_spill] sm:$0xff] %v3519_v51  ;;  %v3527_v15 = vmul.f32 %v3263_v24, %v3401_v12  ;;  %v2739_v62 = vpop.eup %2738  ;;  %v851_v33 = vadd.f32 1.0, %v2731_v0  ;;  %v1607_v46 = vmul.f32 %v3322_v45, %v3401_v12 }
 0x12a   : > { %2748 = vpow2.f32 %v2527_v14  ;;  %v1421_v14 = vmul.f32 %v3286_v63, %v3505_v22  ;;  %v2741_v8 = vpop.eup %2740  ;;  %v3543_v11 = vmul.f32 %v3238_v58, %v3516_v42  ;;  %v1537_v20 = vadd.f32 %v1505_v52, %v1436_v5  ;;  %v3559_v5 = vld [vmem:[#allocation2 + $0xf1] sm:$0xff] }
 0x12b   : > { %v867_v61 = vadd.f32 1.0, %v2733_v55  ;;  %v1522_v7 = vmul.f32 %v3303_v56, %v3516_v42  ;;  %v1623_v0 = vmul.f32 %v3322_v45, %v3545_v48  ;;  %v1538_v13 = vadd.f32 %v1506_v34, %v1437_v6  ;;  %4857 = vst [vmem:[#allocation24_spill] sm:$0xff] %v3559_v5  ;;  %v3563_v6 = vld [vmem:[#allocation2 + $0x48] sm:$0xff]  ;;  %v3565_v54 = vld [vmem:[#allocation2 + $0x50] sm:$0xff] }
 0x12c   : > { %v850_v38 = vadd.f32 1.0, %v2735_v53  ;;  %v1102_v30 = vmul.f32 %v3244_v2, %v3354_v28  ;;  %v1103_v12 = vmul.f32 %v3244_v2, %v3369_v39  ;;  %v1203_v10 = vmul.f32 %v3238_v58, %v3374_v41  ;;  %4858 = vst [vmem:[#allocation25_spill] sm:$0xff] %v3563_v6  ;;  %4859 = vst [vmem:[#allocation26_spill] sm:$0xff] %v3565_v54  ;;  %v3569_v51 = vld [vmem:[#allocation2 + $0x49] sm:$0xff] }
 0x12d   : > { %v1606_v55 = vmul.f32 %v3322_v45, %v3393_v3  ;;  %v1452_v42 = vadd.f32 %v1420_v50, %v1350_v1  ;;  %v1453_v16 = vadd.f32 %v1421_v14, %v1351_v43  ;;  %v1521_v53 = vmul.f32 %v3303_v56, %v3559_v5 }
 0x12e   : > { %2750 = vrcp.f32 %v851_v33  ;;  %v866_v41 = vadd.f32 1.0, %v2737_v59  ;;  %v1639_v1 = vadd.f32 %v1607_v46, %v1538_v13  ;;  %v853_v43 = vadd.f32 1.0, %v2739_v62  ;;  %v3575_v33 = vld [vmem:[#allocation2 + $0x51] sm:$0xff] }
 0x12f   : > { %v1638_v34 = vadd.f32 %v1606_v55, %v1537_v20  ;;  %2752 = vrcp.f32 %v867_v61  ;;  %v1622_v14 = vmul.f32 %v3322_v45, %v3567_v17  ;;  %v1709_v20 = vmul.f32 %v3352_v19, %v3563_v6  ;;  %v3581_v13 = vld [vmem:[#allocation2 + $0x4a] sm:$0xff]  ;;  %v3585_v46 = vld [vmem:[#allocation2 + $0x52] sm:$0xff] }
 0x130   : > { %2754 = vrcp.f32 %v850_v38  ;;  %v869_v59 = vadd.f32 1.0, %v2741_v8  ;;  %v1553_v55 = vadd.f32 %v1521_v53, %v1452_v42  ;;  %v1710_v62 = vmul.f32 %v3352_v19, %v3565_v54 }
 0x131   : > { %v2743_v52 = vpop.eup %2742  ;;  %v1235_v38 = vadd.f32 %v1203_v10, %v1102_v30  ;;  %v1304_v8 = vmul.f32 %v3263_v24, %v3393_v3  ;;  %v1911_v10 = vmul.f32 %v3384_v49, %v3581_v13  ;;  %v1912_v53 = vmul.f32 %v3384_v49, %v3585_v46 }
 0x132   : > { %v2745_v28 = vpop.eup %2744  ;;  %v2147_v39 = vadd.f32 1.0, %v2743_v52  ;;  %v1554_v52 = vadd.f32 %v1522_v7, %v1453_v16  ;;  %v1742_v7 = vadd.f32 %v1710_v62, %v1639_v1  ;;  %v1236_v16 = vadd.f32 %v3523_v44, %v1103_v12  ;;  %v3604_v12 = vld [vmem:[#allocation2 + $0x108] sm:$0xff]  ;;  %v3606_v62 = vld [vmem:[#allocation2 + $0x110] sm:$0xff] }
 0x133   : > { %v2148_v23 = vadd.f32 1.0, %v2745_v28  ;;  %v3571_v50 = vpop.eup %2746  ;;  %v1741_v28 = vadd.f32 %v1709_v20, %v1638_v34  ;;  %v1654_v30 = vadd.f32 %v1622_v14, %v1553_v55  ;;  %v1336_v20 = vadd.f32 %v1304_v8, %v1235_v38 }
 0x134   : > { %4860 = vst [vmem:[#allocation27_spill] sm:$0xff] %v3571_v50  ;;  %2756 = vrcp.f32 %v2147_v39  ;;  %v3579_v61 = vpop.eup %2748  ;;  %v1810_v39 = vmul.f32 %v3367_v35, %v3569_v51  ;;  %v1118_v3 = vmul.f32 %v3244_v2, %v3503_v60  ;;  %v1219_v1 = vmul.f32 %v3238_v58, %v3559_v5  ;;  %v3627_v5 = vld [vmem:[#allocation2 + $0x10a] sm:$0xff] }
 0x135   : > { %4861 = vst [vmem:[#allocation28_spill] sm:$0xff] %v3579_v61  ;;  %2758 = vrcp.f32 %v2148_v23  ;;  %v1811_v23 = vmul.f32 %v3367_v35, %v3575_v33  ;;  %v1725_v38 = vmul.f32 %v3352_v19, %v3604_v12  ;;  %4863 = vst [vmem:[#allocation30_spill] sm:$0xff] %v3627_v5 }
 0x136   : > { %2760 = vrcp.f32 %v866_v41  ;;  %v1842_v42 = vadd.f32 %v1810_v39, %v1741_v28  ;;  %v1655_v41 = vadd.f32 %v1623_v0, %v1554_v52  ;;  %v3612_v52 = vld [vmem:[#allocation2 + $0x109] sm:$0xff]  ;;  %v1726_v28 = vmul.f32 %v3352_v19, %v3606_v62 }
 0x137   : > { %2762 = vrcp.f32 %v853_v43  ;;  %v1843_v34 = vadd.f32 %v1811_v23, %v1742_v7  ;;  %v3602_v43 = vld [vmem:[#allocation2 + $0x111] sm:$0xff]  ;;  %v1337_v23 = vadd.f32 %v3527_v15, %v1236_v16  ;;  %v1757_v60 = vadd.f32 %v1725_v38, %v1654_v30 }
 0x138   : > { %2764 = vrcp.f32 %v869_v59  ;;  %v1943_v44 = vadd.f32 %v1911_v10, %v1842_v42  ;;  %v2751_v14 = vpop.eup %2750  ;;  %v3608_v59 = vld [vmem:[#allocation2 + $0x112] sm:$0xff]  ;;  %v1827_v0 = vmul.f32 %v3367_v35, %v3602_v43  ;;  %v1826_v42 = vmul.f32 %v3367_v35, %v3612_v52 }
 0x139   : > { %4862 = vst [vmem:[#allocation29_spill] sm:$0xff] %v3608_v59  ;;  %v1944_v55 = vadd.f32 %v1912_v53, %v1843_v34  ;;  %v2753_v39 = vpop.eup %2752  ;;  %v1928_v8 = vmul.f32 %v3384_v49, %v3608_v59  ;;  %v1406_v53 = vmul.f32 %v3286_v63, %v3563_v6  ;;  %v1758_v61 = vadd.f32 %v1726_v28, %v1655_v41 }
 0x13a   : > { %v1982_v7 = vmul.f32 %v3427_v29, %v1943_v44  ;;  %v2755_v10 = vpop.eup %2754  ;;  %v1407_v15 = vmul.f32 %v3286_v63, %v3565_v54  ;;  %v1927_v44 = vmul.f32 %v3384_v49, %v3627_v5  ;;  %v947_v30 = vmul.f32 %v2751_v14, %v3337_v25 }
 0x13b   : > { %v1983_v34 = vmul.f32 %v3427_v29, %v1944_v55  ;;  %v1858_v28 = vadd.f32 %v1826_v42, %v1757_v60  ;;  %v1859_v6 = vadd.f32 %v1827_v0, %v1758_v61  ;;  %v963_v5 = vmul.f32 %v2753_v39, %v3340_v47 }
 0x13c   : > { %v3639_v16 = vadd.f32 %v3440_v4, %v1982_v7  ;;  %1036 = vst.msk [vmem:[#allocation2 + $0x69] sm:$0xff] %vm972_vm1, %v947_v30  ;;  %v946_v25 = vmul.f32 %v2755_v10, %v3347_v27  ;;  %v1119_v42 = vmul.f32 %v3244_v2, %v3505_v22  ;;  %v1320_v47 = vmul.f32 %v3263_v24, %v3567_v17 }
 0x13d   : > { %v3646_v38 = vadd.f32 %v3440_v4, %v1983_v34  ;;  %v1959_v60 = vadd.f32 %v1927_v44, %v1858_v28  ;;  %v1960_v61 = vadd.f32 %v1928_v8, %v1859_v6  ;;  %1052 = vst.msk [vmem:[#allocation2 + $0x129] sm:$0xff] %vm972_vm1, %v963_v5  ;;  %v1251_v8 = vadd.f32 %v1219_v1, %v1118_v3 }
 0x13e   : > { %v2757_v50 = vpop.eup %2756  ;;  %v2554_v7 = vmul.f32 -1.442695, %v3639_v16  ;;  %1035 = vst.msk [vmem:[#allocation2 + $0x61] sm:$0xff] %vm972_vm1, %v946_v25  ;;  %v1439_v44 = vadd.f32 %v1407_v15, %v1337_v23  ;;  %v1252_v28 = vadd.f32 %v3543_v11, %v1119_v42  ;;  %v3697_v3 = vmul.f32 -1.442695, %v3501_v32  ;;  %v4869_v25 = vld [vmem:[#allocation12_spill] sm:$0xff] }
 0x13f   : > { %v2759_v41 = vpop.eup %2758  ;;  %v2243_v55 = vmul.f32 %v2757_v50, %v3463_v37  ;;  %v2555_v50 = vmul.f32 -1.442695, %v3646_v38  ;;  %v1998_v6 = vmul.f32 %v3427_v29, %v1959_v60  ;;  %v1999_v39 = vmul.f32 %v3427_v29, %v1960_v61 }
 0x140   : > { %v2761_v59 = vpop.eup %2760  ;;  %v2244_v54 = vmul.f32 %v2759_v41, %v3472_v57  ;;  %2766 = vpow2.f32 %v2554_v7  ;;  %4865 = vst [vmem:[#allocation32_spill] sm:$0xff] %v3697_v3  ;;  %v1352_v1 = vadd.f32 %v1320_v47, %v1251_v8  ;;  %v1422_v15 = vmul.f32 %v3286_v63, %v3604_v12 }
 0x141   : > { %v2763_v14 = vpop.eup %2762  ;;  %2275 = vst.msk [vmem:[%s3634_s22] sm:$0xff] %vm972_vm1, %v2243_v55  ;;  %v2307_v37 = vsel %vm972_vm1, %v2243_v55, 0.0  ;;  %2768 = vpow2.f32 %v2555_v50  ;;  %v962_v10 = vmul.f32 %v2761_v59, %v3357_v31  ;;  %v3673_v30 = vadd.f32 %v3440_v4, %v1998_v6  ;;  %v4876_v6 = vld [vmem:[#allocation9_spill] sm:$0xff] }
 0x142   : > { %v2765_v0 = vpop.eup %2764  ;;  %2276 = vst.msk [vmem:[%s3634_s22 + $0x8] sm:$0xff] %vm972_vm1, %v2244_v54  ;;  %v2308_v57 = vsel %vm972_vm1, %v2244_v54, 0.0  ;;  %v1438_v54 = vadd.f32 %v1406_v53, %v1336_v20  ;;  %v949_v34 = vmul.f32 %v2763_v14, %v3360_v21  ;;  %v3676_v5 = vadd.f32 %v3440_v4, %v1999_v39 }
 0x143   : > { %v3666_v27 = vadd.f32 %v2308_v57, %v2307_v37  ;;  %v965_v41 = vmul.f32 %v2765_v0, %v3372_v40  ;;  %v1321_v55 = vmul.f32 %v3263_v24, %v3545_v48  ;;  %1051 = vst.msk [vmem:[#allocation2 + $0x121] sm:$0xff] %vm972_vm1, %v962_v10  ;;  %2770 = vpow2.f32 %v3498_v18  ;;  %v4872_v0 = vld [vmem:[#allocation15_spill] sm:$0xff] }
 0x144   : > { %1038 = vst.msk [vmem:[#allocation2 + $0x81] sm:$0xff] %vm972_vm1, %v949_v34  ;;  %v3687_v31 = vadd.f32 %v3154_v36, %v3514_v26  ;;  %v1508_v21 = vmul.f32 %v3303_v56, %v3575_v33  ;;  %v1507_v40 = vmul.f32 %v3303_v56, %v3569_v51  ;;  %v2570_v20 = vmul.f32 -1.442695, %v3673_v30  ;;  %v4867_v36 = vld [vmem:[#allocation22_spill] sm:$0xff] }
 0x145   : > { %v2571_v11 = vmul.f32 -1.442695, %v3676_v5  ;;  %1054 = vst.msk [vmem:[#allocation2 + $0x141] sm:$0xff] %vm972_vm1, %v965_v41  ;;  %v3700_v18 = vmul.f32 -1.442695, %v3510_v9  ;;  %v1353_v53 = vadd.f32 %v1321_v55, %v1252_v28  ;;  %v1423_v7 = vmul.f32 %v3286_v63, %v3606_v62  ;;  %v3736_v8 = vld [vmem:[#allocation2 + $0x60] sm:$0xff] }
 0x146   : > { %4864 = vst [vmem:[#allocation31_spill] sm:$0xff] %v3687_v31  ;;  %v3703_v26 = vmul.f32 -1.442695, %v4867_v36  ;;  %v1539_v59 = vadd.f32 %v1507_v40, %v1438_v54  ;;  %v1540_v23 = vadd.f32 %v1508_v21, %v1439_v44  ;;  %2772 = vpow2.f32 %v2570_v20  ;;  %v3738_v54 = vld [vmem:[#allocation2 + $0x68] sm:$0xff] }
 0x147   : > { %4866 = vst [vmem:[#allocation33_spill] sm:$0xff] %v3700_v18  ;;  %2774 = vpow2.f32 %v2571_v11  ;;  %v3711_v14 = vmul.f32 %v3303_v56, %v4869_v25  ;;  %v1609_v37 = vmul.f32 %v3322_v45, %v3585_v46  ;;  %v1608_v50 = vmul.f32 %v3322_v45, %v3581_v13  ;;  %v3744_v11 = vld [vmem:[#allocation2 + $0x69] sm:$0xff] }
 0x148   : > { %4868 = vst [vmem:[#allocation34_spill] sm:$0xff] %v3703_v26  ;;  %v3718_v60 = vmul.f32 -1.442695, %v3687_v31  ;;  %v3722_v57 = vmul.f32 %v3322_v45, %v4872_v0  ;;  %v3726_v42 = vmul.f32 %v3367_v35, %v4869_v25  ;;  %v3730_v47 = vmul.f32 %v3384_v49, %v4872_v0  ;;  %v3746_v25 = vld [vmem:[#allocation2 + $0x61] sm:$0xff] }
 0x149   : > { %4870 = vst [vmem:[#allocation12_spill] sm:$0xff] %v3711_v14  ;;  %v3734_v39 = vmul.f32 %v3286_v63, %v4876_v6  ;;  %v1524_v34 = vmul.f32 %v3303_v56, %v3602_v43  ;;  %v1640_v44 = vadd.f32 %v1608_v50, %v1539_v59  ;;  %v1641_v55 = vadd.f32 %v1609_v37, %v1540_v23  ;;  %v4878_v0 = vld [vmem:[#allocation13_spill] sm:$0xff]  ;;  %v4880_v37 = vld [vmem:[#allocation27_spill] sm:$0xff]  ;;  %v4883_v31 = vld [vmem:[#allocation30_spill] sm:$0xff] }
 0x14a   : > { %4871 = vst [vmem:[#allocation35_spill] sm:$0xff] %v3718_v60  ;;  %v2767_v61 = vpop.eup %2766  ;;  %4873 = vst [vmem:[#allocation15_spill] sm:$0xff] %v3722_v57  ;;  %v1454_v21 = vadd.f32 %v1422_v15, %v1352_v1  ;;  %v1455_v40 = vadd.f32 %v1423_v7, %v1353_v53  ;;  %v1523_v20 = vmul.f32 %v3303_v56, %v3612_v52  ;;  %v3760_v15 = vld [vmem:[#allocation2 + $0x6a] sm:$0xff]  ;;  %v3762_v7 = vld [vmem:[#allocation2 + $0x62] sm:$0xff]  ;;  %v852_v50 = vadd.f32 1.0, %v4880_v37 }
 0x14b   : > { %4874 = vst [vmem:[#allocation36_spill] sm:$0xff] %v3726_v42  ;;  %4875 = vst [vmem:[#allocation37_spill] sm:$0xff] %v3730_v47  ;;  %v2769_v10 = vpop.eup %2768  ;;  %v2149_v41 = vadd.f32 1.0, %v2767_v61  ;;  %v3750_v47 = vmul.f32 %v3286_v63, %v4878_v0  ;;  %v1711_v59 = vmul.f32 %v3352_v19, %v3736_v8  ;;  %v1712_v23 = vmul.f32 %v3352_v19, %v3738_v54  ;;  %v4881_v61 = vld [vmem:[#allocation28_spill] sm:$0xff]  ;;  %v4885_v26 = vld [vmem:[#allocation26_spill] sm:$0xff] }
 0x14c   : > { %4877 = vst [vmem:[#allocation9_spill] sm:$0xff] %v3734_v39  ;;  %v2150_v28 = vadd.f32 1.0, %v2769_v10  ;;  %v3758_v53 = vmul.f32 %v3238_v58, %v3575_v33  ;;  %v868_v10 = vadd.f32 1.0, %v4881_v61  ;;  %v1812_v14 = vmul.f32 %v3367_v35, %v3746_v25 }
 0x14d   : > { %4879 = vst [vmem:[#allocation13_spill] sm:$0xff] %v3750_v47  ;;  %2776 = vrcp.f32 %v2149_v41  ;;  %v2771_v1 = vpop.eup %2770  ;;  %v1813_v41 = vmul.f32 %v3367_v35, %v3744_v11  ;;  %v1743_v42 = vadd.f32 %v1711_v59, %v1640_v44  ;;  %v1744_v57 = vadd.f32 %v1712_v23, %v1641_v55  ;;  %v4882_v47 = vld [vmem:[#allocation29_spill] sm:$0xff] }
 0x14e   : > { %2778 = vrcp.f32 %v2150_v28  ;;  %v1625_v33 = vmul.f32 %v3322_v45, %v4882_v47  ;;  %v1555_v28 = vadd.f32 %v1523_v20, %v1454_v21  ;;  %v1556_v39 = vadd.f32 %v1524_v34, %v1455_v40  ;;  %v4884_v59 = vld [vmem:[#allocation25_spill] sm:$0xff] }
 0x14f   : > { %v1624_v36 = vmul.f32 %v3322_v45, %v4883_v31  ;;  %v1914_v37 = vmul.f32 %v3384_v49, %v3760_v15  ;;  %v1844_v61 = vadd.f32 %v1812_v14, %v1743_v42  ;;  %v1845_v32 = vadd.f32 %v1813_v41, %v1744_v57  ;;  %v3784_v42 = vld [vmem:[#allocation2 + $0x129] sm:$0xff] }
 0x150   : > { %v2773_v9 = vpop.eup %2772  ;;  %v1913_v44 = vmul.f32 %v3384_v49, %v3762_v7  ;;  %v1104_v23 = vmul.f32 %v3244_v2, %v4884_v59  ;;  %2780 = vrcp.f32 %v852_v50  ;;  %v855_v21 = vadd.f32 1.0, %v2771_v1  ;;  %4886 = vst [vmem:[#allocation27_spill] sm:$0xff] %v3784_v42  ;;  %v3788_v50 = vld [vmem:[#allocation2 + $0x120] sm:$0xff] }
 0x151   : > { %v2775_v55 = vpop.eup %2774  ;;  %v2165_v60 = vadd.f32 1.0, %v2773_v9  ;;  %v1946_v20 = vadd.f32 %v1914_v37, %v1845_v32  ;;  %2782 = vrcp.f32 %v868_v10  ;;  %v1105_v18 = vmul.f32 %v3244_v2, %v4885_v26  ;;  %v3790_v32 = vld [vmem:[#allocation2 + $0x128] sm:$0xff] }
 0x152   : > { %v2166_v34 = vadd.f32 1.0, %v2775_v55  ;;  %v1945_v40 = vadd.f32 %v1913_v44, %v1844_v61  ;;  %v1656_v3 = vadd.f32 %v1624_v36, %v1555_v28  ;;  %v1657_v14 = vadd.f32 %v1625_v33, %v1556_v39  ;;  %v3792_v10 = vld [vmem:[#allocation2 + $0x12a] sm:$0xff]  ;;  %v3796_v26 = vld [vmem:[#allocation2 + $0x121] sm:$0xff] }
 0x153   : > { %2784 = vrcp.f32 %v2165_v60  ;;  %v1205_v57 = vmul.f32 %v3238_v58, %v3569_v51  ;;  %v1985_v1 = vmul.f32 %v3427_v29, %v1946_v20  ;;  %4887 = vst [vmem:[#allocation28_spill] sm:$0xff] %v3792_v10  ;;  %v1829_v36 = vmul.f32 %v3367_v35, %v3784_v42  ;;  %v3810_v37 = vld [vmem:[#allocation2 + $0x122] sm:$0xff] }
 0x154   : > { %2786 = vrcp.f32 %v2166_v34  ;;  %v1984_v9 = vmul.f32 %v3427_v29, %v1945_v40  ;;  %v1727_v51 = vmul.f32 %v3352_v19, %v3788_v50  ;;  %v1728_v60 = vmul.f32 %v3352_v19, %v3790_v32 }
 0x155   : > { %2788 = vrcp.f32 %v855_v21  ;;  %v1930_v41 = vmul.f32 %v3384_v49, %v3792_v10  ;;  %v3808_v28 = vadd.f32 %v3440_v4, %v1985_v1  ;;  %v1828_v61 = vmul.f32 %v3367_v35, %v3796_v26  ;;  %v4888_v10 = vld [vmem:[#allocation10_spill] sm:$0xff] }
 0x156   : > { %v3805_v33 = vadd.f32 %v3440_v4, %v1984_v9  ;;  %v1759_v59 = vadd.f32 %v1727_v51, %v1656_v3  ;;  %v1760_v21 = vadd.f32 %v1728_v60, %v1657_v14  ;;  %v1929_v34 = vmul.f32 %v3384_v49, %v3810_v37 }
 0x157   : > { %v2777_v39 = vpop.eup %2776  ;;  %v1237_v40 = vadd.f32 %v1205_v57, %v1104_v23  ;;  %v2557_v1 = vmul.f32 -1.442695, %v3808_v28  ;;  %v3822_v42 = vmul.f32 %v3303_v56, %v4888_v10  ;;  %v1238_v51 = vadd.f32 %v3758_v53, %v1105_v18 }
 0x158   : > { %v2779_v44 = vpop.eup %2778  ;;  %v2245_v55 = vmul.f32 %v2777_v39, %v3639_v16  ;;  %v2556_v9 = vmul.f32 -1.442695, %v3805_v33  ;;  %v1860_v3 = vadd.f32 %v1828_v61, %v1759_v59  ;;  %v1861_v14 = vadd.f32 %v1829_v36, %v1760_v21 }
 0x159   : > { %v2246_v20 = vmul.f32 %v2779_v44, %v3646_v38  ;;  %4889 = vst [vmem:[#allocation29_spill] sm:$0xff] %v3822_v42  ;;  %v1306_v23 = vmul.f32 %v3263_v24, %v3581_v13  ;;  %v1307_v36 = vmul.f32 %v3263_v24, %v3585_v46  ;;  %v1120_v18 = vmul.f32 %v3244_v2, %v3604_v12  ;;  %v4890_v46 = vld [vmem:[#allocation14_spill] sm:$0xff] }
 0x15a   : > { %2277 = vst.msk [vmem:[%s3634_s22 + $0x10] sm:$0xff] %vm972_vm1, %v2245_v55  ;;  %v2310_v16 = vsel %vm972_vm1, %v2245_v55, 0.0  ;;  %2790 = vpow2.f32 %v2556_v9  ;;  %v2781_v57 = vpop.eup %2780  ;;  %v1961_v39 = vadd.f32 %v1929_v34, %v1860_v3  ;;  %v1962_v44 = vadd.f32 %v1930_v41, %v1861_v14  ;;  %v4894_v3 = vld [vmem:[#allocation6_spill] sm:$0xff] }
 0x15b   : > { %2278 = vst.msk [vmem:[%s3634_s22 + $0x18] sm:$0xff] %vm972_vm1, %v2246_v20  ;;  %v2311_v38 = vadd.f32 %v2310_v16, %v3666_v27  ;;  %2792 = vpow2.f32 %v2557_v1  ;;  %v2312_v60 = vsel %vm972_vm1, %v2246_v20, 0.0  ;;  %v2783_v42 = vpop.eup %2782  ;;  %v1338_v61 = vadd.f32 %v1306_v23, %v1237_v40 }
 0x15c   : > { %v1221_v27 = vmul.f32 %v3238_v58, %v3612_v52  ;;  %v1408_v55 = vmul.f32 %v3286_v63, %v3736_v8  ;;  %v2000_v41 = vmul.f32 %v3427_v29, %v1961_v39  ;;  %v2001_v59 = vmul.f32 %v3427_v29, %v1962_v44 }
 0x15d   : > { %v3838_v13 = vadd.f32 %v2312_v60, %v2311_v38  ;;  %v2785_v53 = vpop.eup %2784  ;;  %v3848_v34 = vmul.f32 %v3322_v45, %v4890_v46  ;;  %v1339_v40 = vadd.f32 %v1307_v36, %v1238_v51  ;;  %v1409_v52 = vmul.f32 %v3286_v63, %v3738_v54 }
 0x15e   : > { %v2787_v21 = vpop.eup %2786  ;;  %v3851_v12 = vmul.f32 %v2785_v53, %v3673_v30  ;;  %v3859_v1 = vadd.f32 %v3440_v4, %v2000_v41  ;;  %v3862_v16 = vadd.f32 %v3440_v4, %v2001_v59  ;;  %v948_v14 = vmul.f32 %v2781_v57, %v4894_v3 }
 0x15f   : > { %4891 = vst [vmem:[#allocation30_spill] sm:$0xff] %v3848_v34  ;;  %v2789_v20 = vpop.eup %2788  ;;  %v3856_v9 = vmul.f32 %v2787_v21, %v3676_v5  ;;  %v1222_v30 = vmul.f32 %v3238_v58, %v3602_v43  ;;  %v1121_v51 = vmul.f32 %v3244_v2, %v3606_v62  ;;  %v1322_v23 = vmul.f32 %v3263_v24, %v4883_v31  ;;  %v4895_v5 = vld [vmem:[#allocation8_spill] sm:$0xff]  ;;  %v4898_v31 = vld [vmem:[#allocation11_spill] sm:$0xff]  ;;  %v4901_v21 = vld [vmem:[#allocation21_spill] sm:$0xff] }
 0x160   : > { %4892 = vst [vmem:[#allocation25_spill] sm:$0xff] %v3851_v12  ;;  %2293 = vst.msk [vmem:[%s3634_s22 + $0x90] sm:$0xff] %vm972_vm1, %v3851_v12  ;;  %v964_v38 = vmul.f32 %v2783_v42, %v4895_v5  ;;  %v1253_v60 = vadd.f32 %v1221_v27, %v1120_v18  ;;  %v1440_v39 = vadd.f32 %v1408_v55, %v1338_v61  ;;  %v2572_v57 = vmul.f32 -1.442695, %v3859_v1  ;;  %v4907_v5 = vld [vmem:[#allocation24_spill] sm:$0xff] }
 0x161   : > { %4893 = vst [vmem:[#allocation26_spill] sm:$0xff] %v3856_v9  ;;  %2294 = vst.msk [vmem:[%s3634_s22 + $0x98] sm:$0xff] %vm972_vm1, %v3856_v9  ;;  %v2573_v58 = vmul.f32 -1.442695, %v3862_v16  ;;  %v3883_v2 = vmul.f32 %v3352_v19, %v4876_v6  ;;  %v3887_v43 = vmul.f32 %v3352_v19, %v4878_v0  ;;  %v1441_v62 = vadd.f32 %v1409_v52, %v1339_v40  ;;  %v4904_v52 = vld [vmem:[#allocation19_spill] sm:$0xff] }
 0x162   : > { %1037 = vst.msk [vmem:[#allocation2 + $0x79] sm:$0xff] %vm972_vm1, %v948_v14  ;;  %1053 = vst.msk [vmem:[#allocation2 + $0x139] sm:$0xff] %vm972_vm1, %v964_v38  ;;  %v951_v42 = vmul.f32 %v2789_v20, %v4898_v31  ;;  %v3893_v44 = vmul.f32 %v3367_v35, %v4888_v10  ;;  %v3897_v36 = vmul.f32 %v3384_v49, %v4890_v46  ;;  %2794 = vpow2.f32 %v2572_v57  ;;  %v3949_v31 = vld [vmem:[%s4788_s2] ss:$0 sm:$0xff] }
 0x163   : > { %4896 = vst [vmem:[#allocation10_spill] sm:$0xff] %v3883_v2  ;;  %4897 = vst [vmem:[#allocation14_spill] sm:$0xff] %v3887_v43  ;;  %v1509_v6 = vmul.f32 %v3303_v56, %v3746_v25  ;;  %v1323_v0 = vmul.f32 %v3263_v24, %v4882_v47  ;;  %v1254_v18 = vadd.f32 %v1222_v30, %v1121_v51  ;;  %2796 = vpow2.f32 %v2573_v58 }
 0x164   : > { %4899 = vst [vmem:[#allocation6_spill] sm:$0xff] %v3893_v44  ;;  %4900 = vst [vmem:[#allocation8_spill] sm:$0xff] %v3897_v36  ;;  %v2791_v61 = vpop.eup %2790  ;;  %v1510_v53 = vmul.f32 %v3303_v56, %v3744_v11  ;;  %v1354_v27 = vadd.f32 %v1322_v23, %v1253_v60  ;;  %v1424_v59 = vmul.f32 %v3286_v63, %v3788_v50 }
 0x165   : > { %1040 = vst.msk [vmem:[#allocation2 + $0x99] sm:$0xff] %vm972_vm1, %v951_v42  ;;  %v2793_v10 = vpop.eup %2792  ;;  %v1541_v55 = vadd.f32 %v1509_v6, %v1440_v39  ;;  %v2151_v41 = vadd.f32 1.0, %v2791_v61  ;;  %v3910_v46 = vmul.f32 %v3367_v35, %v4901_v21  ;;  %v3914_v24 = vmul.f32 %v3384_v49, %v3545_v48  ;;  %v4910_v42 = vld [vmem:[#allocation3_spill] sm:$0xff]  ;;  %v4911_v61 = vld [vmem:[#allocation4_spill] sm:$0xff] }
 0x166   : > { %v1542_v47 = vadd.f32 %v1510_v53, %v1441_v62  ;;  %v2152_v40 = vadd.f32 1.0, %v2793_v10  ;;  %v3918_v20 = vmul.f32 %v3352_v19, %v4904_v52  ;;  %v3922_v3 = vmul.f32 %v3352_v19, %v3505_v22  ;;  %v4912_v53 = vld [vmem:[#allocation5_spill] sm:$0xff]  ;;  %v4915_v21 = vld [vmem:[#allocation27_spill] sm:$0xff] }
 0x167   : > { %4902 = vst [vmem:[#allocation11_spill] sm:$0xff] %v3910_v46  ;;  %4903 = vst [vmem:[#allocation21_spill] sm:$0xff] %v3914_v24  ;;  %v1610_v14 = vmul.f32 %v3322_v45, %v3762_v7  ;;  %2798 = vrcp.f32 %v2151_v41  ;;  %v1611_v30 = vmul.f32 %v3322_v45, %v3760_v15  ;;  %v1355_v48 = vadd.f32 %v1323_v0, %v1254_v18  ;;  %v3955_v18 = vld [vmem:[#allocation2 + $0x81] sm:$0xff]  ;;  %v4914_v41 = vld [vmem:[#allocation16_spill] sm:$0xff] }
 0x168   : > { %4905 = vst [vmem:[#allocation19_spill] sm:$0xff] %v3918_v20  ;;  %4906 = vst [vmem:[#allocation38_spill] sm:$0xff] %v3922_v3  ;;  %2800 = vrcp.f32 %v2152_v40  ;;  %v1425_v51 = vmul.f32 %v3286_v63, %v3790_v32  ;;  %v3934_v38 = vmul.f32 %v3367_v35, %v4907_v5  ;;  %v1456_v60 = vadd.f32 %v1424_v59, %v1354_v27  ;;  %v4913_v27 = vld [vmem:[#allocation7_spill] sm:$0xff]  ;;  %v4916_v40 = vld [vmem:[#allocation28_spill] sm:$0xff] }
 0x169   : > { %v3930_v23 = vld [vmem:[#allocation2 + $0x78] sm:$0xff]  ;;  %v1642_v22 = vadd.f32 %v1610_v14, %v1541_v55  ;;  %v1525_v39 = vmul.f32 %v3303_v56, %v3796_v26  ;;  %v3938_v57 = vld [vmem:[#allocation2 + $0x80] sm:$0xff]  ;;  %v3942_v58 = vmul.f32 %v3384_v49, %v3567_v17  ;;  %v1643_v63 = vadd.f32 %v1611_v30, %v1542_v47 }
 0x16a   : > { %4908 = vst [vmem:[#allocation24_spill] sm:$0xff] %v3934_v38  ;;  %v3944_v62 = vld [vmem:[#allocation2 + $0x79] sm:$0xff]  ;;  %v706_v6 = vmul.f32 %v3949_v31, %v4910_v42  ;;  %v689_v0 = vmul.f32 %v3949_v31, %v4911_v61  ;;  %v1713_v17 = vmul.f32 %v3352_v19, %v3930_v23  ;;  %v705_v10 = vmul.f32 %v3949_v31, %v4912_v53 }
 0x16b   : > { %4909 = vst [vmem:[#allocation39_spill] sm:$0xff] %v3942_v58  ;;  %v692_v55 = vmul.f32 %v3949_v31, %v4913_v27  ;;  %v708_v59 = vmul.f32 %v3949_v31, %v4914_v41  ;;  %v1526_v47 = vmul.f32 %v3303_v56, %v4915_v21  ;;  %v1627_v52 = vmul.f32 %v3322_v45, %v4916_v40  ;;  %v3969_v30 = vld [vmem:[#allocation2 + $0x7a] sm:$0xff]  ;;  %v3975_v27 = vld [vmem:[#allocation2 + $0x82] sm:$0xff] }
 0x16c   : > { %v1457_v14 = vadd.f32 %v1425_v51, %v1355_v48  ;;  %v1714_v5 = vmul.f32 %v3352_v19, %v3938_v57  ;;  %v2795_v42 = vpop.eup %2794  ;;  %v1557_v61 = vadd.f32 %v1525_v39, %v1456_v60  ;;  %v1626_v53 = vmul.f32 %v3322_v45, %v3810_v37  ;;  %v4917_v24 = vld [vmem:[#allocation32_spill] sm:$0xff]  ;;  %v4918_v45 = vld [vmem:[#allocation33_spill] sm:$0xff] }
 0x16d   : > { %v1745_v41 = vadd.f32 %v1713_v17, %v1642_v22  ;;  %v1814_v56 = vmul.f32 %v3367_v35, %v3944_v62  ;;  %v2797_v9 = vpop.eup %2796  ;;  %v2167_v12 = vadd.f32 1.0, %v2795_v42  ;;  %v1815_v48 = vmul.f32 %v3367_v35, %v3955_v18 }
 0x16e   : > { %v1746_v51 = vadd.f32 %v1714_v5, %v1643_v63  ;;  %2802 = vpow2.f32 %v4917_v24  ;;  %v2168_v19 = vadd.f32 1.0, %v2797_v9  ;;  %v1915_v60 = vmul.f32 %v3384_v49, %v3969_v30  ;;  %v3990_v9 = vld [vmem:[%s4789_s3] ss:$0 sm:$0xff]  ;;  %v4919_v5 = vld [vmem:[#allocation34_spill] sm:$0xff] }
 0x16f   : > { %v1846_v58 = vadd.f32 %v1814_v56, %v1745_v41  ;;  %2804 = vpow2.f32 %v4918_v45  ;;  %v1558_v39 = vadd.f32 %v1526_v47, %v1457_v14  ;;  %v1916_v22 = vmul.f32 %v3384_v49, %v3975_v27  ;;  %v4920_v41 = vld [vmem:[#allocation17_spill] sm:$0xff] }
 0x170   : > { %2806 = vrcp.f32 %v2167_v12  ;;  %v1847_v17 = vadd.f32 %v1815_v48, %v1746_v51  ;;  %v3993_v24 = vadd.f32 %v3990_v9, %v706_v6  ;;  %v3996_v63 = vadd.f32 %v3990_v9, %v689_v0 }
 0x171   : > { %v2799_v42 = vpop.eup %2798  ;;  %2808 = vrcp.f32 %v2168_v19  ;;  %v1947_v46 = vadd.f32 %v1915_v60, %v1846_v58  ;;  %v691_v58 = vmul.f32 %v3949_v31, %v4920_v41  ;;  %v4005_v6 = vadd.f32 %v3990_v9, %v705_v10  ;;  %v4013_v19 = vld [vmem:[#allocation2 + $0x141] sm:$0xff] }
 0x172   : > { %v2801_v12 = vpop.eup %2800  ;;  %v2247_v47 = vmul.f32 %v2799_v42, %v3805_v33  ;;  %v1948_v14 = vadd.f32 %v1916_v22, %v1847_v17  ;;  %2810 = vpow2.f32 %v4919_v5  ;;  %v4008_v0 = vadd.f32 %v3990_v9, %v692_v55  ;;  %v4024_v55 = vld [vmem:[#allocation2 + $0x138] sm:$0xff]  ;;  %v4026_v22 = vld [vmem:[#allocation2 + $0x140] sm:$0xff]  ;;  %v4058_v5 = vld [vmem:[%s4790_s4 + $0x9] ss:$0 sm:$0xff] }
 0x173   : > { %v2248_v56 = vmul.f32 %v2801_v12, %v3808_v28  ;;  %v1986_v48 = vmul.f32 %v3427_v29, %v1947_v46  ;;  %v1658_v51 = vadd.f32 %v1626_v53, %v1557_v61  ;;  %v1659_v45 = vadd.f32 %v1627_v52, %v1558_v39  ;;  %v4031_v53 = vld [vmem:[#allocation2 + $0x142] sm:$0xff]  ;;  %v4037_v39 = vld [vmem:[#allocation2 + $0x139] sm:$0xff] }
 0x174   : > { %2279 = vst.msk [vmem:[%s3634_s22 + $0x20] sm:$0xff] %vm972_vm1, %v2247_v47  ;;  %v2314_v33 = vsel %vm972_vm1, %v2247_v47, 0.0  ;;  %v1987_v60 = vmul.f32 %v3427_v29, %v1948_v14  ;;  %v1831_v46 = vmul.f32 %v3367_v35, %v4013_v19  ;;  %v4029_v61 = vadd.f32 %v3990_v9, %v708_v59  ;;  %v4042_v35 = vld [vmem:[%s4790_s4 + $0x8] ss:$0 sm:$0xff]  ;;  %v4053_v14 = vld [vmem:[#allocation2 + $0x13a] sm:$0xff] }
 0x175   : > { %2280 = vst.msk [vmem:[%s3634_s22 + $0x28] sm:$0xff] %vm972_vm1, %v2248_v56  ;;  %v2315_v28 = vadd.f32 %v2314_v33, %v3838_v13  ;;  %v4022_v10 = vadd.f32 %v3440_v4, %v1986_v48  ;;  %v2316_v13 = vsel %vm972_vm1, %v2248_v56, 0.0  ;;  %v1729_v17 = vmul.f32 %v4042_v35, %v4024_v55 }
 0x176   : > { %v4034_v52 = vadd.f32 %v3440_v4, %v1987_v60  ;;  %v1730_v59 = vmul.f32 %v4042_v35, %v4026_v22  ;;  %v1932_v42 = vmul.f32 %v3384_v49, %v4031_v53  ;;  %v1830_v41 = vmul.f32 %v4058_v5, %v4037_v39 }
 0x177   : > { %v2558_v12 = vmul.f32 -1.442695, %v4022_v10  ;;  %v4051_v47 = vadd.f32 %v2316_v13, %v2315_v28  ;;  %v1761_v33 = vadd.f32 %v1729_v17, %v1658_v51  ;;  %v1931_v38 = vmul.f32 %v3384_v49, %v4053_v14 }
 0x178   : > { %v2803_v56 = vpop.eup %2802  ;;  %v2559_v48 = vmul.f32 -1.442695, %v4034_v52  ;;  %v1762_v60 = vadd.f32 %v1730_v59, %v1659_v45  ;;  %v2532_v13 = vmul.f32 -1.442695, %v3993_v24  ;;  %v2515_v36 = vmul.f32 -1.442695, %v3996_v63 }
 0x179   : > { %v2805_v28 = vpop.eup %2804  ;;  %2812 = vpow2.f32 %v2558_v12  ;;  %v4068_v3 = vadd.f32 %v3990_v9, %v691_v58  ;;  %v1862_v44 = vadd.f32 %v1830_v41, %v1761_v33  ;;  %v2531_v51 = vmul.f32 -1.442695, %v4005_v6  ;;  %v4923_v12 = vld [vmem:[#allocation23_spill] sm:$0xff] }
 0x17a   : > { %v2807_v20 = vpop.eup %2806  ;;  %2814 = vpow2.f32 %v2559_v48  ;;  %v1863_v34 = vadd.f32 %v1831_v46, %v1762_v60  ;;  %v871_v49 = vadd.f32 1.0, %v2803_v56  ;;  %v4075_v59 = vmul.f32 -1.442695, %v4008_v0  ;;  %v4092_v56 = vld [vmem:[%s4790_s4 + $0x1] ss:$0 sm:$0xff]  ;;  %v4925_v60 = vld [vmem:[#allocation35_spill] sm:$0xff] }
 0x17b   : > { %4921 = vst [vmem:[#allocation3_spill] sm:$0xff] %v4068_v3  ;;  %v2809_v45 = vpop.eup %2808  ;;  %v4072_v17 = vmul.f32 %v2807_v20, %v3859_v1  ;;  %v707_v58 = vmul.f32 %v3949_v31, %v4923_v12  ;;  %v1963_v46 = vadd.f32 %v1931_v38, %v1862_v44  ;;  %v854_v33 = vadd.f32 1.0, %v2805_v28  ;;  %v4085_v1 = vld [vmem:[%s4790_s4] ss:$0 sm:$0xff] }
 0x17c   : > { %v2811_v43 = vpop.eup %2810  ;;  %v4080_v48 = vmul.f32 %v2809_v45, %v3862_v16  ;;  %v1964_v41 = vadd.f32 %v1932_v42, %v1863_v34  ;;  %v1106_v20 = vmul.f32 %v4085_v1, %v3736_v8  ;;  %v1207_v16 = vmul.f32 %v4092_v56, %v3746_v25 }
 0x17d   : > { %4922 = vst [vmem:[#allocation4_spill] sm:$0xff] %v4072_v17  ;;  %2295 = vst.msk [vmem:[%s3634_s22 + $0xa0] sm:$0xff] %vm972_vm1, %v4072_v17  ;;  %2816 = vrcp.f32 %v871_v49  ;;  %v4100_v34 = vmul.f32 -1.442695, %v4029_v61  ;;  %v1208_v44 = vmul.f32 %v4092_v56, %v3744_v11  ;;  %v2002_v8 = vmul.f32 %v3427_v29, %v1963_v46 }
 0x17e   : > { %4924 = vst [vmem:[#allocation5_spill] sm:$0xff] %v4080_v48  ;;  %2296 = vst.msk [vmem:[%s3634_s22 + $0xa8] sm:$0xff] %vm972_vm1, %v4080_v48  ;;  %v2003_v38 = vmul.f32 %v3427_v29, %v1964_v41  ;;  %2818 = vrcp.f32 %v854_v33  ;;  %v1122_v25 = vmul.f32 %v4085_v1, %v3788_v50  ;;  %v1223_v31 = vmul.f32 %v4092_v56, %v3796_v26 }
 0x17f   : > { %v870_v42 = vadd.f32 1.0, %v2811_v43  ;;  %2820 = vpow2.f32 %v4925_v60  ;;  %v1107_v11 = vmul.f32 %v4085_v1, %v3738_v54  ;;  %v4117_v28 = vadd.f32 %v3440_v4, %v2002_v8  ;;  %v4927_v60 = vld [vmem:[#allocation18_spill] sm:$0xff] }
 0x180   : > { %v4120_v45 = vadd.f32 %v3440_v4, %v2003_v38  ;;  %2822 = vpow2.f32 %v2532_v13  ;;  %v1224_v29 = vmul.f32 %v4092_v56, %v4915_v21  ;;  %v1239_v50 = vadd.f32 %v1207_v16, %v1106_v20  ;;  %v4134_v13 = vld [vmem:[%s4790_s4 + $0x2] ss:$0 sm:$0xff] }
 0x181   : > { %2824 = vrcp.f32 %v870_v42  ;;  %v4125_v26 = vadd.f32 %v3990_v9, %v707_v58  ;;  %v1123_v43 = vmul.f32 %v4085_v1, %v3790_v32  ;;  %v2574_v54 = vmul.f32 -1.442695, %v4117_v28 }
 0x182   : > { %v2575_v49 = vmul.f32 -1.442695, %v4120_v45  ;;  %2826 = vpow2.f32 %v2515_v36  ;;  %v1255_v4 = vadd.f32 %v1223_v31, %v1122_v25  ;;  %v1324_v21 = vmul.f32 %v4134_v13, %v3810_v37 }
 0x183   : > { %4926 = vst [vmem:[#allocation7_spill] sm:$0xff] %v4125_v26  ;;  %v2813_v12 = vpop.eup %2812  ;;  %2828 = vpow2.f32 %v2531_v51  ;;  %v4139_v9 = vmul.f32 -1.442695, %v4068_v3  ;;  %v1240_v58 = vadd.f32 %v1208_v44, %v1107_v11  ;;  %v1308_v46 = vmul.f32 %v4134_v13, %v3762_v7 }
 0x184   : > { %v2815_v32 = vpop.eup %2814  ;;  %v2153_v36 = vadd.f32 1.0, %v2813_v12  ;;  %2830 = vpow2.f32 %v2574_v54  ;;  %v1309_v41 = vmul.f32 %v4134_v13, %v3760_v15  ;;  %v4146_v20 = vmul.f32 -1.442695, %v4125_v26  ;;  %v4157_v15 = vld [vmem:[%s4790_s4 + $0x4] ss:$0 sm:$0xff] }
 0x185   : > { %v2154_v33 = vadd.f32 1.0, %v2815_v32  ;;  %2832 = vpow2.f32 %v2575_v49  ;;  %v1325_v37 = vmul.f32 %v4134_v13, %v4916_v40  ;;  %v1340_v51 = vadd.f32 %v1308_v46, %v1239_v50  ;;  %v4171_v50 = vld [vmem:[%s4790_s4 + $0x5] ss:$0 sm:$0xff]  ;;  %v4178_v54 = vld [vmem:[%s4790_s4 + $0x6] ss:$0 sm:$0xff]  ;;  %v1699_v32 = vld [vmem:[#allocation2 + $0x198] sm:$0xff] }
 0x186   : > { %v1256_v16 = vadd.f32 %v1224_v29, %v1123_v43  ;;  %2834 = vrcp.f32 %v2153_v36  ;;  %v1356_v8 = vadd.f32 %v1324_v21, %v1255_v4  ;;  %v4152_v7 = vmul.f32 %v4092_v56, %v3955_v18  ;;  %v4928_v4 = vld [vmem:[#allocation20_spill] sm:$0xff] }
 0x187   : > { %v2817_v44 = vpop.eup %2816  ;;  %v1410_v38 = vmul.f32 %v4157_v15, %v3930_v23  ;;  %2836 = vrcp.f32 %v2154_v33  ;;  %v4163_v40 = vmul.f32 %v4134_v13, %v3975_v27  ;;  %v1341_v31 = vadd.f32 %v1309_v41, %v1240_v58  ;;  %v1700_v58 = vld [vmem:[#allocation2 + $0x1a0] sm:$0xff] }
 0x188   : > { %v2819_v25 = vpop.eup %2818  ;;  %v1411_v42 = vmul.f32 %v4157_v15, %v3938_v57  ;;  %v967_v11 = vmul.f32 %v2817_v44, %v4927_v60  ;;  %v1512_v43 = vmul.f32 %v4171_v50, %v3955_v18  ;;  %v4182_v49 = vmul.f32 %v4178_v54, %v3975_v27 }
 0x189   : > { %v2821_v29 = vpop.eup %2820  ;;  %v4186_v12 = vmul.f32 %v4092_v56, %v4013_v19  ;;  %v950_v21 = vmul.f32 %v2819_v25, %v4928_v4  ;;  %v4191_v18 = vmul.f32 %v4134_v13, %v4031_v53  ;;  %v4195_v36 = vmul.f32 %v4171_v50, %v4013_v19 }
 0x18a   : > { %v2823_v46 = vpop.eup %2822  ;;  %v1108_v27 = vmul.f32 %v4085_v1, %v3930_v23  ;;  %v1209_v41 = vmul.f32 %v4092_v56, %v3944_v62  ;;  %1056 = vst.msk [vmem:[#allocation2 + $0x159] sm:$0xff] %vm972_vm1, %v967_v11  ;;  %v4204_v44 = vmul.f32 %v4178_v54, %v4031_v53  ;;  %v1442_v25 = vadd.f32 %v1410_v38, %v1340_v51  ;;  %v4929_v23 = vld [vmem:[#allocation22_spill] sm:$0xff] }
 0x18b   : > { %v2825_v33 = vpop.eup %2824  ;;  %v1357_v60 = vadd.f32 %v1325_v37, %v1256_v16  ;;  %v1426_v4 = vmul.f32 %v4157_v15, %v4024_v55  ;;  %1039 = vst.msk [vmem:[#allocation2 + $0x91] sm:$0xff] %vm972_vm1, %v950_v21  ;;  %v1443_v48 = vadd.f32 %v1411_v42, %v1341_v31  ;;  %v4211_v2 = vmul.f32 %v4042_v35, %v1699_v32 }
 0x18c   : > { %v2827_v19 = vpop.eup %2826  ;;  %v966_v17 = vmul.f32 %v2825_v33, %v4929_v23  ;;  %v4214_v11 = vmul.f32 %v4042_v35, %v1700_v58  ;;  %v1109_v53 = vmul.f32 %v4085_v1, %v3938_v57  ;;  %v1511_v37 = vmul.f32 %v4171_v50, %v3944_v62 }
 0x18d   : > { %4930 = vst [vmem:[#allocation16_spill] sm:$0xff] %v4211_v2  ;;  %v2829_v26 = vpop.eup %2828  ;;  %v1124_v51 = vmul.f32 %v4085_v1, %v4024_v55  ;;  %v1225_v16 = vmul.f32 %v4092_v56, %v4037_v39  ;;  %v1241_v31 = vadd.f32 %v1209_v41, %v1108_v27  ;;  %v1310_v42 = vmul.f32 %v4134_v13, %v3969_v30 }
 0x18e   : > { %4931 = vst [vmem:[#allocation27_spill] sm:$0xff] %v4214_v11  ;;  %v2831_v38 = vpop.eup %2830  ;;  %v1612_v21 = vmul.f32 %v4178_v54, %v3969_v30  ;;  %v1427_v57 = vmul.f32 %v4157_v15, %v4026_v22  ;;  %1055 = vst.msk [vmem:[#allocation2 + $0x151] sm:$0xff] %vm972_vm1, %v966_v17  ;;  %v1543_v32 = vadd.f32 %v1511_v37, %v1442_v25  ;;  %v873_v37 = vadd.f32 1.0, %v2823_v46 }
 0x18f   : > { %v2833_v62 = vpop.eup %2832  ;;  %v1458_v58 = vadd.f32 %v1426_v4, %v1356_v8  ;;  %v1527_v55 = vmul.f32 %v4171_v50, %v4037_v39  ;;  %v2169_v33 = vadd.f32 1.0, %v2831_v38  ;;  %v1544_v41 = vadd.f32 %v1512_v43, %v1443_v48 }
 0x190   : > { %v2835_v27 = vpop.eup %2834  ;;  %v1125_v23 = vmul.f32 %v4085_v1, %v4026_v22  ;;  %v1326_v30 = vmul.f32 %v4134_v13, %v4053_v14  ;;  %v2170_v2 = vadd.f32 1.0, %v2833_v62  ;;  %v1257_v25 = vadd.f32 %v1225_v16, %v1124_v51 }
 0x191   : > { %v2837_v11 = vpop.eup %2836  ;;  %v2249_v17 = vmul.f32 %v2835_v27, %v4022_v10  ;;  %2838 = vrcp.f32 %v2169_v33  ;;  %v857_v8 = vadd.f32 1.0, %v2821_v29  ;;  %v1459_v4 = vadd.f32 %v1427_v57, %v1357_v60  ;;  %v1276_v57 = vld [vmem:[#allocation2 + $0x9a] sm:$0xff] }
 0x192   : > { %v2250_v39 = vmul.f32 %v2837_v11, %v4034_v52  ;;  %2840 = vrcp.f32 %v2170_v2  ;;  %v1559_v48 = vadd.f32 %v1527_v55, %v1458_v58  ;;  %v1628_v43 = vmul.f32 %v4178_v54, %v4053_v14  ;;  %v4244_v38 = vld [vmem:[#allocation2 + $0x90] sm:$0xff]  ;;  %v1175_v2 = vld [vmem:[#allocation2 + $0x99] sm:$0xff] }
 0x193   : > { %2281 = vst.msk [vmem:[%s3634_s22 + $0x30] sm:$0xff] %vm972_vm1, %v2249_v17  ;;  %v2318_v22 = vsel %vm972_vm1, %v2249_v17, 0.0  ;;  %v856_v10 = vadd.f32 1.0, %v2827_v19  ;;  %v1242_v51 = vadd.f32 %v4152_v7, %v1109_v53  ;;  %v1644_v16 = vadd.f32 %v1612_v21, %v1543_v32  ;;  %v4250_v29 = vld [vmem:[#allocation2 + $0x98] sm:$0xff] }
 0x194   : > { %2282 = vst.msk [vmem:[%s3634_s22 + $0x38] sm:$0xff] %vm972_vm1, %v2250_v39  ;;  %v2319_v52 = vadd.f32 %v2318_v22, %v4051_v47  ;;  %v872_v46 = vadd.f32 1.0, %v2829_v26  ;;  %v4252_v60 = vadd.f32 %v1310_v42, %v1241_v31  ;;  %v1258_v11 = vadd.f32 %v4186_v12, %v1125_v23  ;;  %v4255_v14 = vld [vmem:[#allocation2 + $0x91] sm:$0xff] }
 0x195   : > { %v1645_v19 = vadd.f32 %v4182_v49, %v1544_v41  ;;  %2842 = vrcp.f32 %v857_v8  ;;  %v4258_v7 = vadd.f32 %v1326_v30, %v1257_v25  ;;  %v1560_v53 = vadd.f32 %v4195_v36, %v1459_v4  ;;  %v4268_v12 = vld [vmem:[#allocation2 + $0x92] sm:$0xff]  ;;  %v4288_v41 = vld [vmem:[%s4790_s4 + $0xa] ss:$0 sm:$0xff] }
 0x196   : > { %v1715_v47 = vmul.f32 %v4042_v35, %v4244_v38  ;;  %2844 = vrcp.f32 %v873_v37  ;;  %v4263_v21 = vadd.f32 %v1628_v43, %v1559_v48  ;;  %v4266_v26 = vmul.f32 %v4092_v56, %v1175_v2  ;;  %v1191_v8 = vld [vmem:[#allocation2 + $0x159] sm:$0xff] }
 0x197   : > { %v1716_v31 = vmul.f32 %v4042_v35, %v4250_v29  ;;  %2846 = vrcp.f32 %v856_v10  ;;  %v4273_v49 = vmul.f32 %v4134_v13, %v1276_v57  ;;  %v1816_v36 = vmul.f32 %v4058_v5, %v4255_v14 }
 0x198   : > { %v1747_v42 = vadd.f32 %v1715_v47, %v1644_v16  ;;  %2848 = vrcp.f32 %v872_v46  ;;  %v4278_v62 = vmul.f32 %v4171_v50, %v1175_v2  ;;  %v1817_v32 = vmul.f32 %v4058_v5, %v1175_v2  ;;  %v1089_v46 = vld [vmem:[#allocation2 + $0x150] sm:$0xff]  ;;  %v1090_v47 = vld [vmem:[#allocation2 + $0x158] sm:$0xff] }
 0x199   : > { %v1748_v58 = vadd.f32 %v1716_v31, %v1645_v19  ;;  %v2320_v55 = vsel %vm972_vm1, %v2250_v39, 0.0  ;;  %v4283_v33 = vmul.f32 %v4178_v54, %v1276_v57  ;;  %v1917_v23 = vmul.f32 %v4288_v41, %v4268_v12  ;;  %v1292_v39 = vld [vmem:[#allocation2 + $0x15a] sm:$0xff]  ;;  %v1190_v31 = vld [vmem:[#allocation2 + $0x151] sm:$0xff] }
 0x19a   : > { %v1848_v27 = vadd.f32 %v1816_v36, %v1747_v42  ;;  %v4292_v30 = vadd.f32 %v2320_v55, %v2319_v52  ;;  %v1918_v25 = vmul.f32 %v4288_v41, %v1276_v57  ;;  %v4296_v4 = vadd.f32 %v4163_v40, %v1242_v51  ;;  %v4344_v19 = vld [vmem:[%s4792_s6] ss:$0 sm:$0xff]  ;;  %v4355_v55 = vld [vmem:[#allocation2 + $0x152] sm:$0xff] }
 0x19b   : > { %v2839_v17 = vpop.eup %2838  ;;  %v1849_v37 = vadd.f32 %v1817_v32, %v1748_v58  ;;  %2850 = vpow2.f32 %v4075_v59  ;;  %v4303_v10 = vadd.f32 %v4191_v18, %v1258_v11  ;;  %v1661_v40 = vadd.f32 %v4204_v44, %v1560_v53 }
 0x19c   : > { %v2841_v22 = vpop.eup %2840  ;;  %v4300_v48 = vmul.f32 %v2839_v17, %v4117_v28  ;;  %v1949_v43 = vadd.f32 %v1917_v23, %v1848_v27  ;;  %2852 = vpow2.f32 %v4100_v34  ;;  %v4315_v59 = vmul.f32 %v4092_v56, %v1191_v8  ;;  %v4323_v34 = vld [vmem:[%s4791_s5] ss:$0 sm:$0xff] }
 0x19d   : > { %v4307_v16 = vmul.f32 %v2841_v22, %v4120_v45  ;;  %v1950_v52 = vadd.f32 %v1918_v25, %v1849_v37  ;;  %2854 = vpow2.f32 %v4139_v9  ;;  %v4318_v28 = vmul.f32 %v4134_v13, %v1292_v39 }
 0x19e   : > { %4932 = vst [vmem:[#allocation28_spill] sm:$0xff] %v4300_v48  ;;  %2297 = vst.msk [vmem:[%s3634_s22 + $0xb0] sm:$0xff] %vm972_vm1, %v4300_v48  ;;  %v1988_v45 = vmul.f32 %v4323_v34, %v1949_v43  ;;  %2856 = vpow2.f32 %v4146_v20  ;;  %v4331_v9 = vmul.f32 %v4171_v50, %v1191_v8  ;;  %v4334_v44 = vmul.f32 %v4178_v54, %v1292_v39 }
 0x19f   : > { %4933 = vst [vmem:[#allocation32_spill] sm:$0xff] %v4307_v16  ;;  %v2843_v18 = vpop.eup %2842  ;;  %2298 = vst.msk [vmem:[%s3634_s22 + $0xb8] sm:$0xff] %vm972_vm1, %v4307_v16  ;;  %v1833_v51 = vmul.f32 %v4058_v5, %v1191_v8  ;;  %v1989_v2 = vmul.f32 %v4323_v34, %v1950_v52  ;;  %v1934_v57 = vmul.f32 %v4288_v41, %v1292_v39  ;;  %v4934_v52 = vld [vmem:[#allocation31_spill] sm:$0xff] }
 0x1a0   : > { %v2845_v11 = vpop.eup %2844  ;;  %v1110_v20 = vmul.f32 %v4085_v1, %v4244_v38  ;;  %v4347_v53 = vadd.f32 %v4344_v19, %v1988_v45  ;;  %v1731_v42 = vmul.f32 %v4042_v35, %v1089_v46  ;;  %v1111_v32 = vmul.f32 %v4085_v1, %v4250_v29 }
 0x1a1   : > { %v2847_v36 = vpop.eup %2846  ;;  %v4353_v58 = vadd.f32 %v4344_v19, %v1989_v2  ;;  %v1732_v27 = vmul.f32 %v4042_v35, %v1090_v47  ;;  %v1832_v23 = vmul.f32 %v4058_v5, %v1190_v31  ;;  %v1412_v25 = vmul.f32 %v4157_v15, %v4244_v38 }
 0x1a2   : > { %v2849_v17 = vpop.eup %2848  ;;  %v2560_v8 = vmul.f32 -1.442695, %v4347_v53  ;;  %v1763_v39 = vadd.f32 %v1731_v42, %v4263_v21  ;;  %v1933_v37 = vmul.f32 %v4288_v41, %v4355_v55  ;;  %v953_v45 = vmul.f32 %v2843_v18, %v4934_v52 }
 0x1a3   : > { %v2561_v22 = vmul.f32 -1.442695, %v4353_v58  ;;  %v1764_v43 = vadd.f32 %v1732_v27, %v1661_v40  ;;  %v969_v2 = vmul.f32 %v2845_v11, %v3993_v24  ;;  %v1413_v16 = vmul.f32 %v4157_v15, %v4250_v29 }
 0x1a4   : > { %2858 = vpow2.f32 %v2560_v8  ;;  %v1864_v48 = vadd.f32 %v1832_v23, %v1763_v39  ;;  %v952_v38 = vmul.f32 %v2847_v36, %v3996_v63  ;;  %v1211_v21 = vmul.f32 %v4092_v56, %v4255_v14  ;;  %1042 = vst.msk [vmem:[#allocation2 + $0xb1] sm:$0xff] %vm972_vm1, %v953_v45 }
 0x1a5   : > { %v2851_v3 = vpop.eup %2850  ;;  %2860 = vpow2.f32 %v2561_v22  ;;  %v1865_v42 = vadd.f32 %v1833_v51, %v1764_v43  ;;  %1058 = vst.msk [vmem:[#allocation2 + $0x171] sm:$0xff] %vm972_vm1, %v969_v2  ;;  %v968_v40 = vmul.f32 %v2849_v17, %v4005_v6  ;;  %v4377_v18 = vadd.f32 %v4266_v26, %v1111_v32  ;;  %v1802_v2 = vld [vmem:[#allocation2 + $0x1a1] sm:$0xff] }
 0x1a6   : > { %v2853_v24 = vpop.eup %2852  ;;  %v1312_v29 = vmul.f32 %v4134_v13, %v4268_v12  ;;  %v1428_v63 = vmul.f32 %v4157_v15, %v1089_v46  ;;  %v1965_v11 = vadd.f32 %v1933_v37, %v1864_v48  ;;  %1041 = vst.msk [vmem:[#allocation2 + $0xa9] sm:$0xff] %vm972_vm1, %v952_v38  ;;  %v1444_v51 = vadd.f32 %v1412_v25, %v4252_v60 }
 0x1a7   : > { %v2855_v36 = vpop.eup %2854  ;;  %v1513_v27 = vmul.f32 %v4171_v50, %v4255_v14  ;;  %v1429_v6 = vmul.f32 %v4157_v15, %v1090_v47  ;;  %v1966_v23 = vadd.f32 %v1934_v57, %v1865_v42  ;;  %1057 = vst.msk [vmem:[#allocation2 + $0x169] sm:$0xff] %vm972_vm1, %v968_v40  ;;  %v1445_v32 = vadd.f32 %v1413_v16, %v4296_v4 }
 0x1a8   : > { %v2857_v26 = vpop.eup %2856  ;;  %v1614_v17 = vmul.f32 %v4178_v54, %v4268_v12  ;;  %v2004_v48 = vmul.f32 %v4323_v34, %v1965_v11  ;;  %v859_v8 = vadd.f32 1.0, %v2851_v3  ;;  %v1126_v39 = vmul.f32 %v4085_v1, %v1089_v46 }
 0x1a9   : > { %v1227_v60 = vmul.f32 %v4092_v56, %v1190_v31  ;;  %v2005_v14 = vmul.f32 %v4323_v34, %v1966_v23  ;;  %v875_v25 = vadd.f32 1.0, %v2853_v24  ;;  %v1127_v57 = vmul.f32 %v4085_v1, %v1090_v47 }
 0x1aa   : > { %v1460_v37 = vadd.f32 %v1428_v63, %v4258_v7  ;;  %v1529_v22 = vmul.f32 %v4171_v50, %v1190_v31  ;;  %v4399_v4 = vadd.f32 %v4344_v19, %v2004_v48  ;;  %v1243_v12 = vadd.f32 %v1211_v21, %v1110_v20  ;;  %v1801_v20 = vld [vmem:[#allocation2 + $0x199] sm:$0xff] }
 0x1ab   : > { %v1545_v16 = vadd.f32 %v1513_v27, %v1444_v51  ;;  %v1461_v3 = vadd.f32 %v1429_v6, %v4303_v10  ;;  %v4403_v46 = vadd.f32 %v4344_v19, %v2005_v14  ;;  %v1546_v43 = vadd.f32 %v4278_v62, %v1445_v32 }
 0x1ac   : > { %v2576_v52 = vmul.f32 -1.442695, %v4399_v4  ;;  %2862 = vrcp.f32 %v859_v8  ;;  %v858_v47 = vadd.f32 1.0, %v2855_v36  ;;  %v1259_v45 = vadd.f32 %v1227_v60, %v1126_v39  ;;  %v1177_v36 = vld [vmem:[#allocation2 + $0xb1] sm:$0xff] }
 0x1ad   : > { %v1328_v7 = vmul.f32 %v4134_v13, %v4355_v55  ;;  %v2577_v31 = vmul.f32 -1.442695, %v4403_v46  ;;  %2864 = vrcp.f32 %v875_v25  ;;  %v1260_v10 = vadd.f32 %v4315_v59, %v1127_v57  ;;  %v1075_v23 = vld [vmem:[#allocation2 + $0xa8] sm:$0xff]  ;;  %v1076_v32 = vld [vmem:[#allocation2 + $0xb0] sm:$0xff] }
 0x1ae   : > { %v2859_v38 = vpop.eup %2858  ;;  %v1561_v21 = vadd.f32 %v1529_v22, %v1460_v37  ;;  %v1630_v62 = vmul.f32 %v4178_v54, %v4355_v55  ;;  %2866 = vpow2.f32 %v2576_v52  ;;  %v1562_v24 = vadd.f32 %v4331_v9, %v1461_v3  ;;  %v1193_v48 = vld [vmem:[#allocation2 + $0x171] sm:$0xff] }
 0x1af   : > { %v2861_v42 = vpop.eup %2860  ;;  %v2155_v40 = vadd.f32 1.0, %v2859_v38  ;;  %2868 = vpow2.f32 %v2577_v31  ;;  %v874_v63 = vadd.f32 1.0, %v2857_v26  ;;  %v4415_v51 = vmul.f32 %v4058_v5, %v1801_v20  ;;  %v4424_v26 = vld [vmem:[#allocation2 + $0xb2] sm:$0xff] }
 0x1b0   : > { %v2156_v11 = vadd.f32 1.0, %v2861_v42  ;;  %2870 = vrcp.f32 %v858_v47  ;;  %v4418_v27 = vmul.f32 %v4058_v5, %v1802_v2  ;;  %v1344_v59 = vadd.f32 %v1312_v29, %v1243_v12  ;;  %v1294_v8 = vld [vmem:[#allocation2 + $0x172] sm:$0xff]  ;;  %v4453_v12 = vld [vmem:[#allocation2 + $0xaa] sm:$0xff] }
 0x1b1   : > { %4935 = vst [vmem:[#allocation33_spill] sm:$0xff] %v4415_v51  ;;  %v1646_v6 = vadd.f32 %v1614_v17, %v1545_v16  ;;  %2872 = vrcp.f32 %v2155_v40  ;;  %v4420_v55 = vadd.f32 %v1328_v7, %v1259_v45  ;;  %v4422_v9 = vadd.f32 %v1630_v62, %v1561_v21  ;;  %v1176_v17 = vld [vmem:[#allocation2 + $0xa9] sm:$0xff] }
 0x1b2   : > { %4936 = vst [vmem:[#allocation34_spill] sm:$0xff] %v4418_v27  ;;  %2874 = vrcp.f32 %v2156_v11  ;;  %v1345_v39 = vadd.f32 %v4273_v49, %v4377_v18  ;;  %v1647_v60 = vadd.f32 %v4283_v33, %v1546_v43  ;;  %v1214_v29 = vmul.f32 %v4092_v56, %v1177_v36  ;;  %v4938_v51 = vld [vmem:[#allocation3_spill] sm:$0xff] }
 0x1b3   : > { %v4431_v14 = vadd.f32 %v4318_v28, %v1260_v10  ;;  %v4434_v25 = vadd.f32 %v4334_v44, %v1562_v24  ;;  %2876 = vrcp.f32 %v874_v63  ;;  %v4437_v57 = vmul.f32 %v4171_v50, %v1177_v36 }
 0x1b4   : > { %v1819_v37 = vmul.f32 %v4058_v5, %v1177_v36  ;;  %v1717_v22 = vmul.f32 %v4042_v35, %v1075_v23  ;;  %v1718_v49 = vmul.f32 %v4042_v35, %v1076_v32  ;;  %v1920_v33 = vmul.f32 %v4288_v41, %v4424_v26 }
 0x1b5   : > { %v4445_v18 = vmul.f32 %v4092_v56, %v1193_v48  ;;  %v4448_v28 = vmul.f32 %v4134_v13, %v1294_v8  ;;  %v4451_v44 = vmul.f32 %v4171_v50, %v1193_v48  ;;  %v1113_v3 = vmul.f32 %v4085_v1, %v1076_v32 }
 0x1b6   : > { %v2863_v16 = vpop.eup %2862  ;;  %v1749_v43 = vadd.f32 %v1717_v22, %v1646_v6  ;;  %v1750_v52 = vadd.f32 %v1718_v49, %v1647_v60  ;;  %v1818_v47 = vmul.f32 %v4058_v5, %v1176_v17  ;;  %v4458_v7 = vmul.f32 %v4178_v54, %v1294_v8  ;;  %v1192_v22 = vld [vmem:[#allocation2 + $0x169] sm:$0xff] }
 0x1b7   : > { %v2865_v45 = vpop.eup %2864  ;;  %v1835_v31 = vmul.f32 %v4058_v5, %v1193_v48  ;;  %v1414_v20 = vmul.f32 %v4157_v15, %v1075_v23  ;;  %v1415_v2 = vmul.f32 %v4157_v15, %v1076_v32  ;;  %v4464_v10 = vmul.f32 %v4288_v41, %v1294_v8 }
 0x1b8   : > { %v2867_v38 = vpop.eup %2866  ;;  %v1850_v21 = vadd.f32 %v1818_v47, %v1749_v43  ;;  %v1851_v62 = vadd.f32 %v1819_v37, %v1750_v52  ;;  %v1919_v42 = vmul.f32 %v4288_v41, %v4453_v12  ;;  %v1112_v63 = vmul.f32 %v4085_v1, %v1075_v23  ;;  %v1091_v37 = vld [vmem:[#allocation2 + $0x168] sm:$0xff] }
 0x1b9   : > { %v2869_v40 = vpop.eup %2868  ;;  %v2171_v24 = vadd.f32 1.0, %v2867_v38  ;;  %v1213_v11 = vmul.f32 %v4092_v56, %v1176_v17  ;;  %v4472_v36 = vmul.f32 %v4134_v13, %v4453_v12  ;;  %v4474_v48 = vadd.f32 %v1214_v29, %v1113_v3  ;;  %v1092_v3 = vld [vmem:[#allocation2 + $0x170] sm:$0xff] }
 0x1ba   : > { %v2871_v6 = vpop.eup %2870  ;;  %v2172_v32 = vadd.f32 1.0, %v2869_v40  ;;  %v1951_v8 = vadd.f32 %v1919_v42, %v1850_v21  ;;  %v1952_v60 = vadd.f32 %v1920_v33, %v1851_v62  ;;  %v1446_v43 = vadd.f32 %v1414_v20, %v1344_v59 }
 0x1bb   : > { %v2873_v49 = vpop.eup %2872  ;;  %2878 = vrcp.f32 %v2171_v24  ;;  %v1447_v52 = vadd.f32 %v1415_v2, %v1345_v39  ;;  %v1515_v23 = vmul.f32 %v4171_v50, %v1176_v17  ;;  %v1128_v62 = vmul.f32 %v4085_v1, %v1091_v37 }
 0x1bc   : > { %v2875_v47 = vpop.eup %2874  ;;  %v2251_v38 = vmul.f32 %v2873_v49, %v4347_v53  ;;  %2880 = vrcp.f32 %v2172_v32  ;;  %v1990_v40 = vmul.f32 %v4323_v34, %v1951_v8  ;;  %v1991_v29 = vmul.f32 %v4323_v34, %v1952_v60  ;;  %v1293_v49 = vld [vmem:[#allocation2 + $0x16a] sm:$0xff] }
 0x1bd   : > { %v2877_v33 = vpop.eup %2876  ;;  %v2252_v21 = vmul.f32 %v2875_v47, %v4353_v58  ;;  %v1229_v59 = vmul.f32 %v4092_v56, %v1192_v22  ;;  %v1430_v39 = vmul.f32 %v4157_v15, %v1091_v37  ;;  %v1733_v2 = vmul.f32 %v4042_v35, %v1091_v37 }
 0x1be   : > { %2283 = vst.msk [vmem:[%s3634_s22 + $0x40] sm:$0xff] %vm972_vm1, %v2251_v38  ;;  %v2322_v17 = vsel %vm972_vm1, %v2251_v38, 0.0  ;;  %v4488_v53 = vadd.f32 %v4344_v19, %v1990_v40  ;;  %v4491_v20 = vadd.f32 %v4344_v19, %v1991_v29  ;;  %v1431_v24 = vmul.f32 %v4157_v15, %v1092_v3 }
 0x1bf   : > { %2284 = vst.msk [vmem:[%s3634_s22 + $0x48] sm:$0xff] %vm972_vm1, %v2252_v21  ;;  %v2323_v58 = vadd.f32 %v2322_v17, %v4292_v30  ;;  %v2324_v42 = vsel %vm972_vm1, %v2252_v21, 0.0  ;;  %v1734_v32 = vmul.f32 %v4042_v35, %v1092_v3  ;;  %v1765_v47 = vadd.f32 %v1733_v2, %v4422_v9 }
 0x1c0   : > { %4937 = vst [vmem:[#allocation17_spill] sm:$0xff] %v4491_v20  ;;  %v2562_v8 = vmul.f32 -1.442695, %v4488_v53  ;;  %v2563_v60 = vmul.f32 -1.442695, %v4491_v20  ;;  %v1834_v38 = vmul.f32 %v4058_v5, %v1192_v22  ;;  %v1935_v30 = vmul.f32 %v4288_v41, %v1293_v49 }
 0x1c1   : > { %v4504_v37 = vadd.f32 %v2324_v42, %v2323_v58  ;;  %v1766_v40 = vadd.f32 %v1734_v32, %v4434_v25  ;;  %v955_v29 = vmul.f32 %v2863_v16, %v4008_v0  ;;  %v971_v17 = vmul.f32 %v2865_v45, %v4029_v61  ;;  %v4939_v0 = vld [vmem:[#allocation7_spill] sm:$0xff] }
 0x1c2   : > { %2882 = vpow2.f32 %v2562_v8  ;;  %v1866_v21 = vadd.f32 %v1834_v38, %v1765_v47  ;;  %v954_v27 = vmul.f32 %v2871_v6, %v4938_v51  ;;  %v1462_v20 = vadd.f32 %v1430_v39, %v4420_v55 }
 0x1c3   : > { %2884 = vpow2.f32 %v2563_v60  ;;  %v1531_v9 = vmul.f32 %v4171_v50, %v1192_v22  ;;  %v1867_v2 = vadd.f32 %v1835_v31, %v1766_v40  ;;  %1044 = vst.msk [vmem:[#allocation2 + $0xc9] sm:$0xff] %vm972_vm1, %v955_v29  ;;  %v1129_v25 = vmul.f32 %v4085_v1, %v1092_v3  ;;  %1060 = vst.msk [vmem:[#allocation2 + $0x189] sm:$0xff] %vm972_vm1, %v971_v17 }
 0x1c4   : > { %v1463_v58 = vadd.f32 %v1431_v24, %v4431_v14  ;;  %v1967_v42 = vadd.f32 %v1935_v30, %v1866_v21  ;;  %1043 = vst.msk [vmem:[#allocation2 + $0xc1] sm:$0xff] %vm972_vm1, %v954_v27  ;;  %v970_v61 = vmul.f32 %v2877_v33, %v4939_v0  ;;  %v1245_v16 = vadd.f32 %v1213_v11, %v1112_v63  ;;  %v1903_v33 = vld [vmem:[#allocation2 + $0x1a2] sm:$0xff] }
 0x1c5   : > { %v2879_v51 = vpop.eup %2878  ;;  %v1547_v55 = vadd.f32 %v1515_v23, %v1446_v43  ;;  %v1548_v45 = vadd.f32 %v4437_v57, %v1447_v52  ;;  %v1968_v31 = vadd.f32 %v4464_v10, %v1867_v2  ;;  %v1261_v14 = vadd.f32 %v1229_v59, %v1128_v62 }
 0x1c6   : > { %v2881_v6 = vpop.eup %2880  ;;  %v4522_v22 = vmul.f32 %v2879_v51, %v4399_v4  ;;  %v1330_v3 = vmul.f32 %v4134_v13, %v1293_v49  ;;  %v2006_v27 = vmul.f32 %v4323_v34, %v1967_v42  ;;  %1059 = vst.msk [vmem:[#allocation2 + $0x181] sm:$0xff] %vm972_vm1, %v970_v61  ;;  %v1563_v11 = vadd.f32 %v1531_v9, %v1462_v20 }
 0x1c7   : > { %v4528_v63 = vmul.f32 %v2881_v6, %v4403_v46  ;;  %v1632_v57 = vmul.f32 %v4178_v54, %v1293_v49  ;;  %v2007_v10 = vmul.f32 %v4323_v34, %v1968_v31  ;;  %v1616_v4 = vmul.f32 %v4178_v54, %v4453_v12 }
 0x1c8   : > { %2299 = vst.msk [vmem:[%s3634_s22 + $0xc0] sm:$0xff] %vm972_vm1, %v4522_v22  ;;  %v1262_v43 = vadd.f32 %v4445_v18, %v1129_v25  ;;  %v1564_v52 = vadd.f32 %v4451_v44, %v1463_v58  ;;  %v4540_v23 = vadd.f32 %v4344_v19, %v2006_v27  ;;  %v1315_v46 = vmul.f32 %v4134_v13, %v4424_v26 }
 0x1c9   : > { %2300 = vst.msk [vmem:[%s3634_s22 + $0xc8] sm:$0xff] %vm972_vm1, %v4528_v63  ;;  %v1617_v62 = vmul.f32 %v4178_v54, %v4424_v26  ;;  %v4550_v59 = vadd.f32 %v4344_v19, %v2007_v10  ;;  %v4553_v12 = vmul.f32 %v4288_v41, %v1903_v33  ;;  %v1346_v18 = vadd.f32 %v4472_v36, %v1245_v16 }
 0x1ca   : > { %v1648_v44 = vadd.f32 %v1616_v4, %v1547_v55  ;;  %v4556_v39 = vadd.f32 %v1330_v3, %v1261_v14  ;;  %v2578_v20 = vmul.f32 -1.442695, %v4540_v23  ;;  %v1179_v24 = vld [vmem:[#allocation2 + $0xc9] sm:$0xff]  ;;  %v4559_v8 = vadd.f32 %v1632_v57, %v1563_v11 }
 0x1cb   : > { %v1280_v32 = vld [vmem:[#allocation2 + $0xca] sm:$0xff]  ;;  %v2579_v60 = vmul.f32 -1.442695, %v4550_v59  ;;  %v1077_v26 = vld [vmem:[#allocation2 + $0xc0] sm:$0xff]  ;;  %v1347_v49 = vadd.f32 %v1315_v46, %v4474_v48  ;;  %v1649_v47 = vadd.f32 %v1617_v62, %v1548_v45  ;;  %v1216_v40 = vmul.f32 %v4092_v56, %v1179_v24 }
 0x1cc   : > { %v2883_v38 = vpop.eup %2882  ;;  %2886 = vpow2.f32 %v2578_v20  ;;  %v1078_v36 = vld [vmem:[#allocation2 + $0xc8] sm:$0xff]  ;;  %v4565_v29 = vadd.f32 %v4448_v28, %v1262_v43  ;;  %v4568_v21 = vadd.f32 %v4458_v7, %v1564_v52  ;;  %v1317_v2 = vmul.f32 %v4134_v13, %v1280_v32 }
 0x1cd   : > { %v1178_v30 = vld [vmem:[#allocation2 + $0xc1] sm:$0xff]  ;;  %v2885_v17 = vpop.eup %2884  ;;  %v2157_v9 = vadd.f32 1.0, %v2883_v38  ;;  %2888 = vpow2.f32 %v2579_v60  ;;  %v1518_v48 = vmul.f32 %v4171_v50, %v1179_v24  ;;  %v4572_v25 = vld [vmem:[#allocation2 + $0x189] sm:$0xff]  ;;  %v1619_v42 = vmul.f32 %v4178_v54, %v1280_v32 }
 0x1ce   : > { %v2158_v58 = vadd.f32 1.0, %v2885_v17  ;;  %v1821_v0 = vmul.f32 %v4058_v5, %v1179_v24  ;;  %v1114_v28 = vmul.f32 %v4085_v1, %v1077_v26  ;;  %v1279_v61 = vld [vmem:[#allocation2 + $0xc2] sm:$0xff]  ;;  %v1922_v7 = vmul.f32 %v4288_v41, %v1280_v32 }
 0x1cf   : > { %2890 = vrcp.f32 %v2157_v9  ;;  %v1115_v51 = vmul.f32 %v4085_v1, %v1078_v36  ;;  %v1215_v16 = vmul.f32 %v4092_v56, %v1178_v30  ;;  %v4582_v55 = vmul.f32 %v4171_v50, %v4572_v25  ;;  %v4591_v52 = vld [vmem:[#allocation2 + $0x180] sm:$0xff] }
 0x1d0   : > { %2892 = vrcp.f32 %v2158_v58  ;;  %v1416_v45 = vmul.f32 %v4157_v15, %v1077_v26  ;;  %v1417_v31 = vmul.f32 %v4157_v15, %v1078_v36  ;;  %v1316_v3 = vmul.f32 %v4134_v13, %v1279_v61  ;;  %v4940_v24 = vld [vmem:[#allocation9_spill] sm:$0xff] }
 0x1d1   : > { %v1247_v6 = vadd.f32 %v1215_v16, %v1114_v28  ;;  %v1248_v14 = vadd.f32 %v1216_v40, %v1115_v51  ;;  %v1719_v27 = vmul.f32 %v4042_v35, %v1077_v26  ;;  %v1517_v1 = vmul.f32 %v4171_v50, %v1178_v30  ;;  %v4942_v17 = vld [vmem:[#allocation29_spill] sm:$0xff]  ;;  %v4944_v28 = vld [vmem:[#allocation10_spill] sm:$0xff] }
 0x1d2   : > { %v1448_v33 = vadd.f32 %v1416_v45, %v1346_v18  ;;  %v1449_v11 = vadd.f32 %v1417_v31, %v1347_v49  ;;  %v1720_v56 = vmul.f32 %v4042_v35, %v1078_v36  ;;  %v1820_v43 = vmul.f32 %v4058_v5, %v1178_v30  ;;  %v4941_v18 = vld [vmem:[#allocation13_spill] sm:$0xff]  ;;  %v4945_v16 = vld [vmem:[#allocation14_spill] sm:$0xff] }
 0x1d3   : > { %v1348_v57 = vadd.f32 %v1316_v3, %v1247_v6  ;;  %v1349_v10 = vadd.f32 %v1317_v2, %v1248_v14  ;;  %v1751_v4 = vadd.f32 %v1719_v27, %v1648_v44  ;;  %v1618_v20 = vmul.f32 %v4178_v54, %v1279_v61  ;;  %v4943_v2 = vld [vmem:[#allocation12_spill] sm:$0xff]  ;;  %v4947_v6 = vld [vmem:[#allocation15_spill] sm:$0xff]  ;;  %v1395_v27 = vld [vmem:[#allocation2 + $0x188] sm:$0xff] }
 0x1d4   : > { %v1549_v46 = vadd.f32 %v1517_v1, %v1448_v33  ;;  %v1550_v62 = vadd.f32 %v1518_v48, %v1449_v11  ;;  %v1752_v13 = vadd.f32 %v1720_v56, %v1649_v47  ;;  %v1921_v49 = vmul.f32 %v4288_v41, %v1279_v61  ;;  %v1598_v1 = vld [vmem:[#allocation2 + $0x18a] sm:$0xff] }
 0x1d5   : > { %v1450_v32 = vadd.f32 %v4940_v24, %v1348_v57  ;;  %v1451_v60 = vadd.f32 %v4941_v18, %v1349_v10  ;;  %v1852_v26 = vadd.f32 %v1820_v43, %v1751_v4  ;;  %v1432_v5 = vmul.f32 %v4157_v15, %v4591_v52  ;;  %v4948_v56 = vld [vmem:[#allocation6_spill] sm:$0xff]  ;;  %v4950_v4 = vld [vmem:[#allocation17_spill] sm:$0xff] }
 0x1d6   : > { %v2887_v35 = vpop.eup %2886  ;;  %v1650_v38 = vadd.f32 %v1618_v20, %v1549_v46  ;;  %v1651_v40 = vadd.f32 %v1619_v42, %v1550_v62  ;;  %v1853_v44 = vadd.f32 %v1821_v0, %v1752_v13  ;;  %v4946_v42 = vld [vmem:[#allocation30_spill] sm:$0xff]  ;;  %v4951_v46 = vld [vmem:[#allocation19_spill] sm:$0xff]  ;;  %v4954_v18 = vld [vmem:[#allocation37_spill] sm:$0xff] }
 0x1d7   : > { %v2889_v36 = vpop.eup %2888  ;;  %v2173_v30 = vadd.f32 1.0, %v2887_v35  ;;  %v1551_v9 = vadd.f32 %v4942_v17, %v1450_v32  ;;  %v1552_v47 = vadd.f32 %v4943_v2, %v1451_v60  ;;  %v1953_v48 = vadd.f32 %v1921_v49, %v1852_v26  ;;  %v4952_v20 = vld [vmem:[#allocation38_spill] sm:$0xff] }
 0x1d8   : > { %v2174_v58 = vadd.f32 1.0, %v2889_v36  ;;  %v1753_v51 = vadd.f32 %v4944_v28, %v1650_v38  ;;  %v1754_v45 = vadd.f32 %v4945_v16, %v1651_v40  ;;  %v1954_v61 = vadd.f32 %v1922_v7, %v1853_v44  ;;  %v4949_v7 = vld [vmem:[#allocation36_spill] sm:$0xff]  ;;  %v4956_v44 = vld [vmem:[#allocation11_spill] sm:$0xff]  ;;  %v2951_v17 = vld [vmem:[%s4790_s4 + $0x9] ss:$0 sm:$0xff] }
 0x1d9   : > { %v2891_v31 = vpop.eup %2890  ;;  %2894 = vrcp.f32 %v2173_v30  ;;  %v1652_v0 = vadd.f32 %v4946_v42, %v1551_v9  ;;  %v1653_v14 = vadd.f32 %v4947_v6, %v1552_v47  ;;  %v1992_v3 = vmul.f32 %v4323_v34, %v1953_v48  ;;  %v4955_v38 = vld [vmem:[#allocation24_spill] sm:$0xff]  ;;  %v1496_v48 = vld [vmem:[#allocation2 + $0x181] sm:$0xff] }
 0x1da   : > { %v2893_v33 = vpop.eup %2892  ;;  %v4607_v11 = vmul.f32 %v2891_v31, %v4488_v53  ;;  %2896 = vrcp.f32 %v2174_v58  ;;  %v1854_v57 = vadd.f32 %v4948_v56, %v1753_v51  ;;  %v1855_v10 = vadd.f32 %v4949_v7, %v1754_v45  ;;  %v4953_v53 = vld [vmem:[#allocation8_spill] sm:$0xff]  ;;  %v4957_v58 = vld [vmem:[#allocation39_spill] sm:$0xff]  ;;  %v4958_v51 = vld [vmem:[#allocation21_spill] sm:$0xff] }
 0x1db   : > { %v4612_v43 = vmul.f32 %v2893_v33, %v4950_v4  ;;  %v1755_v62 = vadd.f32 %v4951_v46, %v1652_v0  ;;  %v1756_v13 = vadd.f32 %v4952_v20, %v1653_v14  ;;  %v1993_v24 = vmul.f32 %v4323_v34, %v1954_v61  ;;  %v1597_v31 = vld [vmem:[#allocation2 + $0x182] sm:$0xff] }
 0x1dc   : > { %2285 = vst.msk [vmem:[%s3634_s22 + $0x50] sm:$0xff] %vm972_vm1, %v4607_v11  ;;  %v1955_v32 = vadd.f32 %v4953_v53, %v1854_v57  ;;  %v1956_v60 = vadd.f32 %v4954_v18, %v1855_v10  ;;  %v4623_v26 = vadd.f32 %v4344_v19, %v1992_v3  ;;  %v1433_v49 = vmul.f32 %v4157_v15, %v1395_v27  ;;  %v1902_v53 = vld [vmem:[#allocation2 + $0x19a] sm:$0xff] }
 0x1dd   : > { %2286 = vst.msk [vmem:[%s3634_s22 + $0x58] sm:$0xff] %vm972_vm1, %v4612_v43  ;;  %v1635_v35 = vmul.f32 %v4178_v54, %v1598_v1  ;;  %v1856_v40 = vadd.f32 %v4955_v38, %v1755_v62  ;;  %v1857_v36 = vadd.f32 %v4956_v44, %v1756_v13  ;;  %v4633_v30 = vadd.f32 %v4344_v19, %v1993_v24 }
 0x1de   : > { %v1837_v9 = vmul.f32 %v2951_v17, %v4572_v25  ;;  %v1994_v15 = vmul.f32 %v4323_v34, %v1955_v32  ;;  %v1995_v2 = vmul.f32 %v4323_v34, %v1956_v60  ;;  %v2564_v47 = vmul.f32 -1.442695, %v4623_v26 }
 0x1df   : > { %v1957_v28 = vadd.f32 %v4957_v58, %v1856_v40  ;;  %v1958_v16 = vadd.f32 %v4958_v51, %v1857_v36  ;;  %v2565_v45 = vmul.f32 -1.442695, %v4633_v30  ;;  %v1464_v61 = vadd.f32 %v1432_v5, %v4556_v39  ;;  %v4961_v36 = vld [vmem:[#allocation34_spill] sm:$0xff] }
 0x1e0   : > { %v4647_v42 = vadd.f32 %v4344_v19, %v1994_v15  ;;  %v4650_v25 = vadd.f32 %v4344_v19, %v1995_v2  ;;  %2898 = vpow2.f32 %v2564_v47  ;;  %v1465_v0 = vadd.f32 %v1433_v49, %v4565_v29 }
 0x1e1   : > { %v1996_v6 = vmul.f32 %v4323_v34, %v1957_v28  ;;  %v1997_v14 = vmul.f32 %v4323_v34, %v1958_v16  ;;  %2900 = vpow2.f32 %v2565_v45  ;;  %v1533_v3 = vmul.f32 %v4171_v50, %v1496_v48  ;;  %v2952_v50 = vld [vmem:[%s4790_s4 + $0x8] ss:$0 sm:$0xff] }
 0x1e2   : > { %v2566_v33 = vmul.f32 -1.442695, %v4647_v42  ;;  %v2567_v39 = vmul.f32 -1.442695, %v4650_v25  ;;  %v1566_v5 = vadd.f32 %v4582_v55, %v1465_v0  ;;  %v1634_v56 = vmul.f32 %v4178_v54, %v1597_v31 }
 0x1e3   : > { %v2895_v57 = vpop.eup %2894  ;;  %v4661_v7 = vadd.f32 %v4344_v19, %v1996_v6  ;;  %v4664_v29 = vadd.f32 %v4344_v19, %v1997_v14  ;;  %v1565_v10 = vadd.f32 %v1533_v3, %v1464_v61  ;;  %v1735_v4 = vmul.f32 %v2952_v50, %v4591_v52 }
 0x1e4   : > { %v2897_v46 = vpop.eup %2896  ;;  %v4671_v55 = vmul.f32 %v2895_v57, %v4540_v23  ;;  %2902 = vpow2.f32 %v2566_v33  ;;  %v1667_v54 = vadd.f32 %v1635_v35, %v1566_v5  ;;  %v1736_v62 = vmul.f32 %v2952_v50, %v1395_v27  ;;  %v4960_v35 = vld [vmem:[#allocation16_spill] sm:$0xff] }
 0x1e5   : > { %v4674_v20 = vmul.f32 %v2897_v46, %v4550_v59  ;;  %2904 = vpow2.f32 %v2567_v39  ;;  %v2568_v13 = vmul.f32 -1.442695, %v4661_v7  ;;  %v2569_v24 = vmul.f32 -1.442695, %v4664_v29  ;;  %v4959_v59 = vld [vmem:[#allocation27_spill] sm:$0xff] }
 0x1e6   : > { %2301 = vst.msk [vmem:[%s3634_s22 + $0xd0] sm:$0xff] %vm972_vm1, %v4671_v55  ;;  %v1938_v52 = vmul.f32 %v4288_v41, %v1598_v1  ;;  %v1666_v32 = vadd.f32 %v1634_v56, %v1565_v10  ;;  %v1767_v23 = vadd.f32 %v1735_v4, %v4559_v8  ;;  %v1768_v18 = vadd.f32 %v1736_v62, %v4568_v21  ;;  %v4962_v21 = vld [vmem:[#allocation33_spill] sm:$0xff] }
 0x1e7   : > { %2302 = vst.msk [vmem:[%s3634_s22 + $0xd8] sm:$0xff] %vm972_vm1, %v4674_v20  ;;  %2906 = vpow2.f32 %v2568_v13  ;;  %v1770_v27 = vadd.f32 %v4959_v59, %v1667_v54  ;;  %v1836_v60 = vmul.f32 %v2951_v17, %v1496_v48  ;;  %v1937_v49 = vmul.f32 %v4288_v41, %v1597_v31 }
 0x1e8   : > { %2908 = vpow2.f32 %v2569_v24  ;;  %v1769_v38 = vadd.f32 %v4960_v35, %v1666_v32  ;;  %v1869_v40 = vadd.f32 %v1837_v9, %v1768_v18  ;;  %v1939_v1 = vmul.f32 %v4288_v41, %v1902_v53 }
 0x1e9   : > { %v1868_v44 = vadd.f32 %v1836_v60, %v1767_v23  ;;  %v1871_v8 = vadd.f32 %v4961_v36, %v1770_v27  ;;  %v2326_v3 = vsel %vm972_vm1, %v4607_v11, 0.0  ;;  %v2328_v54 = vsel %vm972_vm1, %v4612_v43, 0.0 }
 0x1ea   : > { %v2899_v15 = vpop.eup %2898  ;;  %v1870_v2 = vadd.f32 %v4962_v21, %v1769_v38  ;;  %v1970_v47 = vadd.f32 %v1938_v52, %v1869_v40  ;;  %v2327_v4 = vadd.f32 %v2326_v3, %v4504_v37  ;;  %v4966_v3 = vld [vmem:[#allocation5_spill] sm:$0xff] }
 0x1eb   : > { %v2901_v58 = vpop.eup %2900  ;;  %v2159_v28 = vadd.f32 1.0, %v2899_v15  ;;  %v1969_v51 = vadd.f32 %v1937_v49, %v1868_v44  ;;  %v1972_v17 = vadd.f32 %v4553_v12, %v1871_v8 }
 0x1ec   : > { %v2160_v48 = vadd.f32 1.0, %v2901_v58  ;;  %v1971_v16 = vadd.f32 %v1939_v1, %v1870_v2  ;;  %v2009_v45 = vmul.f32 %v4323_v34, %v1970_v47  ;;  %v2329_v13 = vadd.f32 %v2328_v54, %v2327_v4 }
 0x1ed   : > { %2910 = vrcp.f32 %v2159_v28  ;;  %v2008_v9 = vmul.f32 %v4323_v34, %v1969_v51  ;;  %v2011_v41 = vmul.f32 %v4323_v34, %v1972_v17  ;;  %v4963_v51 = vld [vmem:[#allocation25_spill] sm:$0xff] }
 0x1ee   : > { %v2903_v61 = vpop.eup %2902  ;;  %2912 = vrcp.f32 %v2160_v48  ;;  %v2010_v31 = vmul.f32 %v4323_v34, %v1971_v16  ;;  %v4699_v0 = vadd.f32 %v4344_v19, %v2009_v45  ;;  %v2342_v17 = vsel %vm972_vm1, %v4963_v51, 0.0  ;;  %v4964_v16 = vld [vmem:[#allocation26_spill] sm:$0xff] }
 0x1ef   : > { %v2905_v6 = vpop.eup %2904  ;;  %v2161_v14 = vadd.f32 1.0, %v2903_v61  ;;  %v4702_v12 = vadd.f32 %v4344_v19, %v2008_v9  ;;  %v4710_v5 = vadd.f32 %v4344_v19, %v2011_v41  ;;  %v2344_v45 = vsel %vm972_vm1, %v4964_v16, 0.0  ;;  %v4965_v61 = vld [vmem:[#allocation4_spill] sm:$0xff] }
 0x1f0   : > { %v2162_v33 = vadd.f32 1.0, %v2905_v6  ;;  %v4707_v39 = vadd.f32 %v4344_v19, %v2010_v31  ;;  %v2581_v50 = vmul.f32 -1.442695, %v4699_v0  ;;  %v2346_v31 = vsel %vm972_vm1, %v4965_v61, 0.0 }
 0x1f1   : > { %v2907_v56 = vpop.eup %2906  ;;  %2914 = vrcp.f32 %v2161_v14  ;;  %v2580_v34 = vmul.f32 -1.442695, %v4702_v12  ;;  %v2583_v19 = vmul.f32 -1.442695, %v4710_v5 }
 0x1f2   : > { %v2909_v57 = vpop.eup %2908  ;;  %v2163_v10 = vadd.f32 1.0, %v2907_v56  ;;  %2916 = vrcp.f32 %v2162_v33  ;;  %v2582_v46 = vmul.f32 -1.442695, %v4707_v39  ;;  %v2348_v33 = vsel %vm972_vm1, %v4966_v3, 0.0 }
 0x1f3   : > { %v2164_v11 = vadd.f32 1.0, %v2909_v57  ;;  %2918 = vpow2.f32 %v2580_v34 }
 0x1f4   : > { %2920 = vrcp.f32 %v2163_v10  ;;  %v4967_v10 = vld [vmem:[#allocation28_spill] sm:$0xff] }
 0x1f5   : > { %2922 = vrcp.f32 %v2164_v11 }
 0x1f6   : > { %2924 = vpow2.f32 %v2581_v50  ;;  %v2350_v50 = vsel %vm972_vm1, %v4967_v10, 0.0 }
 0x1f7   : > { %v2911_v62 = vpop.eup %2910  ;;  %2926 = vpow2.f32 %v2582_v46 }
 0x1f8   : > { %v2913_v24 = vpop.eup %2912  ;;  %v2255_v37 = vmul.f32 %v2911_v62, %v4623_v26  ;;  %2928 = vpow2.f32 %v2583_v19 }
 0x1f9   : > { %v2256_v53 = vmul.f32 %v2913_v24, %v4633_v30  ;;  %v2354_v24 = vsel %vm972_vm1, %v4522_v22, 0.0 }
 0x1fa   : > { %2287 = vst.msk [vmem:[%s3634_s22 + $0x60] sm:$0xff] %vm972_vm1, %v2255_v37  ;;  %v2330_v52 = vsel %vm972_vm1, %v2255_v37, 0.0 }
 0x1fb   : > { %v2915_v32 = vpop.eup %2914  ;;  %2288 = vst.msk [vmem:[%s3634_s22 + $0x68] sm:$0xff] %vm972_vm1, %v2256_v53  ;;  %v2331_v43 = vadd.f32 %v2330_v52, %v2329_v13  ;;  %v2332_v59 = vsel %vm972_vm1, %v2256_v53, 0.0  ;;  %v2358_v53 = vsel %vm972_vm1, %v4671_v55, 0.0 }
 0x1fc   : > { %v2917_v23 = vpop.eup %2916  ;;  %v2257_v18 = vmul.f32 %v2915_v32, %v4647_v42 }
 0x1fd   : > { %v2919_v27 = vpop.eup %2918  ;;  %v2258_v26 = vmul.f32 %v2917_v23, %v4650_v25  ;;  %v2333_v60 = vadd.f32 %v2332_v59, %v2331_v43 }
 0x1fe   : > { %v2921_v30 = vpop.eup %2920  ;;  %2289 = vst.msk [vmem:[%s3634_s22 + $0x70] sm:$0xff] %vm972_vm1, %v2257_v18  ;;  %v2334_v49 = vsel %vm972_vm1, %v2257_v18, 0.0  ;;  %v2175_v35 = vadd.f32 1.0, %v2919_v27 }
 0x1ff   : > { %v2923_v38 = vpop.eup %2922  ;;  %v2259_v40 = vmul.f32 %v2921_v30, %v4661_v7  ;;  %2290 = vst.msk [vmem:[%s3634_s22 + $0x78] sm:$0xff] %vm972_vm1, %v2258_v26  ;;  %v2335_v42 = vadd.f32 %v2334_v49, %v2333_v60  ;;  %v2336_v36 = vsel %vm972_vm1, %v2258_v26, 0.0 }
 0x200   : > { %v2925_v1 = vpop.eup %2924  ;;  %v2260_v44 = vmul.f32 %v2923_v38, %v4664_v29  ;;  %2930 = vrcp.f32 %v2175_v35 }
 0x201   : > { %v2927_v25 = vpop.eup %2926  ;;  %2291 = vst.msk [vmem:[%s3634_s22 + $0x80] sm:$0xff] %vm972_vm1, %v2259_v40  ;;  %v2337_v8 = vadd.f32 %v2336_v36, %v2335_v42  ;;  %v2338_v15 = vsel %vm972_vm1, %v2259_v40, 0.0  ;;  %v2176_v21 = vadd.f32 1.0, %v2925_v1 }
 0x202   : > { %v2929_v2 = vpop.eup %2928  ;;  %2292 = vst.msk [vmem:[%s3634_s22 + $0x88] sm:$0xff] %vm972_vm1, %v2260_v44  ;;  %v2177_v7 = vadd.f32 1.0, %v2927_v25  ;;  %v2340_v29 = vsel %vm972_vm1, %v2260_v44, 0.0 }
 0x203   : > { %v2339_v47 = vadd.f32 %v2338_v15, %v2337_v8  ;;  %v2178_v58 = vadd.f32 1.0, %v2929_v2  ;;  %2932 = vrcp.f32 %v2176_v21 }
 0x204   : > { %2934 = vrcp.f32 %v2177_v7 }
 0x205   : > { %v2341_v28 = vadd.f32 %v2340_v29, %v2339_v47  ;;  %2936 = vrcp.f32 %v2178_v58 }
 0x207   : > { %v2343_v48 = vadd.f32 %v2342_v17, %v2341_v28 }
 0x209   : > { %v2345_v9 = vadd.f32 %v2344_v45, %v2343_v48 }
 0x20a   : > { %v2931_v41 = vpop.eup %2930 }
 0x20b   : > { %v2271_v6 = vmul.f32 %v2931_v41, %v4702_v12  ;;  %v2347_v14 = vadd.f32 %v2346_v31, %v2345_v9  ;;  %v4968_v12 = vld [vmem:[#allocation32_spill] sm:$0xff] }
 0x20c   : > { %v2352_v54 = vsel %vm972_vm1, %v4968_v12, 0.0 }
 0x20d   : > { %v2933_v56 = vpop.eup %2932  ;;  %2303 = vst.msk [vmem:[%s3634_s22 + $0xe0] sm:$0xff] %vm972_vm1, %v2271_v6  ;;  %v2349_v34 = vadd.f32 %v2348_v33, %v2347_v14  ;;  %v2362_v43 = vsel %vm972_vm1, %v2271_v6, 0.0 }
 0x20e   : > { %v2935_v57 = vpop.eup %2934  ;;  %v2272_v4 = vmul.f32 %v2933_v56, %v4699_v0 }
 0x20f   : > { %v2937_v11 = vpop.eup %2936  ;;  %v2273_v46 = vmul.f32 %v2935_v57, %v4707_v39  ;;  %v2351_v19 = vadd.f32 %v2350_v50, %v2349_v34  ;;  %v2356_v39 = vsel %vm972_vm1, %v4528_v63, 0.0 }
 0x210   : > { %v2274_v62 = vmul.f32 %v2937_v11, %v4710_v5  ;;  %2304 = vst.msk [vmem:[%s3634_s22 + $0xe8] sm:$0xff] %vm972_vm1, %v2272_v4  ;;  %v2360_v5 = vsel %vm972_vm1, %v4674_v20, 0.0  ;;  %v2364_v22 = vsel %vm972_vm1, %v2272_v4, 0.0 }
 0x211   : > { %2305 = vst.msk [vmem:[%s3634_s22 + $0xf0] sm:$0xff] %vm972_vm1, %v2273_v46  ;;  %v2353_v13 = vadd.f32 %v2352_v54, %v2351_v19  ;;  %v2366_v59 = vsel %vm972_vm1, %v2273_v46, 0.0 }
 0x212   : > { %2306 = vst.msk [vmem:[%s3634_s22 + $0xf8] sm:$0xff] %vm972_vm1, %v2274_v62  ;;  %v2368_v63 = vsel %vm972_vm1, %v2274_v62, 0.0 }
 0x213   : > { %v2355_v0 = vadd.f32 %v2354_v24, %v2353_v13 }
 0x215   : > { %v2357_v37 = vadd.f32 %v2356_v39, %v2355_v0 }
 0x217   : > { %v2359_v52 = vadd.f32 %v2358_v53, %v2357_v37 }
 0x219   : > { %v2361_v32 = vadd.f32 %v2360_v5, %v2359_v52 }
 0x21b   : > { %v2363_v23 = vadd.f32 %v2362_v43, %v2361_v32 }
 0x21d   : > { %v2365_v18 = vadd.f32 %v2364_v22, %v2363_v23 }
 0x21f   : > { %v2367_v27 = vadd.f32 %v2366_v59, %v2365_v18 }
 0x221   : > { %v2369_v26 = vadd.f32 %v2368_v63, %v2367_v27 }
 0x223   : > { %v2370_v60 = vrot.slane %v2369_v26, 4 }
 0x225   : > { %v2371_v55 = vadd.f32 %v2370_v60, %v2369_v26 }
 0x227   : > { %v2372_v30 = vrot.slane %v2371_v55, 2 }
 0x229   : > { %v2373_v49 = vadd.f32 %v2372_v30, %v2371_v55 }
 0x22b   : > { %v2374_v35 = vrot.slane %v2373_v49, 1 }
 0x22d   : > { %v2375_v20 = vadd.f32 %v2374_v35, %v2373_v49 }
 0x22f   : > { %v2377_v38 = vmul.f32 0.00390625, %v2375_v20 }
 0x231   : > { %2379 = vst.msk [vmem:[%s314_s15] sm:$0x1] %vm2378_vm3, %v2377_v38 }
 0x232 PF: > { %s19_s27 = sadd.s32 1, %s2959_s27  }
 0x233   : > { %p16_p4 = scmp.ge.s32.totalorder %s19_s27, 4  }
 0x235   :  { %18 = sbr.rel (!%p16_p4) target bundleno = 1 (0x1), region = 94 }

</bundles_post_ra>
